<compile_context>
chip_gen: v7x
topology: tpu7x:2x2x1
jax: 0.10.0
libtpu: 0.0.40
codegen_flags: <defaults>
</compile_context>

<pallas_src>
import functools

import jax
import jax.numpy as jnp
from jax.experimental import pallas as pl
from jax.experimental.pallas import tpu as pltpu


# ----------------------------------------------------------------------------
# Fused kernel for one batch block of `bb` rows.
#   x_ref   : (Cin, bb, HWpad)  VMEM, image flattened into the lane dim
#   w*/b*   : 1-D conv weights/biases in SMEM (OIHW flattening)
#   wfc_ref : (C2, HWpad, dpad) VMEM, FC weight permuted to conv2 lane layout
#   bfc_ref : (1, dpad)         VMEM
#   o_ref   : (bb, dpad)        lane-dense logits (padded out_size)
#   h1_ref  : (C1, bb, HWpad)   conv1 activations (scratch)
#   h2_ref  : (C2, bb, HWpad)   conv2 activations (scratch)
# ----------------------------------------------------------------------------
def _micro_cnn_kernel(img_w, sub, x_ref, w1_ref, b1_ref, w2_ref, b2_ref,
                      wfc_ref, bfc_ref, o_ref, h1_ref, h2_ref):
    cin, bb, hwp = x_ref.shape
    c1 = h1_ref.shape[0]
    c2, _, dpad = wfc_ref.shape

    def tap(v, ky, kx):
        # t[p] = v[p + ky*img_w + kx]; valid output positions never wrap, and
        # wrapped lanes only ever feed zero FC weights downstream.
        s = ky * img_w + kx
        if s == 0:
            return v
        return pltpu.roll(v, hwp - s, 1)          # np.roll semantics: -s shift

    def conv3x3_relu(load_in, w_ref, b_ref, n_in, n_out):
        # One roll per (ci, ky, kx) tap, reused across all output channels;
        # independent per-channel accumulators give VALU ILP. Weight scalars
        # are read from SMEM exactly once each.
        accs = [None] * n_out
        for ci in range(n_in):
            v = load_in(ci)                        # (sub, HWpad)
            for ky in range(3):
                for kx in range(3):
                    t = tap(v, ky, kx)
                    for co in range(n_out):
                        w = w_ref[(co * n_in + ci) * 9 + ky * 3 + kx]
                        p = w * t
                        accs[co] = p if accs[co] is None else accs[co] + p
        return [jnp.maximum(accs[co] + b_ref[co], 0.0) for co in range(n_out)]

    # Convolutions on `sub`-row sub-tiles (bounds vreg pressure); all stores
    # are full-tile, lane-dense, unmasked.
    for r in range(0, bb, sub):
        h1 = conv3x3_relu(lambda ci: x_ref[ci, r:r + sub, :],
                          w1_ref, b1_ref, cin, c1)
        for co in range(c1):
            h1_ref[co, r:r + sub, :] = h1[co]

        h2 = conv3x3_relu(lambda ci: h1_ref[ci, r:r + sub, :],
                          w2_ref, b2_ref, c1, c2)
        for co in range(c2):
            h2_ref[co, r:r + sub, :] = h2[co]

    # MLP: per-channel MXU dots over the full bb block (M-dense). w_fc was
    # permuted host-side to this layout, so no flatten / gather is needed.
    acc = jnp.zeros((bb, dpad), jnp.float32)
    for co in range(c2):
        acc = acc + jnp.dot(h2_ref[co], wfc_ref[co],
                            preferred_element_type=jnp.float32)
    o_ref[...] = acc + bfc_ref[...]               # lane-dense unmasked store


def micro_cnn_forward(x, params):
    """x: [B, Cin, H, W] -> [B, out_size]; matches MicroCNN.forward."""
    B, Cin, H, W = x.shape
    C1, _, kh, kw = params["w1"].shape
    C2 = params["w2"].shape[0]
    assert (kh, kw) == (3, 3)
    Ho1, Wo1 = H - 2, W - 2
    Ho2, Wo2 = Ho1 - 2, Wo1 - 2
    Din, Dout = params["w_fc"].shape
    assert Din == C2 * Ho2 * Wo2, (Din, C2 * Ho2 * Wo2)

    HW = H * W
    HWpad = ((HW + 127) // 128) * 128             # lane-dense spatial axis
    dpad = ((Dout + 127) // 128) * 128            # lane-dense output axis

    # Batch tiling: >=8 rows (f32 sublane), <=128 rows (MXU M) per grid step;
    # trailing partial block is zero-padded, never dropped.
    SUB = 8
    bb = min(128, ((B + SUB - 1) // SUB) * SUB)
    Bpad = ((B + bb - 1) // bb) * bb
    grid = (Bpad // bb,)

    f32 = jnp.float32
    # Input relayout (host-side layout plumbing): (B,Cin,H,W)->(Cin,Bpad,HWpad)
    x_prep = jnp.zeros((Cin, Bpad, HWpad), f32).at[:, :B, :HW].set(
        x.astype(f32).reshape(B, Cin, HW).transpose(1, 0, 2))

    # Conv weights flattened to 1-D SMEM (OIHW order), biases 1-D SMEM.
    w1 = params["w1"].astype(f32).reshape(-1)
    b1 = params["b1"].astype(f32)
    w2 = params["w2"].astype(f32).reshape(-1)
    b2 = params["b2"].astype(f32)

    # FC weight permuted to the kernel's conv2 layout: feature (co, y, x) lives
    # at lane y*W + x of channel co; invalid / padded lanes get zero weight.
    wfc4 = jnp.zeros((C2, H, W, dpad), f32).at[:, :Ho2, :Wo2, :Dout].set(
        params["w_fc"].astype(f32).reshape(C2, Ho2, Wo2, Dout))
    wfc = jnp.zeros((C2, HWpad, dpad), f32).at[:, :HW, :].set(
        wfc4.reshape(C2, HW, dpad))
    bfc = jnp.zeros((1, dpad), f32).at[0, :Dout].set(params["b_fc"].astype(f32))

    kernel = functools.partial(_micro_cnn_kernel, W, SUB)
    out = pl.pallas_call(
        kernel,
        out_shape=jax.ShapeDtypeStruct((Bpad, dpad), f32),
        grid=grid,
        in_specs=[
            pl.BlockSpec((Cin, bb, HWpad), lambda g: (0, g, 0)),
            pl.BlockSpec(memory_space=pltpu.MemorySpace.SMEM),     # w1 (1-D)
            pl.BlockSpec(memory_space=pltpu.MemorySpace.SMEM),     # b1
            pl.BlockSpec(memory_space=pltpu.MemorySpace.SMEM),     # w2 (1-D)
            pl.BlockSpec(memory_space=pltpu.MemorySpace.SMEM),     # b2
            pl.BlockSpec((C2, HWpad, dpad), lambda g: (0, 0, 0)),  # w_fc resident
            pl.BlockSpec((1, dpad), lambda g: (0, 0)),             # b_fc resident
        ],
        out_specs=pl.BlockSpec((bb, dpad), lambda g: (g, 0)),
        scratch_shapes=[
            pltpu.VMEM((C1, bb, HWpad), f32),      # conv1 activations
            pltpu.VMEM((C2, bb, HWpad), f32),      # conv2 activations
        ],
        compiler_params=pltpu.CompilerParams(
            dimension_semantics=("parallel",)),
    )(x_prep, w1, b1, w2, b2, wfc, bfc)
    return out[:B, :Dout]


# ----------------------------------------------------------------------------
# Pure-JAX reference (same semantics) for verification.
# ----------------------------------------------------------------------------
def _reference_forward(x, params):
    def block(h, w, b):
        out = jax.lax.conv_general_dilated(
            h.astype(jnp.float32), w.astype(jnp.float32),
            window_strides=(1, 1), padding="VALID",
            dimension_numbers=("NCHW", "OIHW", "NCHW"))
        return jnp.maximum(out + b[None, :, None, None], 0.0)

    h = block(x, params["w1"], params["b1"])
    h = block(h, params["w2"], params["b2"])
    h = h.reshape(h.shape[0], -1)
    return h @ params["w_fc"].astype(jnp.float32) + params["b_fc"]


def init_params(key, in_channels=1, out_size=10):
    k1, k2, k3, k4, k5, k6 = jax.random.split(key, 6)
    return {
        "w1": 0.1 * jax.random.normal(k1, (2, in_channels, 3, 3), jnp.float32),
        "b1": 0.1 * jax.random.normal(k2, (2,), jnp.float32),
        "w2": 0.1 * jax.random.normal(k3, (4, 2, 3, 3), jnp.float32),
        "b2": 0.1 * jax.random.normal(k4, (4,), jnp.float32),
        # Stored as [in, out] (== torch Linear weight transposed); same math.
        "w_fc": 0.02 * jax.random.normal(k5, (24 * 24 * 4, out_size), jnp.float32),
        "b_fc": 0.02 * jax.random.normal(k6, (out_size,), jnp.float32),
    }


if __name__ == "__main__":
    key = jax.random.PRNGKey(0)
    kx, kp = jax.random.split(key)

    B, in_channels, out_size = 2, 1, 10
    # MNIST-shaped input: the MLP's hard-coded 24*24*4 forces 28x28 spatial.
    x = jax.random.normal(kx, (B, in_channels, 28, 28), jnp.float32)
    params = init_params(kp, in_channels=in_channels, out_size=out_size)

    forward = jax.jit(micro_cnn_forward)
    out = jax.block_until_ready(forward(x, params))
    ref = jax.block_until_ready(_reference_forward(x, params))

    assert out.shape == (B, out_size), out.shape
    assert out.dtype == jnp.float32
    max_err = float(jnp.max(jnp.abs(out - ref)))
    assert jnp.allclose(out, ref, atol=1e-4, rtol=1e-4), max_err
    print("KERNEL_OK")
</pallas_src>

<mosaic_0001>
module attributes {stable_mosaic.version = 11 : i64} {
  func.func @_micro_cnn_kernel(%arg0: i32, %arg1: memref<1x8x896xf32, #tpu.memory_space<vmem>>, %arg2: memref<18xf32, #tpu.memory_space<smem>>, %arg3: memref<2xf32, #tpu.memory_space<smem>>, %arg4: memref<72xf32, #tpu.memory_space<smem>>, %arg5: memref<4xf32, #tpu.memory_space<smem>>, %arg6: memref<4x896x128xf32, #tpu.memory_space<vmem>>, %arg7: memref<1x128xf32, #tpu.memory_space<vmem>>, %arg8: memref<8x128xf32, #tpu.memory_space<vmem>>, %arg9: memref<2x8x896xf32, #tpu.memory_space<vmem>>, %arg10: memref<4x8x896xf32, #tpu.memory_space<vmem>>) attributes {dimension_semantics = [#tpu.dimension_semantics<parallel>], iteration_bounds = array<i64: 1>, scalar_prefetch = 0 : i64, scratch_operands = 2 : i64, tpu.core_type = #tpu.core_type<tc>, window_params = [{transform_indices = @transform_0, window_bounds = array<i64: 1, 8, 896>}, {transform_indices = @transform_1, window_bounds = array<i64: 18>}, {transform_indices = @transform_2, window_bounds = array<i64: 2>}, {transform_indices = @transform_3, window_bounds = array<i64: 72>}, {transform_indices = @transform_4, window_bounds = array<i64: 4>}, {pipeline_mode = #tpu.pipeline_mode<synchronous>, transform_indices = @transform_5, window_bounds = array<i64: 4, 896, 128>}, {pipeline_mode = #tpu.pipeline_mode<synchronous>, transform_indices = @transform_6, window_bounds = array<i64: 1, 128>}, {transform_indices = @transform_7, window_bounds = array<i64: 8, 128>}]} {
    %c0 = arith.constant 0 : index
    %c0_0 = arith.constant 0 : index
    %c0_1 = arith.constant 0 : index
    %0 = vector.load %arg1[%c0, %c0_0, %c0_1] : memref<1x8x896xf32, #tpu.memory_space<vmem>>, vector<1x8x896xf32>
    %1 = vector.shape_cast %0 : vector<1x8x896xf32> to vector<8x896xf32>
    %c0_2 = arith.constant 0 : index
    %2 = memref.load %arg2[%c0_2] : memref<18xf32, #tpu.memory_space<smem>>
    %3 = vector.broadcast %2 : f32 to vector<8x896xf32>
    %4 = arith.mulf %3, %1 : vector<8x896xf32>
    %c9 = arith.constant 9 : index
    %5 = memref.load %arg2[%c9] : memref<18xf32, #tpu.memory_space<smem>>
    %6 = vector.broadcast %5 : f32 to vector<8x896xf32>
    %7 = arith.mulf %6, %1 : vector<8x896xf32>
    %c895_i32 = arith.constant 895 : i32
    %8 = tpu.dynamic_rotate %1 by %c895_i32 dim 1 : vector<8x896xf32>, i32 -> vector<8x896xf32>
    %c1 = arith.constant 1 : index
    %9 = memref.load %arg2[%c1] : memref<18xf32, #tpu.memory_space<smem>>
    %10 = vector.broadcast %9 : f32 to vector<8x896xf32>
    %11 = arith.mulf %10, %8 : vector<8x896xf32>
    %12 = arith.addf %4, %11 : vector<8x896xf32>
    %c10 = arith.constant 10 : index
    %13 = memref.load %arg2[%c10] : memref<18xf32, #tpu.memory_space<smem>>
    %14 = vector.broadcast %13 : f32 to vector<8x896xf32>
    %15 = arith.mulf %14, %8 : vector<8x896xf32>
    %16 = arith.addf %7, %15 : vector<8x896xf32>
    %c894_i32 = arith.constant 894 : i32
    %17 = tpu.dynamic_rotate %1 by %c894_i32 dim 1 : vector<8x896xf32>, i32 -> vector<8x896xf32>
    %c2 = arith.constant 2 : index
    %18 = memref.load %arg2[%c2] : memref<18xf32, #tpu.memory_space<smem>>
    %19 = vector.broadcast %18 : f32 to vector<8x896xf32>
    %20 = arith.mulf %19, %17 : vector<8x896xf32>
    %21 = arith.addf %12, %20 : vector<8x896xf32>
    %c11 = arith.constant 11 : index
    %22 = memref.load %arg2[%c11] : memref<18xf32, #tpu.memory_space<smem>>
    %23 = vector.broadcast %22 : f32 to vector<8x896xf32>
    %24 = arith.mulf %23, %17 : vector<8x896xf32>
    %25 = arith.addf %16, %24 : vector<8x896xf32>
    %c868_i32 = arith.constant 868 : i32
    %26 = tpu.dynamic_rotate %1 by %c868_i32 dim 1 : vector<8x896xf32>, i32 -> vector<8x896xf32>
    %c3 = arith.constant 3 : index
    %27 = memref.load %arg2[%c3] : memref<18xf32, #tpu.memory_space<smem>>
    %28 = vector.broadcast %27 : f32 to vector<8x896xf32>
    %29 = arith.mulf %28, %26 : vector<8x896xf32>
    %30 = arith.addf %21, %29 : vector<8x896xf32>
    %c12 = arith.constant 12 : index
    %31 = memref.load %arg2[%c12] : memref<18xf32, #tpu.memory_space<smem>>
    %32 = vector.broadcast %31 : f32 to vector<8x896xf32>
    %33 = arith.mulf %32, %26 : vector<8x896xf32>
    %34 = arith.addf %25, %33 : vector<8x896xf32>
    %c867_i32 = arith.constant 867 : i32
    %35 = tpu.dynamic_rotate %1 by %c867_i32 dim 1 : vector<8x896xf32>, i32 -> vector<8x896xf32>
    %c4 = arith.constant 4 : index
    %36 = memref.load %arg2[%c4] : memref<18xf32, #tpu.memory_space<smem>>
    %37 = vector.broadcast %36 : f32 to vector<8x896xf32>
    %38 = arith.mulf %37, %35 : vector<8x896xf32>
    %39 = arith.addf %30, %38 : vector<8x896xf32>
    %c13 = arith.constant 13 : index
    %40 = memref.load %arg2[%c13] : memref<18xf32, #tpu.memory_space<smem>>
    %41 = vector.broadcast %40 : f32 to vector<8x896xf32>
    %42 = arith.mulf %41, %35 : vector<8x896xf32>
    %43 = arith.addf %34, %42 : vector<8x896xf32>
    %c866_i32 = arith.constant 866 : i32
    %44 = tpu.dynamic_rotate %1 by %c866_i32 dim 1 : vector<8x896xf32>, i32 -> vector<8x896xf32>
    %c5 = arith.constant 5 : index
    %45 = memref.load %arg2[%c5] : memref<18xf32, #tpu.memory_space<smem>>
    %46 = vector.broadcast %45 : f32 to vector<8x896xf32>
    %47 = arith.mulf %46, %44 : vector<8x896xf32>
    %48 = arith.addf %39, %47 : vector<8x896xf32>
    %c14 = arith.constant 14 : index
    %49 = memref.load %arg2[%c14] : memref<18xf32, #tpu.memory_space<smem>>
    %50 = vector.broadcast %49 : f32 to vector<8x896xf32>
    %51 = arith.mulf %50, %44 : vector<8x896xf32>
    %52 = arith.addf %43, %51 : vector<8x896xf32>
    %c840_i32 = arith.constant 840 : i32
    %53 = tpu.dynamic_rotate %1 by %c840_i32 dim 1 : vector<8x896xf32>, i32 -> vector<8x896xf32>
    %c6 = arith.constant 6 : index
    %54 = memref.load %arg2[%c6] : memref<18xf32, #tpu.memory_space<smem>>
    %55 = vector.broadcast %54 : f32 to vector<8x896xf32>
    %56 = arith.mulf %55, %53 : vector<8x896xf32>
    %57 = arith.addf %48, %56 : vector<8x896xf32>
    %c15 = arith.constant 15 : index
    %58 = memref.load %arg2[%c15] : memref<18xf32, #tpu.memory_space<smem>>
    %59 = vector.broadcast %58 : f32 to vector<8x896xf32>
    %60 = arith.mulf %59, %53 : vector<8x896xf32>
    %61 = arith.addf %52, %60 : vector<8x896xf32>
    %c839_i32 = arith.constant 839 : i32
    %62 = tpu.dynamic_rotate %1 by %c839_i32 dim 1 : vector<8x896xf32>, i32 -> vector<8x896xf32>
    %c7 = arith.constant 7 : index
    %63 = memref.load %arg2[%c7] : memref<18xf32, #tpu.memory_space<smem>>
    %64 = vector.broadcast %63 : f32 to vector<8x896xf32>
    %65 = arith.mulf %64, %62 : vector<8x896xf32>
    %66 = arith.addf %57, %65 : vector<8x896xf32>
    %c16 = arith.constant 16 : index
    %67 = memref.load %arg2[%c16] : memref<18xf32, #tpu.memory_space<smem>>
    %68 = vector.broadcast %67 : f32 to vector<8x896xf32>
    %69 = arith.mulf %68, %62 : vector<8x896xf32>
    %70 = arith.addf %61, %69 : vector<8x896xf32>
    %c838_i32 = arith.constant 838 : i32
    %71 = tpu.dynamic_rotate %1 by %c838_i32 dim 1 : vector<8x896xf32>, i32 -> vector<8x896xf32>
    %c8 = arith.constant 8 : index
    %72 = memref.load %arg2[%c8] : memref<18xf32, #tpu.memory_space<smem>>
    %73 = vector.broadcast %72 : f32 to vector<8x896xf32>
    %74 = arith.mulf %73, %71 : vector<8x896xf32>
    %75 = arith.addf %66, %74 : vector<8x896xf32>
    %c17 = arith.constant 17 : index
    %76 = memref.load %arg2[%c17] : memref<18xf32, #tpu.memory_space<smem>>
    %77 = vector.broadcast %76 : f32 to vector<8x896xf32>
    %78 = arith.mulf %77, %71 : vector<8x896xf32>
    %79 = arith.addf %70, %78 : vector<8x896xf32>
    %c0_3 = arith.constant 0 : index
    %80 = memref.load %arg3[%c0_3] : memref<2xf32, #tpu.memory_space<smem>>
    %81 = vector.broadcast %80 : f32 to vector<8x896xf32>
    %82 = arith.addf %75, %81 : vector<8x896xf32>
    %cst = arith.constant 0.000000e+00 : f32
    %83 = vector.broadcast %cst : f32 to vector<8x896xf32>
    %84 = arith.maximumf %82, %83 : vector<8x896xf32>
    %c1_4 = arith.constant 1 : index
    %85 = memref.load %arg3[%c1_4] : memref<2xf32, #tpu.memory_space<smem>>
    %86 = vector.broadcast %85 : f32 to vector<8x896xf32>
    %87 = arith.addf %79, %86 : vector<8x896xf32>
    %cst_5 = arith.constant 0.000000e+00 : f32
    %88 = vector.broadcast %cst_5 : f32 to vector<8x896xf32>
    %89 = arith.maximumf %87, %88 : vector<8x896xf32>
    %c0_6 = arith.constant 0 : index
    %c0_7 = arith.constant 0 : index
    %c0_8 = arith.constant 0 : index
    %90 = vector.load %arg9[%c0_6, %c0_7, %c0_8] : memref<2x8x896xf32, #tpu.memory_space<vmem>>, vector<1x8x896xf32>
    %91 = vector.shape_cast %90 : vector<1x8x896xf32> to vector<8x896xf32>
    %92 = vector.shape_cast %84 : vector<8x896xf32> to vector<1x8x896xf32>
    tpu.vector_store %arg9[%c0_6, %c0_7, %c0_8], %92 {strides = array<i32>} : memref<2x8x896xf32, #tpu.memory_space<vmem>>, vector<1x8x896xf32>,
    %c1_9 = arith.constant 1 : index
    %c0_10 = arith.constant 0 : index
    %c0_11 = arith.constant 0 : index
    %93 = vector.load %arg9[%c1_9, %c0_10, %c0_11] : memref<2x8x896xf32, #tpu.memory_space<vmem>>, vector<1x8x896xf32>
    %94 = vector.shape_cast %93 : vector<1x8x896xf32> to vector<8x896xf32>
    %95 = vector.shape_cast %89 : vector<8x896xf32> to vector<1x8x896xf32>
    tpu.vector_store %arg9[%c1_9, %c0_10, %c0_11], %95 {strides = array<i32>} : memref<2x8x896xf32, #tpu.memory_space<vmem>>, vector<1x8x896xf32>,
    %c0_12 = arith.constant 0 : index
    %c0_13 = arith.constant 0 : index
    %c0_14 = arith.constant 0 : index
    %96 = vector.load %arg9[%c0_12, %c0_13, %c0_14] : memref<2x8x896xf32, #tpu.memory_space<vmem>>, vector<1x8x896xf32>
    %97 = vector.shape_cast %96 : vector<1x8x896xf32> to vector<8x896xf32>
    %c0_15 = arith.constant 0 : index
    %98 = memref.load %arg4[%c0_15] : memref<72xf32, #tpu.memory_space<smem>>
    %99 = vector.broadcast %98 : f32 to vector<8x896xf32>
    %100 = arith.mulf %99, %97 : vector<8x896xf32>
    %c18 = arith.constant 18 : index
    %101 = memref.load %arg4[%c18] : memref<72xf32, #tpu.memory_space<smem>>
    %102 = vector.broadcast %101 : f32 to vector<8x896xf32>
    %103 = arith.mulf %102, %97 : vector<8x896xf32>
    %c36 = arith.constant 36 : index
    %104 = memref.load %arg4[%c36] : memref<72xf32, #tpu.memory_space<smem>>
    %105 = vector.broadcast %104 : f32 to vector<8x896xf32>
    %106 = arith.mulf %105, %97 : vector<8x896xf32>
    %c54 = arith.constant 54 : index
    %107 = memref.load %arg4[%c54] : memref<72xf32, #tpu.memory_space<smem>>
    %108 = vector.broadcast %107 : f32 to vector<8x896xf32>
    %109 = arith.mulf %108, %97 : vector<8x896xf32>
    %c895_i32_16 = arith.constant 895 : i32
    %110 = tpu.dynamic_rotate %97 by %c895_i32_16 dim 1 : vector<8x896xf32>, i32 -> vector<8x896xf32>
    %c1_17 = arith.constant 1 : index
    %111 = memref.load %arg4[%c1_17] : memref<72xf32, #tpu.memory_space<smem>>
    %112 = vector.broadcast %111 : f32 to vector<8x896xf32>
    %113 = arith.mulf %112, %110 : vector<8x896xf32>
    %114 = arith.addf %100, %113 : vector<8x896xf32>
    %c19 = arith.constant 19 : index
    %115 = memref.load %arg4[%c19] : memref<72xf32, #tpu.memory_space<smem>>
    %116 = vector.broadcast %115 : f32 to vector<8x896xf32>
    %117 = arith.mulf %116, %110 : vector<8x896xf32>
    %118 = arith.addf %103, %117 : vector<8x896xf32>
    %c37 = arith.constant 37 : index
    %119 = memref.load %arg4[%c37] : memref<72xf32, #tpu.memory_space<smem>>
    %120 = vector.broadcast %119 : f32 to vector<8x896xf32>
    %121 = arith.mulf %120, %110 : vector<8x896xf32>
    %122 = arith.addf %106, %121 : vector<8x896xf32>
    %c55 = arith.constant 55 : index
    %123 = memref.load %arg4[%c55] : memref<72xf32, #tpu.memory_space<smem>>
    %124 = vector.broadcast %123 : f32 to vector<8x896xf32>
    %125 = arith.mulf %124, %110 : vector<8x896xf32>
    %126 = arith.addf %109, %125 : vector<8x896xf32>
    %c894_i32_18 = arith.constant 894 : i32
    %127 = tpu.dynamic_rotate %97 by %c894_i32_18 dim 1 : vector<8x896xf32>, i32 -> vector<8x896xf32>
    %c2_19 = arith.constant 2 : index
    %128 = memref.load %arg4[%c2_19] : memref<72xf32, #tpu.memory_space<smem>>
    %129 = vector.broadcast %128 : f32 to vector<8x896xf32>
    %130 = arith.mulf %129, %127 : vector<8x896xf32>
    %131 = arith.addf %114, %130 : vector<8x896xf32>
    %c20 = arith.constant 20 : index
    %132 = memref.load %arg4[%c20] : memref<72xf32, #tpu.memory_space<smem>>
    %133 = vector.broadcast %132 : f32 to vector<8x896xf32>
    %134 = arith.mulf %133, %127 : vector<8x896xf32>
    %135 = arith.addf %118, %134 : vector<8x896xf32>
    %c38 = arith.constant 38 : index
    %136 = memref.load %arg4[%c38] : memref<72xf32, #tpu.memory_space<smem>>
    %137 = vector.broadcast %136 : f32 to vector<8x896xf32>
    %138 = arith.mulf %137, %127 : vector<8x896xf32>
    %139 = arith.addf %122, %138 : vector<8x896xf32>
    %c56 = arith.constant 56 : index
    %140 = memref.load %arg4[%c56] : memref<72xf32, #tpu.memory_space<smem>>
    %141 = vector.broadcast %140 : f32 to vector<8x896xf32>
    %142 = arith.mulf %141, %127 : vector<8x896xf32>
    %143 = arith.addf %126, %142 : vector<8x896xf32>
    %c868_i32_20 = arith.constant 868 : i32
    %144 = tpu.dynamic_rotate %97 by %c868_i32_20 dim 1 : vector<8x896xf32>, i32 -> vector<8x896xf32>
    %c3_21 = arith.constant 3 : index
    %145 = memref.load %arg4[%c3_21] : memref<72xf32, #tpu.memory_space<smem>>
    %146 = vector.broadcast %145 : f32 to vector<8x896xf32>
    %147 = arith.mulf %146, %144 : vector<8x896xf32>
    %148 = arith.addf %131, %147 : vector<8x896xf32>
    %c21 = arith.constant 21 : index
    %149 = memref.load %arg4[%c21] : memref<72xf32, #tpu.memory_space<smem>>
    %150 = vector.broadcast %149 : f32 to vector<8x896xf32>
    %151 = arith.mulf %150, %144 : vector<8x896xf32>
    %152 = arith.addf %135, %151 : vector<8x896xf32>
    %c39 = arith.constant 39 : index
    %153 = memref.load %arg4[%c39] : memref<72xf32, #tpu.memory_space<smem>>
    %154 = vector.broadcast %153 : f32 to vector<8x896xf32>
    %155 = arith.mulf %154, %144 : vector<8x896xf32>
    %156 = arith.addf %139, %155 : vector<8x896xf32>
    %c57 = arith.constant 57 : index
    %157 = memref.load %arg4[%c57] : memref<72xf32, #tpu.memory_space<smem>>
    %158 = vector.broadcast %157 : f32 to vector<8x896xf32>
    %159 = arith.mulf %158, %144 : vector<8x896xf32>
    %160 = arith.addf %143, %159 : vector<8x896xf32>
    %c867_i32_22 = arith.constant 867 : i32
    %161 = tpu.dynamic_rotate %97 by %c867_i32_22 dim 1 : vector<8x896xf32>, i32 -> vector<8x896xf32>
    %c4_23 = arith.constant 4 : index
    %162 = memref.load %arg4[%c4_23] : memref<72xf32, #tpu.memory_space<smem>>
    %163 = vector.broadcast %162 : f32 to vector<8x896xf32>
    %164 = arith.mulf %163, %161 : vector<8x896xf32>
    %165 = arith.addf %148, %164 : vector<8x896xf32>
    %c22 = arith.constant 22 : index
    %166 = memref.load %arg4[%c22] : memref<72xf32, #tpu.memory_space<smem>>
    %167 = vector.broadcast %166 : f32 to vector<8x896xf32>
    %168 = arith.mulf %167, %161 : vector<8x896xf32>
    %169 = arith.addf %152, %168 : vector<8x896xf32>
    %c40 = arith.constant 40 : index
    %170 = memref.load %arg4[%c40] : memref<72xf32, #tpu.memory_space<smem>>
    %171 = vector.broadcast %170 : f32 to vector<8x896xf32>
    %172 = arith.mulf %171, %161 : vector<8x896xf32>
    %173 = arith.addf %156, %172 : vector<8x896xf32>
    %c58 = arith.constant 58 : index
    %174 = memref.load %arg4[%c58] : memref<72xf32, #tpu.memory_space<smem>>
    %175 = vector.broadcast %174 : f32 to vector<8x896xf32>
    %176 = arith.mulf %175, %161 : vector<8x896xf32>
    %177 = arith.addf %160, %176 : vector<8x896xf32>
    %c866_i32_24 = arith.constant 866 : i32
    %178 = tpu.dynamic_rotate %97 by %c866_i32_24 dim 1 : vector<8x896xf32>, i32 -> vector<8x896xf32>
    %c5_25 = arith.constant 5 : index
    %179 = memref.load %arg4[%c5_25] : memref<72xf32, #tpu.memory_space<smem>>
    %180 = vector.broadcast %179 : f32 to vector<8x896xf32>
    %181 = arith.mulf %180, %178 : vector<8x896xf32>
    %182 = arith.addf %165, %181 : vector<8x896xf32>
    %c23 = arith.constant 23 : index
    %183 = memref.load %arg4[%c23] : memref<72xf32, #tpu.memory_space<smem>>
    %184 = vector.broadcast %183 : f32 to vector<8x896xf32>
    %185 = arith.mulf %184, %178 : vector<8x896xf32>
    %186 = arith.addf %169, %185 : vector<8x896xf32>
    %c41 = arith.constant 41 : index
    %187 = memref.load %arg4[%c41] : memref<72xf32, #tpu.memory_space<smem>>
    %188 = vector.broadcast %187 : f32 to vector<8x896xf32>
    %189 = arith.mulf %188, %178 : vector<8x896xf32>
    %190 = arith.addf %173, %189 : vector<8x896xf32>
    %c59 = arith.constant 59 : index
    %191 = memref.load %arg4[%c59] : memref<72xf32, #tpu.memory_space<smem>>
    %192 = vector.broadcast %191 : f32 to vector<8x896xf32>
    %193 = arith.mulf %192, %178 : vector<8x896xf32>
    %194 = arith.addf %177, %193 : vector<8x896xf32>
    %c840_i32_26 = arith.constant 840 : i32
    %195 = tpu.dynamic_rotate %97 by %c840_i32_26 dim 1 : vector<8x896xf32>, i32 -> vector<8x896xf32>
    %c6_27 = arith.constant 6 : index
    %196 = memref.load %arg4[%c6_27] : memref<72xf32, #tpu.memory_space<smem>>
    %197 = vector.broadcast %196 : f32 to vector<8x896xf32>
    %198 = arith.mulf %197, %195 : vector<8x896xf32>
    %199 = arith.addf %182, %198 : vector<8x896xf32>
    %c24 = arith.constant 24 : index
    %200 = memref.load %arg4[%c24] : memref<72xf32, #tpu.memory_space<smem>>
    %201 = vector.broadcast %200 : f32 to vector<8x896xf32>
    %202 = arith.mulf %201, %195 : vector<8x896xf32>
    %203 = arith.addf %186, %202 : vector<8x896xf32>
    %c42 = arith.constant 42 : index
    %204 = memref.load %arg4[%c42] : memref<72xf32, #tpu.memory_space<smem>>
    %205 = vector.broadcast %204 : f32 to vector<8x896xf32>
    %206 = arith.mulf %205, %195 : vector<8x896xf32>
    %207 = arith.addf %190, %206 : vector<8x896xf32>
    %c60 = arith.constant 60 : index
    %208 = memref.load %arg4[%c60] : memref<72xf32, #tpu.memory_space<smem>>
    %209 = vector.broadcast %208 : f32 to vector<8x896xf32>
    %210 = arith.mulf %209, %195 : vector<8x896xf32>
    %211 = arith.addf %194, %210 : vector<8x896xf32>
    %c839_i32_28 = arith.constant 839 : i32
    %212 = tpu.dynamic_rotate %97 by %c839_i32_28 dim 1 : vector<8x896xf32>, i32 -> vector<8x896xf32>
    %c7_29 = arith.constant 7 : index
    %213 = memref.load %arg4[%c7_29] : memref<72xf32, #tpu.memory_space<smem>>
    %214 = vector.broadcast %213 : f32 to vector<8x896xf32>
    %215 = arith.mulf %214, %212 : vector<8x896xf32>
    %216 = arith.addf %199, %215 : vector<8x896xf32>
    %c25 = arith.constant 25 : index
    %217 = memref.load %arg4[%c25] : memref<72xf32, #tpu.memory_space<smem>>
    %218 = vector.broadcast %217 : f32 to vector<8x896xf32>
    %219 = arith.mulf %218, %212 : vector<8x896xf32>
    %220 = arith.addf %203, %219 : vector<8x896xf32>
    %c43 = arith.constant 43 : index
    %221 = memref.load %arg4[%c43] : memref<72xf32, #tpu.memory_space<smem>>
    %222 = vector.broadcast %221 : f32 to vector<8x896xf32>
    %223 = arith.mulf %222, %212 : vector<8x896xf32>
    %224 = arith.addf %207, %223 : vector<8x896xf32>
    %c61 = arith.constant 61 : index
    %225 = memref.load %arg4[%c61] : memref<72xf32, #tpu.memory_space<smem>>
    %226 = vector.broadcast %225 : f32 to vector<8x896xf32>
    %227 = arith.mulf %226, %212 : vector<8x896xf32>
    %228 = arith.addf %211, %227 : vector<8x896xf32>
    %c838_i32_30 = arith.constant 838 : i32
    %229 = tpu.dynamic_rotate %97 by %c838_i32_30 dim 1 : vector<8x896xf32>, i32 -> vector<8x896xf32>
    %c8_31 = arith.constant 8 : index
    %230 = memref.load %arg4[%c8_31] : memref<72xf32, #tpu.memory_space<smem>>
    %231 = vector.broadcast %230 : f32 to vector<8x896xf32>
    %232 = arith.mulf %231, %229 : vector<8x896xf32>
    %233 = arith.addf %216, %232 : vector<8x896xf32>
    %c26 = arith.constant 26 : index
    %234 = memref.load %arg4[%c26] : memref<72xf32, #tpu.memory_space<smem>>
    %235 = vector.broadcast %234 : f32 to vector<8x896xf32>
    %236 = arith.mulf %235, %229 : vector<8x896xf32>
    %237 = arith.addf %220, %236 : vector<8x896xf32>
    %c44 = arith.constant 44 : index
    %238 = memref.load %arg4[%c44] : memref<72xf32, #tpu.memory_space<smem>>
    %239 = vector.broadcast %238 : f32 to vector<8x896xf32>
    %240 = arith.mulf %239, %229 : vector<8x896xf32>
    %241 = arith.addf %224, %240 : vector<8x896xf32>
    %c62 = arith.constant 62 : index
    %242 = memref.load %arg4[%c62] : memref<72xf32, #tpu.memory_space<smem>>
    %243 = vector.broadcast %242 : f32 to vector<8x896xf32>
    %244 = arith.mulf %243, %229 : vector<8x896xf32>
    %245 = arith.addf %228, %244 : vector<8x896xf32>
    %c1_32 = arith.constant 1 : index
    %c0_33 = arith.constant 0 : index
    %c0_34 = arith.constant 0 : index
    %246 = vector.load %arg9[%c1_32, %c0_33, %c0_34] : memref<2x8x896xf32, #tpu.memory_space<vmem>>, vector<1x8x896xf32>
    %247 = vector.shape_cast %246 : vector<1x8x896xf32> to vector<8x896xf32>
    %c9_35 = arith.constant 9 : index
    %248 = memref.load %arg4[%c9_35] : memref<72xf32, #tpu.memory_space<smem>>
    %249 = vector.broadcast %248 : f32 to vector<8x896xf32>
    %250 = arith.mulf %249, %247 : vector<8x896xf32>
    %251 = arith.addf %233, %250 : vector<8x896xf32>
    %c27 = arith.constant 27 : index
    %252 = memref.load %arg4[%c27] : memref<72xf32, #tpu.memory_space<smem>>
    %253 = vector.broadcast %252 : f32 to vector<8x896xf32>
    %254 = arith.mulf %253, %247 : vector<8x896xf32>
    %255 = arith.addf %237, %254 : vector<8x896xf32>
    %c45 = arith.constant 45 : index
    %256 = memref.load %arg4[%c45] : memref<72xf32, #tpu.memory_space<smem>>
    %257 = vector.broadcast %256 : f32 to vector<8x896xf32>
    %258 = arith.mulf %257, %247 : vector<8x896xf32>
    %259 = arith.addf %241, %258 : vector<8x896xf32>
    %c63 = arith.constant 63 : index
    %260 = memref.load %arg4[%c63] : memref<72xf32, #tpu.memory_space<smem>>
    %261 = vector.broadcast %260 : f32 to vector<8x896xf32>
    %262 = arith.mulf %261, %247 : vector<8x896xf32>
    %263 = arith.addf %245, %262 : vector<8x896xf32>
    %c895_i32_36 = arith.constant 895 : i32
    %264 = tpu.dynamic_rotate %247 by %c895_i32_36 dim 1 : vector<8x896xf32>, i32 -> vector<8x896xf32>
    %c10_37 = arith.constant 10 : index
    %265 = memref.load %arg4[%c10_37] : memref<72xf32, #tpu.memory_space<smem>>
    %266 = vector.broadcast %265 : f32 to vector<8x896xf32>
    %267 = arith.mulf %266, %264 : vector<8x896xf32>
    %268 = arith.addf %251, %267 : vector<8x896xf32>
    %c28 = arith.constant 28 : index
    %269 = memref.load %arg4[%c28] : memref<72xf32, #tpu.memory_space<smem>>
    %270 = vector.broadcast %269 : f32 to vector<8x896xf32>
    %271 = arith.mulf %270, %264 : vector<8x896xf32>
    %272 = arith.addf %255, %271 : vector<8x896xf32>
    %c46 = arith.constant 46 : index
    %273 = memref.load %arg4[%c46] : memref<72xf32, #tpu.memory_space<smem>>
    %274 = vector.broadcast %273 : f32 to vector<8x896xf32>
    %275 = arith.mulf %274, %264 : vector<8x896xf32>
    %276 = arith.addf %259, %275 : vector<8x896xf32>
    %c64 = arith.constant 64 : index
    %277 = memref.load %arg4[%c64] : memref<72xf32, #tpu.memory_space<smem>>
    %278 = vector.broadcast %277 : f32 to vector<8x896xf32>
    %279 = arith.mulf %278, %264 : vector<8x896xf32>
    %280 = arith.addf %263, %279 : vector<8x896xf32>
    %c894_i32_38 = arith.constant 894 : i32
    %281 = tpu.dynamic_rotate %247 by %c894_i32_38 dim 1 : vector<8x896xf32>, i32 -> vector<8x896xf32>
    %c11_39 = arith.constant 11 : index
    %282 = memref.load %arg4[%c11_39] : memref<72xf32, #tpu.memory_space<smem>>
    %283 = vector.broadcast %282 : f32 to vector<8x896xf32>
    %284 = arith.mulf %283, %281 : vector<8x896xf32>
    %285 = arith.addf %268, %284 : vector<8x896xf32>
    %c29 = arith.constant 29 : index
    %286 = memref.load %arg4[%c29] : memref<72xf32, #tpu.memory_space<smem>>
    %287 = vector.broadcast %286 : f32 to vector<8x896xf32>
    %288 = arith.mulf %287, %281 : vector<8x896xf32>
    %289 = arith.addf %272, %288 : vector<8x896xf32>
    %c47 = arith.constant 47 : index
    %290 = memref.load %arg4[%c47] : memref<72xf32, #tpu.memory_space<smem>>
    %291 = vector.broadcast %290 : f32 to vector<8x896xf32>
    %292 = arith.mulf %291, %281 : vector<8x896xf32>
    %293 = arith.addf %276, %292 : vector<8x896xf32>
    %c65 = arith.constant 65 : index
    %294 = memref.load %arg4[%c65] : memref<72xf32, #tpu.memory_space<smem>>
    %295 = vector.broadcast %294 : f32 to vector<8x896xf32>
    %296 = arith.mulf %295, %281 : vector<8x896xf32>
    %297 = arith.addf %280, %296 : vector<8x896xf32>
    %c868_i32_40 = arith.constant 868 : i32
    %298 = tpu.dynamic_rotate %247 by %c868_i32_40 dim 1 : vector<8x896xf32>, i32 -> vector<8x896xf32>
    %c12_41 = arith.constant 12 : index
    %299 = memref.load %arg4[%c12_41] : memref<72xf32, #tpu.memory_space<smem>>
    %300 = vector.broadcast %299 : f32 to vector<8x896xf32>
    %301 = arith.mulf %300, %298 : vector<8x896xf32>
    %302 = arith.addf %285, %301 : vector<8x896xf32>
    %c30 = arith.constant 30 : index
    %303 = memref.load %arg4[%c30] : memref<72xf32, #tpu.memory_space<smem>>
    %304 = vector.broadcast %303 : f32 to vector<8x896xf32>
    %305 = arith.mulf %304, %298 : vector<8x896xf32>
    %306 = arith.addf %289, %305 : vector<8x896xf32>
    %c48 = arith.constant 48 : index
    %307 = memref.load %arg4[%c48] : memref<72xf32, #tpu.memory_space<smem>>
    %308 = vector.broadcast %307 : f32 to vector<8x896xf32>
    %309 = arith.mulf %308, %298 : vector<8x896xf32>
    %310 = arith.addf %293, %309 : vector<8x896xf32>
    %c66 = arith.constant 66 : index
    %311 = memref.load %arg4[%c66] : memref<72xf32, #tpu.memory_space<smem>>
    %312 = vector.broadcast %311 : f32 to vector<8x896xf32>
    %313 = arith.mulf %312, %298 : vector<8x896xf32>
    %314 = arith.addf %297, %313 : vector<8x896xf32>
    %c867_i32_42 = arith.constant 867 : i32
    %315 = tpu.dynamic_rotate %247 by %c867_i32_42 dim 1 : vector<8x896xf32>, i32 -> vector<8x896xf32>
    %c13_43 = arith.constant 13 : index
    %316 = memref.load %arg4[%c13_43] : memref<72xf32, #tpu.memory_space<smem>>
    %317 = vector.broadcast %316 : f32 to vector<8x896xf32>
    %318 = arith.mulf %317, %315 : vector<8x896xf32>
    %319 = arith.addf %302, %318 : vector<8x896xf32>
    %c31 = arith.constant 31 : index
    %320 = memref.load %arg4[%c31] : memref<72xf32, #tpu.memory_space<smem>>
    %321 = vector.broadcast %320 : f32 to vector<8x896xf32>
    %322 = arith.mulf %321, %315 : vector<8x896xf32>
    %323 = arith.addf %306, %322 : vector<8x896xf32>
    %c49 = arith.constant 49 : index
    %324 = memref.load %arg4[%c49] : memref<72xf32, #tpu.memory_space<smem>>
    %325 = vector.broadcast %324 : f32 to vector<8x896xf32>
    %326 = arith.mulf %325, %315 : vector<8x896xf32>
    %327 = arith.addf %310, %326 : vector<8x896xf32>
    %c67 = arith.constant 67 : index
    %328 = memref.load %arg4[%c67] : memref<72xf32, #tpu.memory_space<smem>>
    %329 = vector.broadcast %328 : f32 to vector<8x896xf32>
    %330 = arith.mulf %329, %315 : vector<8x896xf32>
    %331 = arith.addf %314, %330 : vector<8x896xf32>
    %c866_i32_44 = arith.constant 866 : i32
    %332 = tpu.dynamic_rotate %247 by %c866_i32_44 dim 1 : vector<8x896xf32>, i32 -> vector<8x896xf32>
    %c14_45 = arith.constant 14 : index
    %333 = memref.load %arg4[%c14_45] : memref<72xf32, #tpu.memory_space<smem>>
    %334 = vector.broadcast %333 : f32 to vector<8x896xf32>
    %335 = arith.mulf %334, %332 : vector<8x896xf32>
    %336 = arith.addf %319, %335 : vector<8x896xf32>
    %c32 = arith.constant 32 : index
    %337 = memref.load %arg4[%c32] : memref<72xf32, #tpu.memory_space<smem>>
    %338 = vector.broadcast %337 : f32 to vector<8x896xf32>
    %339 = arith.mulf %338, %332 : vector<8x896xf32>
    %340 = arith.addf %323, %339 : vector<8x896xf32>
    %c50 = arith.constant 50 : index
    %341 = memref.load %arg4[%c50] : memref<72xf32, #tpu.memory_space<smem>>
    %342 = vector.broadcast %341 : f32 to vector<8x896xf32>
    %343 = arith.mulf %342, %332 : vector<8x896xf32>
    %344 = arith.addf %327, %343 : vector<8x896xf32>
    %c68 = arith.constant 68 : index
    %345 = memref.load %arg4[%c68] : memref<72xf32, #tpu.memory_space<smem>>
    %346 = vector.broadcast %345 : f32 to vector<8x896xf32>
    %347 = arith.mulf %346, %332 : vector<8x896xf32>
    %348 = arith.addf %331, %347 : vector<8x896xf32>
    %c840_i32_46 = arith.constant 840 : i32
    %349 = tpu.dynamic_rotate %247 by %c840_i32_46 dim 1 : vector<8x896xf32>, i32 -> vector<8x896xf32>
    %c15_47 = arith.constant 15 : index
    %350 = memref.load %arg4[%c15_47] : memref<72xf32, #tpu.memory_space<smem>>
    %351 = vector.broadcast %350 : f32 to vector<8x896xf32>
    %352 = arith.mulf %351, %349 : vector<8x896xf32>
    %353 = arith.addf %336, %352 : vector<8x896xf32>
    %c33 = arith.constant 33 : index
    %354 = memref.load %arg4[%c33] : memref<72xf32, #tpu.memory_space<smem>>
    %355 = vector.broadcast %354 : f32 to vector<8x896xf32>
    %356 = arith.mulf %355, %349 : vector<8x896xf32>
    %357 = arith.addf %340, %356 : vector<8x896xf32>
    %c51 = arith.constant 51 : index
    %358 = memref.load %arg4[%c51] : memref<72xf32, #tpu.memory_space<smem>>
    %359 = vector.broadcast %358 : f32 to vector<8x896xf32>
    %360 = arith.mulf %359, %349 : vector<8x896xf32>
    %361 = arith.addf %344, %360 : vector<8x896xf32>
    %c69 = arith.constant 69 : index
    %362 = memref.load %arg4[%c69] : memref<72xf32, #tpu.memory_space<smem>>
    %363 = vector.broadcast %362 : f32 to vector<8x896xf32>
    %364 = arith.mulf %363, %349 : vector<8x896xf32>
    %365 = arith.addf %348, %364 : vector<8x896xf32>
    %c839_i32_48 = arith.constant 839 : i32
    %366 = tpu.dynamic_rotate %247 by %c839_i32_48 dim 1 : vector<8x896xf32>, i32 -> vector<8x896xf32>
    %c16_49 = arith.constant 16 : index
    %367 = memref.load %arg4[%c16_49] : memref<72xf32, #tpu.memory_space<smem>>
    %368 = vector.broadcast %367 : f32 to vector<8x896xf32>
    %369 = arith.mulf %368, %366 : vector<8x896xf32>
    %370 = arith.addf %353, %369 : vector<8x896xf32>
    %c34 = arith.constant 34 : index
    %371 = memref.load %arg4[%c34] : memref<72xf32, #tpu.memory_space<smem>>
    %372 = vector.broadcast %371 : f32 to vector<8x896xf32>
    %373 = arith.mulf %372, %366 : vector<8x896xf32>
    %374 = arith.addf %357, %373 : vector<8x896xf32>
    %c52 = arith.constant 52 : index
    %375 = memref.load %arg4[%c52] : memref<72xf32, #tpu.memory_space<smem>>
    %376 = vector.broadcast %375 : f32 to vector<8x896xf32>
    %377 = arith.mulf %376, %366 : vector<8x896xf32>
    %378 = arith.addf %361, %377 : vector<8x896xf32>
    %c70 = arith.constant 70 : index
    %379 = memref.load %arg4[%c70] : memref<72xf32, #tpu.memory_space<smem>>
    %380 = vector.broadcast %379 : f32 to vector<8x896xf32>
    %381 = arith.mulf %380, %366 : vector<8x896xf32>
    %382 = arith.addf %365, %381 : vector<8x896xf32>
    %c838_i32_50 = arith.constant 838 : i32
    %383 = tpu.dynamic_rotate %247 by %c838_i32_50 dim 1 : vector<8x896xf32>, i32 -> vector<8x896xf32>
    %c17_51 = arith.constant 17 : index
    %384 = memref.load %arg4[%c17_51] : memref<72xf32, #tpu.memory_space<smem>>
    %385 = vector.broadcast %384 : f32 to vector<8x896xf32>
    %386 = arith.mulf %385, %383 : vector<8x896xf32>
    %387 = arith.addf %370, %386 : vector<8x896xf32>
    %c35 = arith.constant 35 : index
    %388 = memref.load %arg4[%c35] : memref<72xf32, #tpu.memory_space<smem>>
    %389 = vector.broadcast %388 : f32 to vector<8x896xf32>
    %390 = arith.mulf %389, %383 : vector<8x896xf32>
    %391 = arith.addf %374, %390 : vector<8x896xf32>
    %c53 = arith.constant 53 : index
    %392 = memref.load %arg4[%c53] : memref<72xf32, #tpu.memory_space<smem>>
    %393 = vector.broadcast %392 : f32 to vector<8x896xf32>
    %394 = arith.mulf %393, %383 : vector<8x896xf32>
    %395 = arith.addf %378, %394 : vector<8x896xf32>
    %c71 = arith.constant 71 : index
    %396 = memref.load %arg4[%c71] : memref<72xf32, #tpu.memory_space<smem>>
    %397 = vector.broadcast %396 : f32 to vector<8x896xf32>
    %398 = arith.mulf %397, %383 : vector<8x896xf32>
    %399 = arith.addf %382, %398 : vector<8x896xf32>
    %c0_52 = arith.constant 0 : index
    %400 = memref.load %arg5[%c0_52] : memref<4xf32, #tpu.memory_space<smem>>
    %401 = vector.broadcast %400 : f32 to vector<8x896xf32>
    %402 = arith.addf %387, %401 : vector<8x896xf32>
    %cst_53 = arith.constant 0.000000e+00 : f32
    %403 = vector.broadcast %cst_53 : f32 to vector<8x896xf32>
    %404 = arith.maximumf %402, %403 : vector<8x896xf32>
    %c1_54 = arith.constant 1 : index
    %405 = memref.load %arg5[%c1_54] : memref<4xf32, #tpu.memory_space<smem>>
    %406 = vector.broadcast %405 : f32 to vector<8x896xf32>
    %407 = arith.addf %391, %406 : vector<8x896xf32>
    %cst_55 = arith.constant 0.000000e+00 : f32
    %408 = vector.broadcast %cst_55 : f32 to vector<8x896xf32>
    %409 = arith.maximumf %407, %408 : vector<8x896xf32>
    %c2_56 = arith.constant 2 : index
    %410 = memref.load %arg5[%c2_56] : memref<4xf32, #tpu.memory_space<smem>>
    %411 = vector.broadcast %410 : f32 to vector<8x896xf32>
    %412 = arith.addf %395, %411 : vector<8x896xf32>
    %cst_57 = arith.constant 0.000000e+00 : f32
    %413 = vector.broadcast %cst_57 : f32 to vector<8x896xf32>
    %414 = arith.maximumf %412, %413 : vector<8x896xf32>
    %c3_58 = arith.constant 3 : index
    %415 = memref.load %arg5[%c3_58] : memref<4xf32, #tpu.memory_space<smem>>
    %416 = vector.broadcast %415 : f32 to vector<8x896xf32>
    %417 = arith.addf %399, %416 : vector<8x896xf32>
    %cst_59 = arith.constant 0.000000e+00 : f32
    %418 = vector.broadcast %cst_59 : f32 to vector<8x896xf32>
    %419 = arith.maximumf %417, %418 : vector<8x896xf32>
    %c0_60 = arith.constant 0 : index
    %c0_61 = arith.constant 0 : index
    %c0_62 = arith.constant 0 : index
    %420 = vector.load %arg10[%c0_60, %c0_61, %c0_62] : memref<4x8x896xf32, #tpu.memory_space<vmem>>, vector<1x8x896xf32>
    %421 = vector.shape_cast %420 : vector<1x8x896xf32> to vector<8x896xf32>
    %422 = vector.shape_cast %404 : vector<8x896xf32> to vector<1x8x896xf32>
    tpu.vector_store %arg10[%c0_60, %c0_61, %c0_62], %422 {strides = array<i32>} : memref<4x8x896xf32, #tpu.memory_space<vmem>>, vector<1x8x896xf32>,
    %c1_63 = arith.constant 1 : index
    %c0_64 = arith.constant 0 : index
    %c0_65 = arith.constant 0 : index
    %423 = vector.load %arg10[%c1_63, %c0_64, %c0_65] : memref<4x8x896xf32, #tpu.memory_space<vmem>>, vector<1x8x896xf32>
    %424 = vector.shape_cast %423 : vector<1x8x896xf32> to vector<8x896xf32>
    %425 = vector.shape_cast %409 : vector<8x896xf32> to vector<1x8x896xf32>
    tpu.vector_store %arg10[%c1_63, %c0_64, %c0_65], %425 {strides = array<i32>} : memref<4x8x896xf32, #tpu.memory_space<vmem>>, vector<1x8x896xf32>,
    %c2_66 = arith.constant 2 : index
    %c0_67 = arith.constant 0 : index
    %c0_68 = arith.constant 0 : index
    %426 = vector.load %arg10[%c2_66, %c0_67, %c0_68] : memref<4x8x896xf32, #tpu.memory_space<vmem>>, vector<1x8x896xf32>
    %427 = vector.shape_cast %426 : vector<1x8x896xf32> to vector<8x896xf32>
    %428 = vector.shape_cast %414 : vector<8x896xf32> to vector<1x8x896xf32>
    tpu.vector_store %arg10[%c2_66, %c0_67, %c0_68], %428 {strides = array<i32>} : memref<4x8x896xf32, #tpu.memory_space<vmem>>, vector<1x8x896xf32>,
    %c3_69 = arith.constant 3 : index
    %c0_70 = arith.constant 0 : index
    %c0_71 = arith.constant 0 : index
    %429 = vector.load %arg10[%c3_69, %c0_70, %c0_71] : memref<4x8x896xf32, #tpu.memory_space<vmem>>, vector<1x8x896xf32>
    %430 = vector.shape_cast %429 : vector<1x8x896xf32> to vector<8x896xf32>
    %431 = vector.shape_cast %419 : vector<8x896xf32> to vector<1x8x896xf32>
    tpu.vector_store %arg10[%c3_69, %c0_70, %c0_71], %431 {strides = array<i32>} : memref<4x8x896xf32, #tpu.memory_space<vmem>>, vector<1x8x896xf32>,
    %cst_72 = arith.constant 0.000000e+00 : f32
    %432 = vector.broadcast %cst_72 : f32 to vector<8x128xf32>
    %c0_73 = arith.constant 0 : index
    %c0_74 = arith.constant 0 : index
    %c0_75 = arith.constant 0 : index
    %433 = vector.load %arg10[%c0_73, %c0_74, %c0_75] : memref<4x8x896xf32, #tpu.memory_space<vmem>>, vector<1x8x896xf32>
    %434 = vector.shape_cast %433 : vector<1x8x896xf32> to vector<8x896xf32>
    %c0_76 = arith.constant 0 : index
    %c0_77 = arith.constant 0 : index
    %c0_78 = arith.constant 0 : index
    %435 = vector.load %arg6[%c0_76, %c0_77, %c0_78] : memref<4x896x128xf32, #tpu.memory_space<vmem>>, vector<1x896x128xf32>
    %436 = vector.shape_cast %435 : vector<1x896x128xf32> to vector<896x128xf32>
    %cst_79 = arith.constant dense<0.000000e+00> : vector<8x128xf32>
    %437 = tpu.matmul %434, %436, %cst_79 {dimension_numbers = #tpu.dot_dimension_numbers<[1], [0], [0], [1], [0, 0, 1, 1], [], []>} : vector<8x896xf32>, vector<896x128xf32>, vector<8x128xf32> -> vector<8x128xf32>
    %438 = arith.addf %432, %437 : vector<8x128xf32>
    %c1_80 = arith.constant 1 : index
    %c0_81 = arith.constant 0 : index
    %c0_82 = arith.constant 0 : index
    %439 = vector.load %arg10[%c1_80, %c0_81, %c0_82] : memref<4x8x896xf32, #tpu.memory_space<vmem>>, vector<1x8x896xf32>
    %440 = vector.shape_cast %439 : vector<1x8x896xf32> to vector<8x896xf32>
    %c1_83 = arith.constant 1 : index
    %c0_84 = arith.constant 0 : index
    %c0_85 = arith.constant 0 : index
    %441 = vector.load %arg6[%c1_83, %c0_84, %c0_85] : memref<4x896x128xf32, #tpu.memory_space<vmem>>, vector<1x896x128xf32>
    %442 = vector.shape_cast %441 : vector<1x896x128xf32> to vector<896x128xf32>
    %cst_86 = arith.constant dense<0.000000e+00> : vector<8x128xf32>
    %443 = tpu.matmul %440, %442, %cst_86 {dimension_numbers = #tpu.dot_dimension_numbers<[1], [0], [0], [1], [0, 0, 1, 1], [], []>} : vector<8x896xf32>, vector<896x128xf32>, vector<8x128xf32> -> vector<8x128xf32>
    %444 = arith.addf %438, %443 : vector<8x128xf32>
    %c2_87 = arith.constant 2 : index
    %c0_88 = arith.constant 0 : index
    %c0_89 = arith.constant 0 : index
    %445 = vector.load %arg10[%c2_87, %c0_88, %c0_89] : memref<4x8x896xf32, #tpu.memory_space<vmem>>, vector<1x8x896xf32>
    %446 = vector.shape_cast %445 : vector<1x8x896xf32> to vector<8x896xf32>
    %c2_90 = arith.constant 2 : index
    %c0_91 = arith.constant 0 : index
    %c0_92 = arith.constant 0 : index
    %447 = vector.load %arg6[%c2_90, %c0_91, %c0_92] : memref<4x896x128xf32, #tpu.memory_space<vmem>>, vector<1x896x128xf32>
    %448 = vector.shape_cast %447 : vector<1x896x128xf32> to vector<896x128xf32>
    %cst_93 = arith.constant dense<0.000000e+00> : vector<8x128xf32>
    %449 = tpu.matmul %446, %448, %cst_93 {dimension_numbers = #tpu.dot_dimension_numbers<[1], [0], [0], [1], [0, 0, 1, 1], [], []>} : vector<8x896xf32>, vector<896x128xf32>, vector<8x128xf32> -> vector<8x128xf32>
    %450 = arith.addf %444, %449 : vector<8x128xf32>
    %c3_94 = arith.constant 3 : index
    %c0_95 = arith.constant 0 : index
    %c0_96 = arith.constant 0 : index
    %451 = vector.load %arg10[%c3_94, %c0_95, %c0_96] : memref<4x8x896xf32, #tpu.memory_space<vmem>>, vector<1x8x896xf32>
    %452 = vector.shape_cast %451 : vector<1x8x896xf32> to vector<8x896xf32>
    %c3_97 = arith.constant 3 : index
    %c0_98 = arith.constant 0 : index
    %c0_99 = arith.constant 0 : index
    %453 = vector.load %arg6[%c3_97, %c0_98, %c0_99] : memref<4x896x128xf32, #tpu.memory_space<vmem>>, vector<1x896x128xf32>
    %454 = vector.shape_cast %453 : vector<1x896x128xf32> to vector<896x128xf32>
    %cst_100 = arith.constant dense<0.000000e+00> : vector<8x128xf32>
    %455 = tpu.matmul %452, %454, %cst_100 {dimension_numbers = #tpu.dot_dimension_numbers<[1], [0], [0], [1], [0, 0, 1, 1], [], []>} : vector<8x896xf32>, vector<896x128xf32>, vector<8x128xf32> -> vector<8x128xf32>
    %456 = arith.addf %450, %455 : vector<8x128xf32>
    %c0_101 = arith.constant 0 : index
    %c0_102 = arith.constant 0 : index
    %457 = vector.load %arg7[%c0_101, %c0_102] : memref<1x128xf32, #tpu.memory_space<vmem>>, vector<1x128xf32>
    %458 = vector.broadcast %457 : vector<1x128xf32> to vector<8x128xf32>
    %459 = arith.addf %456, %458 : vector<8x128xf32>
    %c0_103 = arith.constant 0 : index
    %c0_104 = arith.constant 0 : index
    %460 = vector.load %arg8[%c0_103, %c0_104] : memref<8x128xf32, #tpu.memory_space<vmem>>, vector<8x128xf32>
    tpu.vector_store %arg8[%c0_103, %c0_104], %459 {strides = array<i32>} : memref<8x128xf32, #tpu.memory_space<vmem>>, vector<8x128xf32>,
    return
  }
  func.func @transform_0(%arg0: i32) -> (i32, i32, i32) {
    %c0_i32 = arith.constant 0 : i32
    %c0_i32_0 = arith.constant 0 : i32
    %c0_i32_1 = arith.constant 0 : i32
    return %c0_i32, %arg0, %c0_i32_0 : i32, i32, i32
  }
  func.func @transform_1(%arg0: i32) -> i32 {
    %c0_i32 = arith.constant 0 : i32
    %c0_i32_0 = arith.constant 0 : i32
    return %c0_i32 : i32
  }
  func.func @transform_2(%arg0: i32) -> i32 {
    %c0_i32 = arith.constant 0 : i32
    %c0_i32_0 = arith.constant 0 : i32
    return %c0_i32 : i32
  }
  func.func @transform_3(%arg0: i32) -> i32 {
    %c0_i32 = arith.constant 0 : i32
    %c0_i32_0 = arith.constant 0 : i32
    return %c0_i32 : i32
  }
  func.func @transform_4(%arg0: i32) -> i32 {
    %c0_i32 = arith.constant 0 : i32
    %c0_i32_0 = arith.constant 0 : i32
    return %c0_i32 : i32
  }
  func.func @transform_5(%arg0: i32) -> (i32, i32, i32) {
    %c0_i32 = arith.constant 0 : i32
    %c0_i32_0 = arith.constant 0 : i32
    %c0_i32_1 = arith.constant 0 : i32
    %c0_i32_2 = arith.constant 0 : i32
    return %c0_i32, %c0_i32_0, %c0_i32_1 : i32, i32, i32
  }
  func.func @transform_6(%arg0: i32) -> (i32, i32) {
    %c0_i32 = arith.constant 0 : i32
    %c0_i32_0 = arith.constant 0 : i32
    %c0_i32_1 = arith.constant 0 : i32
    return %c0_i32, %c0_i32_0 : i32, i32
  }
  func.func @transform_7(%arg0: i32) -> (i32, i32) {
    %c0_i32 = arith.constant 0 : i32
    %c0_i32_0 = arith.constant 0 : i32
    return %arg0, %c0_i32 : i32, i32
  }
}

</mosaic_0001>

<bundles_post_ra>
// kernel: micro_cnn_forward.1
= control target key start
LH: loop header
LB: loop body
LE: loop exit
PB: predicated region body
PF: predicated region fallthrough
CT: control target
= control target key end

     0   :  { %12 = vsyncpa [#allocation5], 0  ;;  %s9977_s0 = inlined_call_operand.vmem [shape: f32[1,8,896], index: 0, kind: input, shape index: {}]   ;;  %s9978_s1 = inlined_call_operand.vmem [shape: f32[18], index: 1, kind: input, shape index: {}]   ;;  %s9979_s2 = inlined_call_operand.vmem [shape: f32[2], index: 2, kind: input, shape index: {}]   ;;  %s9980_s3 = inlined_call_operand.vmem [shape: f32[72], index: 3, kind: input, shape index: {}]   ;;  %s9981_s4 = inlined_call_operand.vmem [shape: f32[4], index: 4, kind: input, shape index: {}]   ;;  %s9982_s5 = inlined_call_operand.vmem [shape: f32[4,896,128], index: 5, kind: input, shape index: {}]   ;;  %s9983_s6 = inlined_call_operand.vmem [shape: f32[1,128], index: 6, kind: input, shape index: {}]   ;;  %s9984_s7 = inlined_call_operand.vmem [shape: f32[8,128], index: 7, kind: output, shape index: {}]  }
   0x1   :  { %13 = vsyncpa [#allocation7], 0  ;;  %s33_s26 = sshll.u32 %s9979_s2, 4  ;;  %s34_s26 = int_to_ptr.vmem [resolvable:$true] %s33_s26 }
   0x2   :  { %14 = vsyncpa [#allocation10], 0  ;;  %s23_s29 = sshll.u32 %s9978_s1, 4  ;;  %s5318_s30 = scalar_lea.vmem %s34_s26, 16  ;;  %s24_s29 = int_to_ptr.vmem [resolvable:$true] %s23_s29 }
   0x3   :  { %p5319_p0 = scmp.ne.s32.totalorder %s34_s26, %s5318_s30  ;;  %p5323_p1 = scmp.lt.s32.totalorder %s34_s26, %s34_s26 }
   0x4   :  { %p5324_p2 = scmp.lt.s32.totalorder %s5318_s30, %s5318_s30 }
   0x6   :  { %p5325_p3 = por %p5324_p2, %p5323_p1 }
   0x8   :  { %p5326_p4 = pnand %p5325_p3, %p5319_p0 }
   0xa   :  { %5329 = shalt.err (!%p5326_p4)
}
   0xb   :  { %s5372_s8 = smov [#allocation6]   ;;  %s5330_s9 = scalar_lea.vmem %s24_s29, 16 }
   0xc   :  { %36 = dma.vmem_to_smem %s34_s26, 16, %s5372_s8, [#allocation7]  }
   0xd   :  { %p5331_p5 = scmp.ne.s32.totalorder %s24_s29, %s5330_s9  ;;  %p5335_p6 = scmp.lt.s32.totalorder %s24_s29, %s24_s29 }
   0xe   :  { %p5336_p7 = scmp.lt.s32.totalorder %s5330_s9, %s5330_s9 }
  0x10   :  { %p5337_p8 = por %p5336_p7, %p5335_p6 }
  0x12   :  { %p5338_p9 = pnand %p5337_p8, %p5331_p5 }
  0x14   :  { %5341 = shalt.err (!%p5338_p9)
}
  0x15   :  { %s5373_s2 = smov [#allocation4]   ;;  %s43_s11 = sshll.u32 %s9980_s3, 4  ;;  %s44_s11 = int_to_ptr.vmem [resolvable:$true] %s43_s11 }
  0x16   :  { %26 = dma.vmem_to_smem %s24_s29, 16, %s5373_s2, [#allocation5]  }
  0x17   :  { %s53_s14 = sshll.u32 %s9981_s4, 4  ;;  %s5342_s15 = scalar_lea.vmem %s44_s11, 16  ;;  %s54_s14 = int_to_ptr.vmem [resolvable:$true] %s53_s14 }
  0x18   :  { %p5343_p10 = scmp.ne.s32.totalorder %s44_s11, %s5342_s15  ;;  %p5347_p11 = scmp.lt.s32.totalorder %s44_s11, %s44_s11 }
  0x19   :  { %p5348_p12 = scmp.lt.s32.totalorder %s5342_s15, %s5342_s15 }
  0x1b   :  { %p5349_p13 = por %p5348_p12, %p5347_p11 }
  0x1d   :  { %p5350_p0 = pnand %p5349_p13, %p5343_p10 }
  0x1f   :  { %5353 = shalt.err (!%p5350_p0)
}
  0x20   :  { %s5374_s16 = smov [#allocation8]   ;;  %s5354_s17 = scalar_lea.vmem %s54_s14, 16 }
  0x21   :  { %46 = dma.vmem_to_smem %s44_s11, 16, %s5374_s16, [#allocation7]  }
  0x22   :  { %p5355_p1 = scmp.ne.s32.totalorder %s54_s14, %s5354_s17  ;;  %p5359_p2 = scmp.lt.s32.totalorder %s54_s14, %s54_s14 }
  0x23   :  { %p5360_p3 = scmp.lt.s32.totalorder %s5354_s17, %s5354_s17 }
  0x25   :  { %p5361_p4 = por %p5360_p3, %p5359_p2 }
  0x27   :  { %p5362_p5 = pnand %p5361_p4, %p5355_p1 }
  0x29   :  { %5365 = shalt.err (!%p5362_p5)
}
  0x2a   :  { %s5375_s3 = smov [#allocation9]  }
  0x2b   :  { %56 = dma.vmem_to_smem %s54_s14, 16, %s5375_s3, [#allocation10]  }
  0x2c   :  { %5366 = dma.done.wait [#allocation5], 16  }
  0x2d   :  { %5367 = vsyncadd [#allocation5], 4294967280 }
  0x2e   :  { %5368 = dma.done.wait [#allocation7], 32  }
  0x2f   :  { %5369 = vsyncadd [#allocation7], 4294967264 }
  0x30   :  { %5370 = dma.done.wait [#allocation10], 16  }
  0x31   :  { %5371 = vsyncadd [#allocation10], 4294967280 }
  0x32   :  { %73 = sfence }
  0x33   :  { %v5442_v0 = vld [vmem:[%s9977_s0 + $0x18] sm:$0xff]  ;;  %v5447_v1 = vld [vmem:[%s9977_s0 + $0x8] sm:$0xff]  ;;  %s5376_s21 = smov 127   ;;  %v5456_v2 = vld [vmem:[%s9977_s0 + $0x10] sm:$0xff]  ;;  %s5377_s26 = smov 126   ;;  %v113_v7 = vlaneseq  ;;  %vm5385_vm8 = vmmov 0  }
  0x34   :  { %105 = vrot.lane.b32.xlu1 %v5442_v0, %s5376_s21  ;;  %101 = vrot.lane.b32.xlu0 %v5447_v1, %s5376_s21  ;;  %v5461_v3 = vld [vmem:[%s9977_s0] sm:$0xff]  ;;  %s5378_s27 = smov 100   ;;  %v5491_v5 = vld [vmem:[%s9977_s0 + $0x28] sm:$0xff]  ;;  %s5379_s9 = smov 99  }
  0x35   :  { %v5482_v4 = vld [vmem:[%s9977_s0 + $0x20] sm:$0xff]  ;;  %s5380_s2 = smov 98   ;;  %s5381_s1 = smov 72   ;;  %v5568_v6 = vld [vmem:[%s9977_s0 + $0x30] sm:$0xff]  ;;  %v5586_v8 = vand.u32 127, %v113_v7 }
  0x36   :  { %s5382_s10 = smov 71   ;;  %s10009_s11 = smov 70   ;;  %10196 = vst [vmem:[#allocation14_spill] sm:$0xff] %v5568_v6 }
  0x37   :  { %s3766_s0 = sld [smem:[#allocation4 + $0x9]]  ;;  %s3768_s14 = sld [smem:[#allocation4 + $0xa]]  ;;  %vm115_vm0 = vcmp.lt.s32.totalorder %v5586_v8, 127  ;;  %vm169_vm1 = vcmp.lt.s32.totalorder %v5586_v8, 126  ;;  %vm223_vm2 = vcmp.lt.s32.totalorder %v5586_v8, 100  ;;  %vm277_vm3 = vcmp.lt.s32.totalorder %v5586_v8, 99 }
  0x38   :  { %103 = vrot.lane.b32.xlu0 %v5456_v2, %s5376_s21  ;;  %99 = vrot.lane.b32.xlu1 %v5461_v3, %s5376_s21  ;;  %s3770_s15 = sld [smem:[#allocation4 + $0xb]]  ;;  %s3772_s16 = sld [smem:[#allocation4 + $0xc]]  ;;  %vm331_vm4 = vcmp.lt.s32.totalorder %v5586_v8, 98  ;;  %vm385_vm5 = vcmp.lt.s32.totalorder %v5586_v8, 72  ;;  %vm439_vm6 = vcmp.lt.s32.totalorder %v5586_v8, 71  ;;  %vm493_vm7 = vcmp.lt.s32.totalorder %v5586_v8, 70 }
  0x39   :  { %s3774_s17 = sld [smem:[#allocation4 + $0xd]]  ;;  %s3776_s3 = sld [smem:[#allocation4 + $0xe]]  ;;  %v3966_v8 = vld [vmem:[%s9982_s5 + $0x6e0] sm:$0xff] }
  0x3a   :  { %s3778_s4 = sld [smem:[#allocation4 + $0xf]]  ;;  %s81_s18 = sld [smem:[#allocation4]] }
  0x3b   :  { %s3767_s19 = sld [smem:[#allocation4 + $0x1]]  ;;  %s3769_s20 = sld [smem:[#allocation4 + $0x2]] }
  0x3c   :  { %157 = vrot.lane.b32.xlu0 %v5447_v1, %s5377_s26  ;;  %159 = vrot.lane.b32.xlu1 %v5456_v2, %s5377_s26  ;;  %s3771_s22 = sld [smem:[#allocation4 + $0x3]]  ;;  %s5767_s23 = sld [smem:[#allocation4 + $0x4]] }
  0x3d   :  { %v5589_v11 = vstv %s3766_s0  ;;  %v5591_v12 = vstv %s3768_s14  ;;  %s5774_s24 = sld [smem:[#allocation4 + $0x5]]  ;;  %s5776_s25 = sld [smem:[#allocation4 + $0x6]] }
  0x3e   :  { %10197 = vst [vmem:[#allocation15_spill] sm:$0xff] %v5589_v11  ;;  %10198 = vst [vmem:[#allocation16_spill] sm:$0xff] %v5591_v12  ;;  %v93_v16 = vmul.f32 %v5589_v11, %v5447_v1  ;;  %v5613_v20 = vstv %s3770_s15  ;;  %v94_v23 = vmul.f32 %v5589_v11, %v5456_v2  ;;  %v92_v24 = vmul.f32 %v5589_v11, %v5461_v3  ;;  %s3779_s28 = sld [smem:[#allocation4 + $0x7]]  ;;  %s5786_s29 = sld [smem:[#allocation4 + $0x10]] }
  0x3f   :  { %10200 = vst [vmem:[#allocation18_spill] sm:$0xff] %v5613_v20  ;;  %v5645_v39 = vstv %s3772_s16  ;;  %v5675_v57 = vstv %s3774_s17  ;;  %v95_v62 = vmul.f32 %v5589_v11, %v5442_v0  ;;  %s5792_s30 = sld [smem:[#allocation4 + $0x8]]  ;;  %s5794_s8 = sld [smem:[#allocation4 + $0x11]] }
  0x40   :  { %161 = vrot.lane.b32.xlu0 %v5442_v0, %s5377_s26  ;;  %155 = vrot.lane.b32.xlu1 %v5461_v3, %s5377_s26  ;;  %10202 = vst [vmem:[#allocation20_spill] sm:$0xff] %v5645_v39  ;;  %10205 = vst [vmem:[#allocation23_spill] sm:$0xff] %v5675_v57  ;;  %s5844_s12 = sld [smem:[#allocation6]]  ;;  %s6120_s13 = sld [smem:[#allocation6 + $0x1]] }
  0x41   :  { %s3784_s0 = sld [smem:[#allocation8 + $0x12]]  ;;  %s587_s14 = sld [smem:[#allocation8]] }
  0x42   :  { %s3785_s15 = sld [smem:[#allocation8 + $0x24]]  ;;  %s3786_s16 = sld [smem:[#allocation8 + $0x36]] }
  0x43   :  { %s3819_s17 = sld [smem:[#allocation8 + $0x9]] }
  0x44   :  { %211 = vrot.lane.b32.xlu0 %v5447_v1, %s5378_s27  ;;  %213 = vrot.lane.b32.xlu1 %v5456_v2, %s5378_s27 }
  0x48   :  { %215 = vrot.lane.b32.xlu0 %v5442_v0, %s5378_s27  ;;  %107 = vrot.lane.b32.xlu1 %v5482_v4, %s5376_s21 }
  0x4c   :  { %109 = vrot.lane.b32.xlu0 %v5491_v5, %s5376_s21  ;;  %209 = vrot.lane.b32.xlu1 %v5461_v3, %s5378_s27 }
  0x50   :  { %265 = vrot.lane.b32.xlu0 %v5447_v1, %s5379_s9  ;;  %267 = vrot.lane.b32.xlu1 %v5456_v2, %s5379_s9 }
  0x54   :  { %269 = vrot.lane.b32.xlu0 %v5442_v0, %s5379_s9  ;;  %163 = vrot.lane.b32.xlu1 %v5482_v4, %s5377_s26 }
  0x58   :  { %165 = vrot.lane.b32.xlu0 %v5491_v5, %s5377_s26  ;;  %263 = vrot.lane.b32.xlu1 %v5461_v3, %s5379_s9 }
  0x5c   :  { %319 = vrot.lane.b32.xlu0 %v5447_v1, %s5380_s2  ;;  %321 = vrot.lane.b32.xlu1 %v5456_v2, %s5380_s2 }
  0x60   :  { %323 = vrot.lane.b32.xlu0 %v5442_v0, %s5380_s2  ;;  %217 = vrot.lane.b32.xlu1 %v5482_v4, %s5378_s27 }
  0x64   :  { %219 = vrot.lane.b32.xlu0 %v5491_v5, %s5378_s27  ;;  %317 = vrot.lane.b32.xlu1 %v5461_v3, %s5380_s2 }
  0x68   :  { %373 = vrot.lane.b32.xlu0 %v5447_v1, %s5381_s1  ;;  %375 = vrot.lane.b32.xlu1 %v5456_v2, %s5381_s1 }
  0x6c   :  { %377 = vrot.lane.b32.xlu0 %v5442_v0, %s5381_s1  ;;  %271 = vrot.lane.b32.xlu1 %v5482_v4, %s5379_s9 }
  0x70   :  { %273 = vrot.lane.b32.xlu0 %v5491_v5, %s5379_s9  ;;  %371 = vrot.lane.b32.xlu1 %v5461_v3, %s5381_s1 }
  0x74   :  { %427 = vrot.lane.b32.xlu0 %v5447_v1, %s5382_s10  ;;  %429 = vrot.lane.b32.xlu1 %v5456_v2, %s5382_s10 }
  0x78   :  { %431 = vrot.lane.b32.xlu0 %v5442_v0, %s5382_s10  ;;  %325 = vrot.lane.b32.xlu1 %v5482_v4, %s5380_s2 }
  0x7c   :  { %327 = vrot.lane.b32.xlu0 %v5491_v5, %s5380_s2  ;;  %425 = vrot.lane.b32.xlu1 %v5461_v3, %s5382_s10 }
  0x80   :  { %481 = vrot.lane.b32.xlu0 %v5447_v1, %s10009_s11  ;;  %483 = vrot.lane.b32.xlu1 %v5456_v2, %s10009_s11 }
  0x84   :  { %485 = vrot.lane.b32.xlu0 %v5442_v0, %s10009_s11  ;;  %379 = vrot.lane.b32.xlu1 %v5482_v4, %s5381_s1 }
  0x88   :  { %381 = vrot.lane.b32.xlu0 %v5491_v5, %s5381_s1  ;;  %479 = vrot.lane.b32.xlu1 %v5461_v3, %s10009_s11 }
  0x8c   :  { %433 = vrot.lane.b32.xlu0 %v5482_v4, %s5382_s10  ;;  %435 = vrot.lane.b32.xlu1 %v5491_v5, %s5382_s10 }
  0x90   :  { %487 = vrot.lane.b32.xlu0 %v5482_v4, %s10009_s11  ;;  %489 = vrot.lane.b32.xlu1 %v5491_v5, %s10009_s11 }
  0x94   :  { %111 = vrot.lane.b32.xlu0 %v5568_v6, %s5376_s21  ;;  %167 = vrot.lane.b32.xlu1 %v5568_v6, %s5377_s26 }
  0x98   :  { %221 = vrot.lane.b32.xlu0 %v5568_v6, %s5378_s27  ;;  %275 = vrot.lane.b32.xlu1 %v5568_v6, %s5379_s9 }
  0x9c   :  { %329 = vrot.lane.b32.xlu0 %v5568_v6, %s5380_s2  ;;  %383 = vrot.lane.b32.xlu1 %v5568_v6, %s5381_s1 }
  0xa0   :  { %437 = vrot.lane.b32.xlu0 %v5568_v6, %s5382_s10  ;;  %491 = vrot.lane.b32.xlu1 %v5568_v6, %s10009_s11 }
  0xa6   :  { %v106_v9 = vpop.permute.xlu1 %105  ;;  %v102_v10 = vpop.permute.xlu0 %101 }
  0xaa   :  { %v104_v13 = vpop.permute.xlu0 %103  ;;  %v5593_v14 = vpop.permute.xlu1 %99 }
  0xab   :  { %10199 = vst [vmem:[#allocation17_spill] sm:$0xff] %v5593_v14  ;;  %v5597_v15 = vsel %vm115_vm0, %v102_v10, %v104_v13  ;;  %v5606_v18 = vsel %vm115_vm0, %v104_v13, %v106_v9  ;;  %v5611_v19 = vsel %vm115_vm0, %v5593_v14, %v102_v10 }
  0xac   :  { %v142_v17 = vmul.f32 %v5591_v12, %v5597_v15  ;;  %v143_v26 = vmul.f32 %v5591_v12, %v5606_v18  ;;  %v141_v28 = vmul.f32 %v5591_v12, %v5611_v19 }
  0xae   :  { %v158_v21 = vpop.permute.xlu0 %157  ;;  %v160_v22 = vpop.permute.xlu1 %159  ;;  %v149_v27 = vadd.f32 %v142_v17, %v93_v16  ;;  %v150_v35 = vadd.f32 %v143_v26, %v94_v23  ;;  %v148_v36 = vadd.f32 %v141_v28, %v92_v24  ;;  %v96_v17 = vmul.f32 %v5589_v11, %v5482_v4 }
  0xaf   :  { %v5621_v25 = vsel %vm169_vm1, %v158_v21, %v160_v22 }
  0xb0   :  { %v196_v29 = vmul.f32 %v5613_v20, %v5621_v25 }
  0xb2   :  { %v203_v30 = vadd.f32 %v196_v29, %v149_v27  ;;  %v162_v31 = vpop.permute.xlu0 %161  ;;  %v5629_v32 = vpop.permute.xlu1 %155 }
  0xb3   :  { %10201 = vst [vmem:[#allocation19_spill] sm:$0xff] %v5629_v32  ;;  %v5633_v33 = vsel %vm169_vm1, %v160_v22, %v162_v31  ;;  %v5638_v34 = vsel %vm169_vm1, %v5629_v32, %v158_v21 }
  0xb4   :  { %v197_v37 = vmul.f32 %v5613_v20, %v5633_v33  ;;  %v195_v38 = vmul.f32 %v5613_v20, %v5638_v34 }
  0xb6   :  { %v204_v40 = vadd.f32 %v197_v37, %v150_v35  ;;  %v202_v41 = vadd.f32 %v195_v38, %v148_v36  ;;  %v212_v42 = vpop.permute.xlu0 %211  ;;  %v214_v43 = vpop.permute.xlu1 %213 }
  0xb7   :  { %v5649_v44 = vsel %vm223_vm2, %v212_v42, %v214_v43 }
  0xb8   :  { %v250_v45 = vmul.f32 %v5645_v39, %v5649_v44 }
  0xba   :  { %v257_v46 = vadd.f32 %v250_v45, %v203_v30  ;;  %v216_v47 = vpop.permute.xlu0 %215  ;;  %v108_v48 = vpop.permute.xlu1 %107 }
  0xbb   :  { %v5655_v49 = vsel %vm223_vm2, %v214_v43, %v216_v47  ;;  %v5673_v56 = vsel %vm115_vm0, %v106_v9, %v108_v48 }
  0xbc   :  { %v251_v50 = vmul.f32 %v5645_v39, %v5655_v49  ;;  %v144_v63 = vmul.f32 %v5591_v12, %v5673_v56 }
  0xbe   :  { %v258_v51 = vadd.f32 %v251_v50, %v204_v40  ;;  %v5659_v52 = vpop.permute.xlu0 %109  ;;  %v5661_v53 = vpop.permute.xlu1 %209  ;;  %v151_v23 = vadd.f32 %v144_v63, %v95_v62 }
  0xbf   :  { %10203 = vst [vmem:[#allocation21_spill] sm:$0xff] %v5659_v52  ;;  %10204 = vst [vmem:[#allocation22_spill] sm:$0xff] %v5661_v53  ;;  %v5666_v54 = vsel %vm223_vm2, %v5661_v53, %v212_v42  ;;  %v5690_v9 = vsel %vm115_vm0, %v108_v48, %v5659_v52 }
  0xc0   :  { %v249_v55 = vmul.f32 %v5645_v39, %v5666_v54  ;;  %v145_v24 = vmul.f32 %v5591_v12, %v5690_v9  ;;  %v5842_v12 = vstv %s3779_s28  ;;  %s6254_s28 = sld [smem:[#allocation8 + $0x26]] }
  0xc2   :  { %v256_v58 = vadd.f32 %v249_v55, %v202_v41  ;;  %v266_v59 = vpop.permute.xlu0 %265  ;;  %v268_v60 = vpop.permute.xlu1 %267  ;;  %v152_v37 = vadd.f32 %v145_v24, %v96_v17  ;;  %v5730_v41 = vstv %s3776_s3  ;;  %s3820_s3 = sld [smem:[#allocation8 + $0x1b]] }
  0xc3   :  { %v5679_v61 = vsel %vm277_vm3, %v266_v59, %v268_v60 }
  0xc4   :  { %v304_v7 = vmul.f32 %v5675_v57, %v5679_v61 }
  0xc6   :  { %v311_v10 = vadd.f32 %v304_v7, %v257_v46  ;;  %v5692_v13 = vpop.permute.xlu0 %269  ;;  %v164_v16 = vpop.permute.xlu1 %163 }
  0xc7   :  { %v5699_v21 = vsel %vm277_vm3, %v268_v60, %v5692_v13  ;;  %v5703_v22 = vsel %vm169_vm1, %v162_v31, %v164_v16 }
  0xc8   :  { %v305_v26 = vmul.f32 %v5675_v57, %v5699_v21  ;;  %v198_v27 = vmul.f32 %v5613_v20, %v5703_v22 }
  0xca   :  { %v312_v28 = vadd.f32 %v305_v26, %v258_v51  ;;  %v205_v29 = vadd.f32 %v198_v27, %v151_v23  ;;  %v5711_v30 = vpop.permute.xlu0 %165  ;;  %v5713_v35 = vpop.permute.xlu1 %263  ;;  %v5778_v27 = vstv %s3778_s4  ;;  %s6234_s4 = sld [smem:[#allocation8 + $0x2d]] }
  0xcb   :  { %10206 = vst [vmem:[#allocation24_spill] sm:$0xff] %v5711_v30  ;;  %10207 = vst [vmem:[#allocation25_spill] sm:$0xff] %v5713_v35  ;;  %v5718_v31 = vsel %vm169_vm1, %v164_v16, %v5711_v30  ;;  %v5723_v36 = vsel %vm277_vm3, %v5713_v35, %v266_v59  ;;  %v5832_v35 = vstv %s5774_s24  ;;  %s6248_s24 = sld [smem:[#allocation8 + $0x2]] }
  0xcc   :  { %v199_v38 = vmul.f32 %v5613_v20, %v5718_v31  ;;  %v303_v40 = vmul.f32 %v5675_v57, %v5723_v36 }
  0xce   :  { %v206_v42 = vadd.f32 %v199_v38, %v152_v37  ;;  %v310_v43 = vadd.f32 %v303_v40, %v256_v58  ;;  %v320_v45 = vpop.permute.xlu0 %319  ;;  %v322_v46 = vpop.permute.xlu1 %321 }
  0xcf   :  { %v5734_v48 = vsel %vm331_vm4, %v320_v45, %v322_v46 }
  0xd0   :  { %v358_v50 = vmul.f32 %v5730_v41, %v5734_v48 }
  0xd2   :  { %v365_v51 = vadd.f32 %v358_v50, %v311_v10  ;;  %v5738_v55 = vpop.permute.xlu0 %323  ;;  %v218_v59 = vpop.permute.xlu1 %217 }
  0xd3   :  { %v5743_v60 = vsel %vm331_vm4, %v322_v46, %v5738_v55  ;;  %v5747_v58 = vsel %vm223_vm2, %v216_v47, %v218_v59 }
  0xd4   :  { %v359_v62 = vmul.f32 %v5730_v41, %v5743_v60  ;;  %v252_v63 = vmul.f32 %v5645_v39, %v5747_v58 }
  0xd6   :  { %v366_v7 = vadd.f32 %v359_v62, %v312_v28  ;;  %v259_v10 = vadd.f32 %v252_v63, %v205_v29  ;;  %v5753_v16 = vpop.permute.xlu0 %219  ;;  %v5755_v17 = vpop.permute.xlu1 %317  ;;  %v5780_v28 = vstv %s81_s18  ;;  %s6236_s18 = sld [smem:[#allocation8 + $0x3f]] }
  0xd7   :  { %10208 = vst [vmem:[#allocation26_spill] sm:$0xff] %v5753_v16  ;;  %10209 = vst [vmem:[#allocation27_spill] sm:$0xff] %v5755_v17  ;;  %v5760_v23 = vsel %vm223_vm2, %v218_v59, %v5753_v16  ;;  %v5765_v47 = vsel %vm331_vm4, %v5755_v17, %v320_v45  ;;  %v85_v50 = vmul.f32 %v5780_v28, %v5456_v2  ;;  %v5804_v2 = vstv %s3769_s20  ;;  %s6240_s20 = sld [smem:[#allocation8 + $0x13]] }
  0xd8   :  { %v253_v24 = vmul.f32 %v5645_v39, %v5760_v23  ;;  %v357_v26 = vmul.f32 %v5730_v41, %v5765_v47  ;;  %10210 = vst [vmem:[#allocation28_spill] sm:$0xff] %v5780_v28  ;;  %v83_v59 = vmul.f32 %v5780_v28, %v5461_v3  ;;  %v5818_v3 = vstv %s3771_s22  ;;  %s6243_s22 = sld [smem:[#allocation8 + $0x25]] }
  0xd9   :  { %v5829_v39 = vstv %s5767_s23  ;;  %v180_v32 = vmul.f32 %v5804_v2, %v5621_v25  ;;  %v181_v30 = vmul.f32 %v5804_v2, %v5633_v33  ;;  %v234_v25 = vmul.f32 %v5818_v3, %v5649_v44  ;;  %s6245_s23 = sld [smem:[#allocation8 + $0x37]] }
  0xda   :  { %v260_v29 = vadd.f32 %v253_v24, %v206_v42  ;;  %v364_v37 = vadd.f32 %v357_v26, %v310_v43  ;;  %v374_v38 = vpop.permute.xlu0 %373  ;;  %v376_v40 = vpop.permute.xlu1 %375  ;;  %v5796_v42 = vstv %s3767_s19  ;;  %v84_v43 = vmul.f32 %v5780_v28, %v5447_v1  ;;  %s3787_s19 = sld [smem:[#allocation8 + $0x1]] }
  0xdb   :  { %v5784_v45 = vsel %vm385_vm5, %v374_v38, %v376_v40  ;;  %v86_v26 = vmul.f32 %v5780_v28, %v5442_v0  ;;  %v128_v33 = vmul.f32 %v5796_v42, %v5673_v56  ;;  %v129_v44 = vmul.f32 %v5796_v42, %v5690_v9 }
  0xdc   :  { %v412_v46 = vmul.f32 %v5778_v27, %v5784_v45  ;;  %v288_v56 = vmul.f32 %v5829_v39, %v5679_v61 }
  0xde   :  { %v419_v62 = vadd.f32 %v412_v46, %v365_v51  ;;  %v5802_v63 = vpop.permute.xlu0 %377  ;;  %v272_v24 = vpop.permute.xlu1 %271  ;;  %v87_v51 = vmul.f32 %v5780_v28, %v5482_v4 }
  0xdf   :  { %v5811_v17 = vsel %vm385_vm5, %v376_v40, %v5802_v63  ;;  %v5816_v1 = vsel %vm277_vm3, %v5692_v13, %v272_v24  ;;  %v126_v40 = vmul.f32 %v5796_v42, %v5597_v15  ;;  %v5835_v13 = vstv %s5776_s25  ;;  %s6250_s25 = sld [smem:[#allocation8 + $0x14]] }
  0xe0   :  { %v413_v46 = vmul.f32 %v5778_v27, %v5811_v17  ;;  %v306_v0 = vmul.f32 %v5675_v57, %v5816_v1  ;;  %v127_v15 = vmul.f32 %v5796_v42, %v5606_v18  ;;  %v136_v61 = vadd.f32 %v129_v44, %v87_v51 }
  0xe1   :  { %v343_v44 = vmul.f32 %v5832_v35, %v5743_v60  ;;  %v237_v60 = vmul.f32 %v5818_v3, %v5760_v23 }
  0xe2   :  { %v420_v53 = vadd.f32 %v413_v46, %v366_v7  ;;  %v313_v16 = vadd.f32 %v306_v0, %v259_v10  ;;  %v5837_v4 = vpop.permute.xlu0 %273  ;;  %v5839_v20 = vpop.permute.xlu1 %371  ;;  %v5859_v46 = vstv %s5786_s29  ;;  %v125_v0 = vmul.f32 %v5796_v42, %v5611_v19  ;;  %s6256_s29 = sld [smem:[#allocation8 + $0x38]] }
  0xe3   :  { %10211 = vst [vmem:[#allocation29_spill] sm:$0xff] %v5837_v4  ;;  %10212 = vst [vmem:[#allocation30_spill] sm:$0xff] %v5839_v20  ;;  %v5851_v7 = vsel %vm277_vm3, %v272_v24, %v5837_v4  ;;  %v5856_v10 = vsel %vm385_vm5, %v5839_v20, %v374_v38  ;;  %v133_v4 = vadd.f32 %v126_v40, %v84_v43  ;;  %v5872_v38 = vstv %s5792_s30  ;;  %s6260_s30 = sld [smem:[#allocation8 + $0x3]] }
  0xe4   :  { %v307_v18 = vmul.f32 %v5675_v57, %v5851_v7  ;;  %v411_v24 = vmul.f32 %v5778_v27, %v5856_v10  ;;  %v5875_v20 = vstv %s5794_s8  ;;  %v179_v19 = vmul.f32 %v5804_v2, %v5638_v34  ;;  %s6262_s8 = sld [smem:[#allocation8 + $0x15]] }
  0xe5   :  { %v134_v6 = vadd.f32 %v127_v15, %v85_v50  ;;  %v235_v43 = vmul.f32 %v5818_v3, %v5655_v49  ;;  %v132_v28 = vadd.f32 %v125_v0, %v83_v59  ;;  %v187_v34 = vadd.f32 %v180_v32, %v133_v4 }
  0xe6   :  { %v314_v14 = vadd.f32 %v307_v18, %v260_v29  ;;  %v418_v52 = vadd.f32 %v411_v24, %v364_v37  ;;  %v428_v57 = vpop.permute.xlu0 %427  ;;  %v430_v11 = vpop.permute.xlu1 %429  ;;  %v233_v49 = vmul.f32 %v5818_v3, %v5666_v54  ;;  %v289_v50 = vmul.f32 %v5829_v39, %v5699_v21 }
  0xe7   :  { %v444_v40 = vsel %vm439_vm6, %v428_v57, %v430_v11  ;;  %v188_v37 = vadd.f32 %v181_v30, %v134_v6  ;;  %v186_v15 = vadd.f32 %v179_v19, %v132_v28  ;;  %v241_v59 = vadd.f32 %v234_v25, %v187_v34 }
  0xe8   :  { %v466_v29 = vmul.f32 %v5859_v46, %v444_v40  ;;  %v5900_v0 = vstv %s5844_s12  ;;  %v135_v24 = vadd.f32 %v128_v33, %v86_v26  ;;  %v342_v21 = vmul.f32 %v5832_v35, %v5734_v48  ;;  %s6266_s12 = sld [smem:[#allocation8 + $0x27]] }
  0xe9   :  { %v242_v18 = vadd.f32 %v235_v43, %v188_v37  ;;  %v295_v19 = vadd.f32 %v288_v56, %v241_v59  ;;  %v182_v26 = vmul.f32 %v5804_v2, %v5703_v22  ;;  %v287_v34 = vmul.f32 %v5829_v39, %v5723_v36 }
  0xea   :  { %v473_v32 = vadd.f32 %v466_v29, %v419_v62  ;;  %v5897_v4 = vpop.permute.xlu0 %431  ;;  %v326_v9 = vpop.permute.xlu1 %325  ;;  %v240_v62 = vadd.f32 %v233_v49, %v186_v15  ;;  %v236_v36 = vmul.f32 %v5818_v3, %v5747_v58  ;;  %v341_v49 = vmul.f32 %v5832_v35, %v5765_v47 }
  0xeb   :  { %v443_v6 = vsel %vm439_vm6, %v430_v11, %v5897_v4  ;;  %v334_v54 = vsel %vm331_vm4, %v5738_v55, %v326_v9  ;;  %v296_v25 = vadd.f32 %v289_v50, %v242_v18  ;;  %v183_v11 = vmul.f32 %v5804_v2, %v5718_v31 }
  0xec   :  { %v467_v30 = vmul.f32 %v5859_v46, %v443_v6  ;;  %v360_v28 = vmul.f32 %v5730_v41, %v334_v54  ;;  %v396_v55 = vmul.f32 %v5835_v13, %v5784_v45  ;;  %v189_v37 = vadd.f32 %v182_v26, %v135_v24 }
  0xed   :  { %v294_v18 = vadd.f32 %v287_v34, %v240_v62  ;;  %v350_v24 = vadd.f32 %v343_v44, %v296_v25  ;;  %v451_v23 = vmul.f32 %v5842_v12, %v443_v6  ;;  %v395_v6 = vmul.f32 %v5835_v13, %v5856_v10 }
  0xee   :  { %v474_v51 = vadd.f32 %v467_v30, %v420_v53  ;;  %v367_v43 = vadd.f32 %v360_v28, %v313_v16  ;;  %v5918_v33 = vpop.permute.xlu0 %327  ;;  %v5920_v48 = vpop.permute.xlu1 %425  ;;  %v349_v53 = vadd.f32 %v342_v21, %v295_v19  ;;  %v450_v16 = vmul.f32 %v5842_v12, %v444_v40 }
  0xef   :  { %v333_v22 = vsel %vm331_vm4, %v326_v9, %v5918_v33  ;;  %v445_v31 = vsel %vm439_vm6, %v5920_v48, %v428_v57  ;;  %v397_v57 = vmul.f32 %v5835_v13, %v5811_v17  ;;  %v190_v9 = vadd.f32 %v183_v11, %v136_v61 }
  0xf0   :  { %v361_v45 = vmul.f32 %v5730_v41, %v333_v22  ;;  %v465_v29 = vmul.f32 %v5859_v46, %v445_v31  ;;  %v403_v56 = vadd.f32 %v396_v55, %v349_v53  ;;  %v243_v28 = vadd.f32 %v236_v36, %v189_v37 }
  0xf1   :  { %v244_v19 = vadd.f32 %v237_v60, %v190_v9  ;;  %v348_v17 = vadd.f32 %v341_v49, %v294_v18  ;;  %v291_v61 = vmul.f32 %v5829_v39, %v5851_v7  ;;  %v344_v55 = vmul.f32 %v5832_v35, %v334_v54 }
  0xf2   :  { %v368_v50 = vadd.f32 %v361_v45, %v314_v14  ;;  %v472_v40 = vadd.f32 %v465_v29, %v418_v52  ;;  %v482_v15 = vpop.permute.xlu0 %481  ;;  %v484_v59 = vpop.permute.xlu1 %483  ;;  %v457_v21 = vadd.f32 %v450_v16, %v403_v56  ;;  %v290_v14 = vmul.f32 %v5829_v39, %v5816_v1 }
  0xf3   :  { %v498_v58 = vsel %vm493_vm7, %v482_v15, %v484_v59  ;;  %v404_v52 = vadd.f32 %v397_v57, %v350_v24  ;;  %v345_v45 = vmul.f32 %v5832_v35, %v333_v22  ;;  %v449_v10 = vmul.f32 %v5842_v12, %v445_v31 }
  0xf4   :  { %v504_v30 = vmul.f32 %v5872_v38, %v498_v58  ;;  %v520_v47 = vmul.f32 %v5875_v20, %v498_v58  ;;  %v297_v16 = vadd.f32 %v290_v14, %v243_v28  ;;  %v402_v56 = vadd.f32 %v395_v6, %v348_v17 }
  0xf5   :  { %v458_v44 = vadd.f32 %v451_v23, %v404_v52 }
  0xf6   :  { %v511_v62 = vadd.f32 %v504_v30, %v457_v21  ;;  %v5952_v25 = vadd.f32 %v520_v47, %v473_v32  ;;  %v486_v26 = vpop.permute.xlu0 %485  ;;  %v380_v11 = vpop.permute.xlu1 %379  ;;  %v351_v9 = vadd.f32 %v344_v55, %v297_v16  ;;  %v456_v24 = vadd.f32 %v449_v10, %v402_v56 }
  0xf7   :  { %v497_v34 = vsel %vm493_vm7, %v484_v59, %v486_v26  ;;  %v388_v1 = vsel %vm385_vm5, %v5802_v63, %v380_v11  ;;  %v298_v59 = vadd.f32 %v291_v61, %v244_v19 }
  0xf8   :  { %v536_v7 = vadd.f32 %v5900_v0, %v511_v62  ;;  %v505_v32 = vmul.f32 %v5872_v38, %v497_v34  ;;  %v521_v53 = vmul.f32 %v5875_v20, %v497_v34  ;;  %v414_v54 = vmul.f32 %v5778_v27, %v388_v1 }
  0xf9   :  { %v398_v63 = vmul.f32 %v5835_v13, %v388_v1  ;;  %v352_v23 = vadd.f32 %v345_v45, %v298_v59 }
  0xfa   :  { %v5968_v29 = vmax.f32 %v536_v7, 0.0  ;;  %v512_v37 = vadd.f32 %v505_v32, %v458_v44  ;;  %v5970_v36 = vadd.f32 %v521_v53, %v474_v51  ;;  %v5973_v60 = vpop.permute.xlu0 %381  ;;  %v5975_v49 = vpop.permute.xlu1 %479  ;;  %v421_v57 = vadd.f32 %v414_v54, %v367_v43 }
  0xfb   :  { %v387_v22 = vsel %vm385_vm5, %v380_v11, %v5973_v60  ;;  %v499_v31 = vsel %vm493_vm7, %v5975_v49, %v482_v15  ;;  %v405_v15 = vadd.f32 %v398_v63, %v351_v9 }
  0xfc   :  { %v537_v51 = vadd.f32 %v5900_v0, %v512_v37  ;;  %v415_v18 = vmul.f32 %v5778_v27, %v387_v22  ;;  %625 = vrot.lane.b32.xlu0 %v5968_v29, %s5376_s21  ;;  %v399_v43 = vmul.f32 %v5835_v13, %v387_v22  ;;  %v503_v58 = vmul.f32 %v5872_v38, %v499_v31 }
  0xfd   :  { %v519_v21 = vmul.f32 %v5875_v20, %v499_v31 }
  0xfe   :  { %v5990_v30 = vmax.f32 %v537_v51, 0.0  ;;  %v422_v47 = vadd.f32 %v415_v18, %v368_v50  ;;  %v434_v28 = vpop.permute.xlu0 %433  ;;  %v5992_v19 = vpop.permute.xlu1 %435  ;;  %v510_v17 = vadd.f32 %v503_v58, %v456_v24 }
  0xff   :  { %v5994_v14 = vadd.f32 %v519_v21, %v472_v40  ;;  %v442_v52 = vsel %vm439_vm6, %v5897_v4, %v434_v28  ;;  %v441_v61 = vsel %vm439_vm6, %v434_v28, %v5992_v19  ;;  %v406_v40 = vadd.f32 %v399_v43, %v352_v23  ;;  %v10215_v43 = vld [vmem:[#allocation15_spill] sm:$0xff]  ;;  %v10216_v23 = vld [vmem:[#allocation21_spill] sm:$0xff] }
 0x100   :  { %v452_v62 = vmul.f32 %v5842_v12, %v442_v52  ;;  %v468_v11 = vmul.f32 %v5859_v46, %v442_v52  ;;  %v453_v50 = vmul.f32 %v5842_v12, %v441_v61  ;;  %v469_v6 = vmul.f32 %v5859_v46, %v441_v61  ;;  %627 = vrot.lane.b32.xlu1 %v5990_v30, %s5376_s21  ;;  %v10218_v61 = vld [vmem:[#allocation24_spill] sm:$0xff] }
 0x101   :  { %v535_v55 = vadd.f32 %v5900_v0, %v510_v17  ;;  %v97_v58 = vmul.f32 %v10215_v43, %v5491_v5 }
 0x102   :  { %v459_v34 = vadd.f32 %v452_v62, %v405_v15  ;;  %v475_v4 = vadd.f32 %v468_v11, %v421_v57  ;;  %v476_v1 = vadd.f32 %v469_v6, %v422_v47  ;;  %v488_v44 = vpop.permute.xlu0 %487  ;;  %v6009_v7 = vpop.permute.xlu1 %489  ;;  %v460_v53 = vadd.f32 %v453_v50, %v406_v40  ;;  %v10214_v57 = vld [vmem:[#allocation14_spill] sm:$0xff]  ;;  %v10217_v47 = vld [vmem:[#allocation17_spill] sm:$0xff]  ;;  %v10220_v40 = vld [vmem:[#allocation16_spill] sm:$0xff] }
 0x103   :  { %v6011_v32 = vmax.f32 %v535_v55, 0.0  ;;  %v496_v16 = vsel %vm493_vm7, %v486_v26, %v488_v44  ;;  %v495_v45 = vsel %vm493_vm7, %v488_v44, %v6009_v7  ;;  %v10213_v26 = vld [vmem:[#allocation28_spill] sm:$0xff]  ;;  %v98_v21 = vmul.f32 %v10215_v43, %v10214_v57 }
 0x104   :  { %v506_v10 = vmul.f32 %v5872_v38, %v496_v16  ;;  %v522_v54 = vmul.f32 %v5875_v20, %v496_v16  ;;  %v507_v37 = vmul.f32 %v5872_v38, %v495_v45  ;;  %v523_v63 = vmul.f32 %v5875_v20, %v495_v45  ;;  %710 = vrot.lane.b32.xlu1 %v5968_v29, %s5377_s26 }
 0x105   :  { %623 = vrot.lane.b32.xlu0 %v6011_v32, %s5376_s21  ;;  %v88_v56 = vmul.f32 %v10213_v26, %v5491_v5  ;;  %v89_v22 = vmul.f32 %v10213_v26, %v10214_v57  ;;  %v10219_v5 = vld [vmem:[#allocation19_spill] sm:$0xff] }
 0x106   :  { %v513_v31 = vadd.f32 %v506_v10, %v459_v34  ;;  %v6030_v59 = vadd.f32 %v522_v54, %v475_v4  ;;  %v514_v9 = vadd.f32 %v507_v37, %v460_v53  ;;  %v6032_v51 = vadd.f32 %v523_v63, %v476_v1  ;;  %v112_v18 = vpop.permute.xlu0 %111  ;;  %v168_v24 = vpop.permute.xlu1 %167  ;;  %v10221_v63 = vld [vmem:[#allocation18_spill] sm:$0xff] }
 0x107   :  { %v116_v15 = vsel %vm115_vm0, %v10216_v23, %v112_v18  ;;  %v122_v28 = vsel %vm115_vm0, %v112_v18, %v10217_v47  ;;  %v170_v62 = vsel %vm169_vm1, %v10218_v61, %v168_v24  ;;  %v176_v11 = vsel %vm169_vm1, %v168_v24, %v10219_v5  ;;  %v10223_v18 = vld [vmem:[#allocation22_spill] sm:$0xff]  ;;  %v10226_v61 = vld [vmem:[#allocation20_spill] sm:$0xff] }
 0x108   :  { %v538_v17 = vadd.f32 %v5900_v0, %v513_v31  ;;  %v539_v52 = vadd.f32 %v5900_v0, %v514_v9  ;;  %708 = vrot.lane.b32.xlu1 %v6011_v32, %s5377_s26  ;;  %v130_v50 = vmul.f32 %v5796_v42, %v116_v15  ;;  %v131_v6 = vmul.f32 %v5796_v42, %v122_v28  ;;  %v10222_v31 = vld [vmem:[#allocation26_spill] sm:$0xff] }
 0x109   :  { %v146_v55 = vmul.f32 %v10220_v40, %v116_v15  ;;  %v147_v34 = vmul.f32 %v10220_v40, %v122_v28  ;;  %712 = vrot.lane.b32.xlu0 %v5990_v30, %s5377_s26  ;;  %v184_v37 = vmul.f32 %v5804_v2, %v170_v62  ;;  %v185_v42 = vmul.f32 %v5804_v2, %v176_v11  ;;  %v10225_v2 = vld [vmem:[#allocation25_spill] sm:$0xff] }
 0x10a   :  { %v6060_v4 = vmax.f32 %v538_v17, 0.0  ;;  %v6062_v1 = vmax.f32 %v539_v52, 0.0  ;;  %v222_v44 = vpop.permute.xlu0 %221  ;;  %v276_v53 = vpop.permute.xlu1 %275  ;;  %v137_v16 = vadd.f32 %v130_v50, %v88_v56  ;;  %v138_v45 = vadd.f32 %v131_v6, %v89_v22  ;;  %v10224_v22 = vld [vmem:[#allocation29_spill] sm:$0xff]  ;;  %v10227_v6 = vld [vmem:[#allocation23_spill] sm:$0xff] }
 0x10b   :  { %v153_v10 = vadd.f32 %v146_v55, %v97_v58  ;;  %v154_v54 = vadd.f32 %v147_v34, %v98_v21  ;;  %v200_v26 = vmul.f32 %v10221_v63, %v170_v62  ;;  %v201_v57 = vmul.f32 %v10221_v63, %v176_v11 }
 0x10c   :  { %797 = vrot.lane.b32.xlu1 %v5990_v30, %s5378_s27  ;;  %v224_v9 = vsel %vm223_vm2, %v10222_v31, %v222_v44  ;;  %v230_v56 = vsel %vm223_vm2, %v222_v44, %v10223_v18  ;;  %v278_v24 = vsel %vm277_vm3, %v10224_v22, %v276_v53  ;;  %v284_v43 = vsel %vm277_vm3, %v276_v53, %v10225_v2 }
 0x10d   :  { %795 = vrot.lane.b32.xlu0 %v5968_v29, %s5378_s27  ;;  %v191_v58 = vadd.f32 %v184_v37, %v137_v16  ;;  %v192_v21 = vadd.f32 %v185_v42, %v138_v45  ;;  %v207_v23 = vadd.f32 %v200_v26, %v153_v10  ;;  %v208_v15 = vadd.f32 %v201_v57, %v154_v54  ;;  %v10228_v45 = vld [vmem:[#allocation27_spill] sm:$0xff]  ;;  %v10229_v54 = vld [vmem:[#allocation30_spill] sm:$0xff] }
 0x10e   :  { %v330_v47 = vpop.permute.xlu0 %329  ;;  %v384_v28 = vpop.permute.xlu1 %383  ;;  %v238_v17 = vmul.f32 %v5818_v3, %v224_v9  ;;  %v239_v52 = vmul.f32 %v5818_v3, %v230_v56  ;;  %v254_v62 = vmul.f32 %v10226_v61, %v224_v9  ;;  %v255_v5 = vmul.f32 %v10226_v61, %v230_v56 }
 0x10f   :  { %v292_v11 = vmul.f32 %v5829_v39, %v278_v24  ;;  %v293_v50 = vmul.f32 %v5829_v39, %v284_v43  ;;  %v308_v40 = vmul.f32 %v10227_v6, %v278_v24  ;;  %v309_v55 = vmul.f32 %v10227_v6, %v284_v43 }
 0x110   :  { %631 = vrot.lane.b32.xlu1 %v6062_v1, %s5376_s21  ;;  %v245_v34 = vadd.f32 %v238_v17, %v191_v58  ;;  %v246_v44 = vadd.f32 %v239_v52, %v192_v21  ;;  %v261_v53 = vadd.f32 %v254_v62, %v207_v23  ;;  %v262_v16 = vadd.f32 %v255_v5, %v208_v15 }
 0x111   :  { %629 = vrot.lane.b32.xlu0 %v6060_v4, %s5376_s21  ;;  %v332_v3 = vsel %vm331_vm4, %v5918_v33, %v330_v47  ;;  %v338_v39 = vsel %vm331_vm4, %v330_v47, %v10228_v45  ;;  %v386_v10 = vsel %vm385_vm5, %v5973_v60, %v384_v28  ;;  %v392_v37 = vsel %vm385_vm5, %v384_v28, %v10229_v54 }
 0x112   :  { %v299_v42 = vadd.f32 %v292_v11, %v245_v34  ;;  %v300_v63 = vadd.f32 %v293_v50, %v246_v44  ;;  %v315_v26 = vadd.f32 %v308_v40, %v261_v53  ;;  %v316_v57 = vadd.f32 %v309_v55, %v262_v16  ;;  %v438_v56 = vpop.permute.xlu0 %437  ;;  %v492_v22 = vpop.permute.xlu1 %491 }
 0x113   :  { %v346_v31 = vmul.f32 %v5832_v35, %v332_v3  ;;  %v347_v33 = vmul.f32 %v5832_v35, %v338_v39  ;;  %v362_v9 = vmul.f32 %v5730_v41, %v332_v3  ;;  %v363_v18 = vmul.f32 %v5730_v41, %v338_v39 }
 0x114   :  { %880 = vrot.lane.b32.xlu1 %v5968_v29, %s5379_s9  ;;  %v400_v60 = vmul.f32 %v5835_v13, %v386_v10  ;;  %v401_v24 = vmul.f32 %v5835_v13, %v392_v37  ;;  %v416_v2 = vmul.f32 %v5778_v27, %v386_v10  ;;  %v417_v43 = vmul.f32 %v5778_v27, %v392_v37 }
 0x115   :  { %793 = vrot.lane.b32.xlu0 %v6011_v32, %s5378_s27  ;;  %v353_v35 = vadd.f32 %v346_v31, %v299_v42  ;;  %v354_v41 = vadd.f32 %v347_v33, %v300_v63  ;;  %v369_v58 = vadd.f32 %v362_v9, %v315_v26  ;;  %v370_v21 = vadd.f32 %v363_v18, %v316_v57 }
 0x116   :  { %v440_v23 = vsel %vm439_vm6, %v5992_v19, %v438_v56  ;;  %v446_v13 = vsel %vm439_vm6, %v438_v56, %v5920_v48  ;;  %v494_v27 = vsel %vm493_vm7, %v6009_v7, %v492_v22  ;;  %v500_v15 = vsel %vm493_vm7, %v492_v22, %v5975_v49 }
 0x117   :  { %v407_v47 = vadd.f32 %v400_v60, %v353_v35  ;;  %v408_v28 = vadd.f32 %v401_v24, %v354_v41  ;;  %v423_v17 = vadd.f32 %v416_v2, %v369_v58  ;;  %v424_v52 = vadd.f32 %v417_v43, %v370_v21 }
 0x118   :  { %714 = vrot.lane.b32.xlu1 %v6060_v4, %s5377_s26  ;;  %v454_v19 = vmul.f32 %v5842_v12, %v440_v23  ;;  %v455_v61 = vmul.f32 %v5842_v12, %v446_v13  ;;  %v470_v48 = vmul.f32 %v5859_v46, %v440_v23  ;;  %v471_v62 = vmul.f32 %v5859_v46, %v446_v13 }
 0x119   :  { %882 = vrot.lane.b32.xlu0 %v5990_v30, %s5379_s9  ;;  %v508_v49 = vmul.f32 %v5872_v38, %v494_v27  ;;  %v509_v7 = vmul.f32 %v5872_v38, %v500_v15  ;;  %v524_v5 = vmul.f32 %v5875_v20, %v494_v27  ;;  %v525_v11 = vmul.f32 %v5875_v20, %v500_v15 }
 0x11a   :  { %v461_v50 = vadd.f32 %v454_v19, %v407_v47  ;;  %v462_v6 = vadd.f32 %v455_v61, %v408_v28  ;;  %v477_v40 = vadd.f32 %v470_v48, %v423_v17  ;;  %v478_v12 = vadd.f32 %v471_v62, %v424_v52 }
 0x11b   :  { %v550_v53 = vstv %s6120_s13  ;;  %s6268_s13 = sld [smem:[#allocation8 + $0x39]]  ;;  %v6272_v63 = vstv %s587_s14  ;;  %v6274_v26 = vstv %s3785_s15  ;;  %v6278_v57 = vstv %s3786_s16  ;;  %s6292_s14 = sld [smem:[#allocation8 + $0x28]] }
 0x11c   :  { %878 = vrot.lane.b32.xlu1 %v6011_v32, %s5379_s9  ;;  %v515_v46 = vadd.f32 %v508_v49, %v461_v50  ;;  %v516_v55 = vadd.f32 %v509_v7, %v462_v6  ;;  %v531_v34 = vadd.f32 %v524_v5, %v477_v40  ;;  %v532_v44 = vadd.f32 %v525_v11, %v478_v12  ;;  %s6294_s15 = sld [smem:[#allocation8 + $0x3a]]  ;;  %s6315_s16 = sld [smem:[#allocation8 + $0x5]] }
 0x11d   :  { %716 = vrot.lane.b32.xlu0 %v6062_v1, %s5377_s26  ;;  %v553_v39 = vadd.f32 %v550_v53, %v5970_v36  ;;  %v552_v10 = vadd.f32 %v550_v53, %v5952_v25  ;;  %v551_v36 = vadd.f32 %v550_v53, %v5994_v14  ;;  %v555_v14 = vadd.f32 %v550_v53, %v6032_v51 }
 0x11e   :  { %v6152_v38 = vadd.f32 %v5900_v0, %v515_v46  ;;  %v6155_v20 = vadd.f32 %v5900_v0, %v516_v55  ;;  %v6157_v16 = vadd.f32 %v550_v53, %v531_v34  ;;  %v6159_v3 = vadd.f32 %v550_v53, %v532_v44 }
 0x11f   :  { %v6171_v0 = vstv %s3784_s0  ;;  %v6213_v54 = vmax.f32 %v553_v39, 0.0  ;;  %v6215_v37 = vmax.f32 %v552_v10, 0.0  ;;  %v6226_v25 = vmax.f32 %v551_v36, 0.0  ;;  %s6280_s0 = sld [smem:[#allocation8 + $0x4]] }
 0x120   :  { %967 = vrot.lane.b32.xlu1 %v5990_v30, %s5380_s2  ;;  %v6177_v45 = vmul.f32 %v6171_v0, %v6062_v1  ;;  %v554_v42 = vadd.f32 %v550_v53, %v6030_v59  ;;  %v6264_v51 = vmax.f32 %v555_v14, 0.0  ;;  %v6284_v31 = vstv %s3819_s17  ;;  %s6317_s17 = sld [smem:[#allocation8 + $0x17]] }
 0x121   :  { %965 = vrot.lane.b32.xlu0 %v5968_v29, %s5380_s2  ;;  %10232 = vst [vmem:[#allocation15_spill] sm:$0xff] %v6284_v31  ;;  %v6286_v33 = vstv %s3820_s3  ;;  %v6290_v9 = vstv %s3787_s19  ;;  %v6297_v18 = vstv %s6234_s4  ;;  %v6304_v22 = vmul.f32 %v6272_v63, %v5968_v29  ;;  %s6335_s3 = sld [smem:[#allocation8 + $0x29]]  ;;  %s6337_s4 = sld [smem:[#allocation8 + $0x3b]] }
 0x122   :  { %10230 = vst [vmem:[#allocation28_spill] sm:$0xff] %v6177_v45  ;;  %10231 = vst [vmem:[#allocation14_spill] sm:$0xff] %v6264_v51  ;;  %v6270_v59 = vmax.f32 %v554_v42, 0.0  ;;  %v6300_v56 = vstv %s6236_s18  ;;  %v6307_v60 = vstv %s6240_s20  ;;  %v6310_v24 = vstv %s6243_s22  ;;  %s6397_s18 = sld [smem:[#allocation8 + $0x6]]  ;;  %s6399_s19 = sld [smem:[#allocation8 + $0x18]] }
 0x123   :  { %10233 = vst [vmem:[#allocation21_spill] sm:$0xff] %v6286_v33  ;;  %10234 = vst [vmem:[#allocation17_spill] sm:$0xff] %v6290_v9  ;;  %v6313_v2 = vstv %s6245_s23  ;;  %v6321_v43 = vmul.f32 %v6171_v0, %v5968_v29  ;;  %v6325_v35 = vmul.f32 %v6274_v26, %v5968_v29  ;;  %v6329_v41 = vmul.f32 %v6278_v57, %v5968_v29  ;;  %s6417_s20 = sld [smem:[#allocation8 + $0x2a]]  ;;  %s6419_s22 = sld [smem:[#allocation8 + $0x3c]] }
 0x124   :  { %801 = vrot.lane.b32.xlu1 %v6062_v1, %s5378_s27  ;;  %10235 = vst [vmem:[#allocation24_spill] sm:$0xff] %v6297_v18  ;;  %10236 = vst [vmem:[#allocation19_spill] sm:$0xff] %v6300_v56  ;;  %v6333_v58 = vmul.f32 %v6272_v63, %v6011_v32  ;;  %v6343_v21 = vmul.f32 %v6171_v0, %v6011_v32  ;;  %v6351_v23 = vmul.f32 %v6278_v57, %v6011_v32  ;;  %s6459_s23 = sld [smem:[#allocation8 + $0x7]] }
 0x125   :  { %799 = vrot.lane.b32.xlu0 %v6060_v4, %s5378_s27  ;;  %10237 = vst [vmem:[#allocation16_spill] sm:$0xff] %v6307_v60  ;;  %10238 = vst [vmem:[#allocation18_spill] sm:$0xff] %v6310_v24  ;;  %v6354_v13 = vstv %s6248_s24  ;;  %v6359_v27 = vstv %s6250_s25  ;;  %v6362_v15 = vstv %s6254_s28  ;;  %v6369_v28 = vmul.f32 %v6272_v63, %v5990_v30  ;;  %s6461_s24 = sld [smem:[#allocation8 + $0x19]]  ;;  %s6471_s25 = sld [smem:[#allocation8 + $0x3d]] }
 0x126   :  { %10239 = vst [vmem:[#allocation26_spill] sm:$0xff] %v6313_v2  ;;  %10240 = vst [vmem:[#allocation22_spill] sm:$0xff] %v6354_v13  ;;  %v6365_v47 = vstv %s6256_s29  ;;  %v6372_v17 = vstv %s6260_s30  ;;  %v6375_v52 = vstv %s6262_s8  ;;  %v6381_v19 = vstv %s6268_s13  ;;  %s6491_s28 = sld [smem:[#allocation8 + $0x8]]  ;;  %s6493_s29 = sld [smem:[#allocation8 + $0x1a]] }
 0x127   :  { %10241 = vst [vmem:[#allocation29_spill] sm:$0xff] %v6359_v27  ;;  %10242 = vst [vmem:[#allocation25_spill] sm:$0xff] %v6362_v15  ;;  %v6384_v61 = vmax.f32 %v6152_v38, 0.0  ;;  %v6387_v48 = vmax.f32 %v6155_v20, 0.0  ;;  %v6391_v62 = vmul.f32 %v6272_v63, %v6060_v4  ;;  %v6395_v49 = vmul.f32 %v6171_v0, %v5990_v30  ;;  %s6511_s30 = sld [smem:[#allocation8 + $0x2c]]  ;;  %s6513_s8 = sld [smem:[#allocation8 + $0x3e]] }
 0x128   :  { %1050 = vrot.lane.b32.xlu1 %v5968_v29, %s5381_s1  ;;  %10243 = vst [vmem:[#allocation20_spill] sm:$0xff] %v6365_v47  ;;  %10244 = vst [vmem:[#allocation23_spill] sm:$0xff] %v6372_v17  ;;  %v6402_v7 = vmax.f32 %v6157_v16, 0.0  ;;  %v6405_v5 = vmax.f32 %v6159_v3, 0.0  ;;  %v6411_v11 = vmul.f32 %v6171_v0, %v6060_v4  ;;  %v6415_v50 = vmul.f32 %v6274_v26, %v5990_v30  ;;  %s6536_s13 = sld [smem:[#allocation8 + $0x1c]] }
 0x129   :  { %963 = vrot.lane.b32.xlu0 %v6011_v32, %s5380_s2  ;;  %10245 = vst [vmem:[#allocation27_spill] sm:$0xff] %v6375_v52  ;;  %10247 = vst [vmem:[#allocation31_spill] sm:$0xff] %v6381_v19  ;;  %v6425_v6 = vmul.f32 %v6274_v26, %v6060_v4  ;;  %v6429_v40 = vmul.f32 %v6278_v57, %v5990_v30  ;;  %v6433_v12 = vmul.f32 %v6278_v57, %v6060_v4 }
 0x12a   :  { %10248 = vst [vmem:[#allocation32_spill] sm:$0xff] %v6387_v48  ;;  %10249 = vst [vmem:[#allocation33_spill] sm:$0xff] %v6402_v7  ;;  %v6436_v46 = vstv %s6280_s0  ;;  %v6442_v34 = vstv %s6292_s14  ;;  %v6445_v44 = vstv %s6294_s15  ;;  %v6448_v53 = vstv %s6315_s16  ;;  %s6561_s0 = sld [smem:[#allocation8 + $0x2e]]  ;;  %s6563_s14 = sld [smem:[#allocation8 + $0x40]] }
 0x12b   :  { %10250 = vst [vmem:[#allocation34_spill] sm:$0xff] %v6405_v5  ;;  %10251 = vst [vmem:[#allocation35_spill] sm:$0xff] %v6436_v46  ;;  %v6451_v38 = vstv %s6317_s17  ;;  %v6454_v20 = vstv %s6335_s3  ;;  %v6475_v16 = vmul.f32 %v6286_v33, %v6215_v37  ;;  %v6479_v3 = vmul.f32 %v6297_v18, %v6215_v37  ;;  %s6571_s15 = sld [smem:[#allocation8 + $0xb]]  ;;  %s6573_s16 = sld [smem:[#allocation8 + $0x1d]] }
 0x12c   :  { %884 = vrot.lane.b32.xlu1 %v6060_v4, %s5379_s9  ;;  %10253 = vst [vmem:[#allocation37_spill] sm:$0xff] %v6442_v34  ;;  %10254 = vst [vmem:[#allocation38_spill] sm:$0xff] %v6445_v44  ;;  %v6483_v39 = vmul.f32 %v6300_v56, %v6215_v37  ;;  %v6487_v10 = vmul.f32 %v6284_v31, %v6226_v25  ;;  %v6497_v36 = vmul.f32 %v6286_v33, %v6226_v25  ;;  %s6593_s17 = sld [smem:[#allocation8 + $0x2f]]  ;;  %s6595_s3 = sld [smem:[#allocation8 + $0x41]] }
 0x12d   :  { %1052 = vrot.lane.b32.xlu0 %v5990_v30, %s5381_s1  ;;  %10255 = vst [vmem:[#allocation39_spill] sm:$0xff] %v6448_v53  ;;  %10256 = vst [vmem:[#allocation40_spill] sm:$0xff] %v6451_v38  ;;  %v6501_v14 = vmul.f32 %v6297_v18, %v6226_v25  ;;  %v6505_v42 = vmul.f32 %v6300_v56, %v6226_v25  ;;  %v6509_v45 = vmul.f32 %v6284_v31, %v6213_v54 }
 0x12e   :  { %10257 = vst [vmem:[#allocation41_spill] sm:$0xff] %v6454_v20  ;;  %10260 = vst [vmem:[#allocation44_spill] sm:$0xff] %v6475_v16  ;;  %v6521_v16 = vmul.f32 %v6286_v33, %v6213_v54 }
 0x12f   :  { %10261 = vst [vmem:[#allocation45_spill] sm:$0xff] %v6479_v3  ;;  %10262 = vst [vmem:[#allocation46_spill] sm:$0xff] %v6483_v39  ;;  %v6559_v39 = vstv %s6419_s22  ;;  %s6702_s22 = sld [smem:[#allocation8 + $0xd]] }
 0x130   :  { %1048 = vrot.lane.b32.xlu1 %v6011_v32, %s5381_s1  ;;  %10263 = vst [vmem:[#allocation47_spill] sm:$0xff] %v6487_v10  ;;  %10264 = vst [vmem:[#allocation48_spill] sm:$0xff] %v6497_v36  ;;  %v6517_v36 = vmul.f32 %v6284_v31, %v6270_v59  ;;  %v6556_v10 = vstv %s6417_s20  ;;  %s6692_s20 = sld [smem:[#allocation8 + $0x42]] }
 0x131   :  { %886 = vrot.lane.b32.xlu0 %v6062_v1, %s5379_s9  ;;  %10265 = vst [vmem:[#allocation49_spill] sm:$0xff] %v6501_v14  ;;  %10266 = vst [vmem:[#allocation50_spill] sm:$0xff] %v6505_v42  ;;  %v6525_v42 = vmul.f32 %v6286_v33, %v6270_v59  ;;  %v6532_v14 = vstv %s6397_s18  ;;  %s6635_s18 = sld [smem:[#allocation8 + $0x1e]] }
 0x132   :  { %10267 = vst [vmem:[#allocation51_spill] sm:$0xff] %v6509_v45  ;;  %10268 = vst [vmem:[#allocation52_spill] sm:$0xff] %v6517_v36  ;;  %v6529_v45 = vmul.f32 %v6297_v18, %v6213_v54  ;;  %v6540_v36 = vmul.f32 %v6297_v18, %v6270_v59 }
 0x133   :  { %10269 = vst [vmem:[#allocation53_spill] sm:$0xff] %v6521_v16  ;;  %10270 = vst [vmem:[#allocation54_spill] sm:$0xff] %v6525_v42  ;;  %v6544_v16 = vmul.f32 %v6300_v56, %v6213_v54  ;;  %v6548_v42 = vmul.f32 %v6300_v56, %v6270_v59  ;;  %v6577_v56 = vmul.f32 %v6274_v26, %v6062_v1 }
 0x134   :  { %1137 = vrot.lane.b32.xlu1 %v5990_v30, %s5382_s10  ;;  %10271 = vst [vmem:[#allocation55_spill] sm:$0xff] %v6529_v45  ;;  %10272 = vst [vmem:[#allocation56_spill] sm:$0xff] %v6532_v14  ;;  %v6553_v45 = vstv %s6399_s19  ;;  %s6637_s19 = sld [smem:[#allocation8 + $0x30]] }
 0x135   :  { %1135 = vrot.lane.b32.xlu0 %v5968_v29, %s5382_s10  ;;  %10273 = vst [vmem:[#allocation57_spill] sm:$0xff] %v6540_v36  ;;  %10274 = vst [vmem:[#allocation58_spill] sm:$0xff] %v6544_v16  ;;  %v6567_v16 = vmul.f32 %v6272_v63, %v6062_v1  ;;  %v6585_v36 = vmul.f32 %v6272_v63, %v6384_v61 }
 0x136   :  { %10275 = vst [vmem:[#allocation59_spill] sm:$0xff] %v6548_v42  ;;  %10276 = vst [vmem:[#allocation60_spill] sm:$0xff] %v6553_v45  ;;  %v6581_v42 = vmul.f32 %v6278_v57, %v6062_v1  ;;  %v6774_v53 = vstv %s6692_s20  ;;  %s6954_s20 = sld [smem:[#allocation8 + $0xe]] }
 0x137   :  { %10277 = vst [vmem:[#allocation61_spill] sm:$0xff] %v6556_v10  ;;  %10278 = vst [vmem:[#allocation62_spill] sm:$0xff] %v6559_v39  ;;  %v6662_v39 = vstv %s6471_s25  ;;  %v6673_v10 = vstv %s6511_s30  ;;  %s7294_s30 = sld [smem:[#allocation8 + $0xf]] }
 0x138   :  { %971 = vrot.lane.b32.xlu1 %v6062_v1, %s5380_s2  ;;  %10279 = vst [vmem:[#allocation63_spill] sm:$0xff] %v6567_v16  ;;  %10280 = vst [vmem:[#allocation64_spill] sm:$0xff] %v6577_v56  ;;  %v6589_v16 = vmul.f32 %v6272_v63, %v6387_v48  ;;  %v6599_v56 = vmul.f32 %v6171_v0, %v6384_v61  ;;  %v6607_v63 = vmul.f32 %v6274_v26, %v6384_v61 }
 0x139   :  { %969 = vrot.lane.b32.xlu0 %v6060_v4, %s5380_s2  ;;  %10281 = vst [vmem:[#allocation65_spill] sm:$0xff] %v6581_v42  ;;  %10282 = vst [vmem:[#allocation66_spill] sm:$0xff] %v6585_v36 }
 0x13a   :  { %10283 = vst [vmem:[#allocation67_spill] sm:$0xff] %v6589_v16  ;;  %10284 = vst [vmem:[#allocation68_spill] sm:$0xff] %v6599_v56  ;;  %v6611_v16 = vmul.f32 %v6274_v26, %v6387_v48 }
 0x13b   :  { %10286 = vst [vmem:[#allocation70_spill] sm:$0xff] %v6607_v63  ;;  %v6628_v63 = vmul.f32 %v6284_v31, %v6405_v5  ;;  %10296 = vst [vmem:[#allocation80_spill] sm:$0xff] %v6662_v39 }
 0x13c   :  { %1220 = vrot.lane.b32.xlu1 %v5968_v29, %s10009_s11  ;;  %v6347_v29 = vmul.f32 %v6274_v26, %v6011_v32  ;;  %10287 = vst [vmem:[#allocation71_spill] sm:$0xff] %v6611_v16  ;;  %10300 = vst [vmem:[#allocation84_spill] sm:$0xff] %v6673_v10 }
 0x13d   :  { %1133 = vrot.lane.b32.xlu0 %v6011_v32, %s5382_s10  ;;  %10290 = vst [vmem:[#allocation74_spill] sm:$0xff] %v6628_v63  ;;  %v6646_v63 = vstv %s6459_s23  ;;  %s6718_s23 = sld [smem:[#allocation8 + $0x1f]]  ;;  %10315 = vst [vmem:[#allocation99_spill] sm:$0xff] %v6774_v53 }
 0x13e   :  { %10292 = vst [vmem:[#allocation76_spill] sm:$0xff] %v6646_v63 }
 0x140   :  { %1054 = vrot.lane.b32.xlu1 %v6060_v4, %s5381_s1 }
 0x141   :  { %1222 = vrot.lane.b32.xlu0 %v5990_v30, %s10009_s11  ;;  %v6457_v30 = vstv %s6337_s4  ;;  %s6616_s4 = sld [smem:[#allocation8 + $0xc]] }
 0x142   :  { %10258 = vst [vmem:[#allocation42_spill] sm:$0xff] %v6457_v30 }
 0x144   :  { %1218 = vrot.lane.b32.xlu1 %v6011_v32, %s10009_s11  ;;  %v6378_v32 = vstv %s6266_s12  ;;  %s6534_s12 = sld [smem:[#allocation8 + $0xa]] }
 0x145   :  { %1056 = vrot.lane.b32.xlu0 %v6062_v1, %s5381_s1  ;;  %10246 = vst [vmem:[#allocation30_spill] sm:$0xff] %v6378_v32 }
 0x148   :  { %1141 = vrot.lane.b32.xlu1 %v6062_v1, %s5382_s10 }
 0x149   :  { %1139 = vrot.lane.b32.xlu0 %v6060_v4, %s5382_s10 }
 0x14c   :  { %1378 = vrot.lane.b32.xlu1 %v6213_v54, %s5376_s21 }
 0x14d   :  { %1376 = vrot.lane.b32.xlu0 %v6215_v37, %s5376_s21 }
 0x150   :  { %1226 = vrot.lane.b32.xlu1 %v6062_v1, %s10009_s11  ;;  %v6603_v1 = vmul.f32 %v6171_v0, %v6387_v48  ;;  %v6620_v0 = vmul.f32 %v6278_v57, %v6384_v61 }
 0x151   :  { %1224 = vrot.lane.b32.xlu0 %v6060_v4, %s10009_s11  ;;  %s6282_s11 = sld [smem:[#allocation8 + $0x16]]  ;;  %v6465_v4 = vmul.f32 %v6284_v31, %v6215_v37  ;;  %v6649_v31 = vstv %s6461_s24  ;;  %s6748_s24 = sld [smem:[#allocation8 + $0x31]] }
 0x152   :  { %10285 = vst [vmem:[#allocation69_spill] sm:$0xff] %v6603_v1  ;;  %10288 = vst [vmem:[#allocation72_spill] sm:$0xff] %v6620_v0  ;;  %v6624_v1 = vmul.f32 %v6278_v57, %v6387_v48  ;;  %v6641_v57 = vmul.f32 %v6286_v33, %v6405_v5  ;;  %v6656_v0 = vmul.f32 %v6297_v18, %v6405_v5  ;;  %v6676_v18 = vstv %s6513_s8  ;;  %s7367_s8 = sld [smem:[#allocation8 + $0x21]] }
 0x153   :  { %10259 = vst [vmem:[#allocation43_spill] sm:$0xff] %v6465_v4  ;;  %10293 = vst [vmem:[#allocation77_spill] sm:$0xff] %v6649_v31  ;;  %v6667_v31 = vstv %s6491_s28  ;;  %v6716_v5 = vstv %s6595_s3 }
 0x154   :  { %1461 = vrot.lane.b32.xlu1 %v6215_v37, %s5377_s26  ;;  %10289 = vst [vmem:[#allocation73_spill] sm:$0xff] %v6624_v1  ;;  %10291 = vst [vmem:[#allocation75_spill] sm:$0xff] %v6641_v57 }
 0x155   :  { %1374 = vrot.lane.b32.xlu0 %v6226_v25, %s5376_s21  ;;  %10295 = vst [vmem:[#allocation79_spill] sm:$0xff] %v6656_v0  ;;  %10298 = vst [vmem:[#allocation82_spill] sm:$0xff] %v6667_v31  ;;  %v6726_v31 = vstv %s6616_s4 }
 0x156   :  { %10301 = vst [vmem:[#allocation85_spill] sm:$0xff] %v6676_v18  ;;  %10310 = vst [vmem:[#allocation94_spill] sm:$0xff] %v6716_v5 }
 0x157   :  { %v6439_v55 = vstv %s6282_s11  ;;  %s6469_s11 = sld [smem:[#allocation8 + $0x2b]]  ;;  %10311 = vst [vmem:[#allocation95_spill] sm:$0xff] %v6726_v31  ;;  %v3874_v31 = vld [vmem:[%s9982_s5 + $0x400] sm:$0xff] }
 0x158   :  { %1459 = vrot.lane.b32.xlu1 %v6226_v25, %s5377_s26  ;;  %10252 = vst [vmem:[#allocation36_spill] sm:$0xff] %v6439_v55 }
 0x159   :  { %1463 = vrot.lane.b32.xlu0 %v6213_v54, %s5377_s26 }
 0x15c   :  { %1548 = vrot.lane.b32.xlu1 %v6213_v54, %s5378_s27 }
 0x15d   :  { %1546 = vrot.lane.b32.xlu0 %v6215_v37, %s5378_s27  ;;  %v6652_v1 = vstv %s6469_s11 }
 0x15e   :  { %10294 = vst [vmem:[#allocation78_spill] sm:$0xff] %v6652_v1  ;;  %v6670_v1 = vstv %s6493_s29  ;;  %s7292_s29 = sld [smem:[#allocation8 + $0x44]] }
 0x15f   :  { %10299 = vst [vmem:[#allocation83_spill] sm:$0xff] %v6670_v1 }
 0x160   :  { %1382 = vrot.lane.b32.xlu1 %v6264_v51, %s5376_s21 }
 0x161   :  { %1380 = vrot.lane.b32.xlu0 %v6270_v59, %s5376_s21 }
 0x164   :  { %1631 = vrot.lane.b32.xlu1 %v6215_v37, %s5379_s9 }
 0x165   :  { %1544 = vrot.lane.b32.xlu0 %v6226_v25, %s5378_s27 }
 0x168   :  { %1465 = vrot.lane.b32.xlu1 %v6270_v59, %s5377_s26 }
 0x169   :  { %1633 = vrot.lane.b32.xlu0 %v6213_v54, %s5379_s9 }
 0x16c   :  { %1629 = vrot.lane.b32.xlu1 %v6226_v25, %s5379_s9 }
 0x16d   :  { %1467 = vrot.lane.b32.xlu0 %v6264_v51, %s5377_s26 }
 0x16e   :  { %v626_v3 = vpop.permute.xlu0 %625 }
 0x170   :  { %1718 = vrot.lane.b32.xlu1 %v6213_v54, %s5380_s2 }
 0x171   :  { %1716 = vrot.lane.b32.xlu0 %v6215_v37, %s5380_s2 }
 0x172   :  { %v6591_v4 = vpop.permute.xlu1 %627 }
 0x173   :  { %v641_v36 = vsel %vm115_vm0, %v626_v3, %v6591_v4 }
 0x174   :  { %v647_v26 = vmul.f32 %v6290_v9, %v641_v36  ;;  %v679_v16 = vmul.f32 %v6310_v24, %v641_v36  ;;  %v695_v56 = vmul.f32 %v6313_v2, %v641_v36  ;;  %1552 = vrot.lane.b32.xlu1 %v6264_v51, %s5378_s27 }
 0x175   :  { %1550 = vrot.lane.b32.xlu0 %v6270_v59, %s5378_s27 }
 0x176   :  { %v654_v42 = vadd.f32 %v647_v26, %v6304_v22  ;;  %v686_v57 = vadd.f32 %v679_v16, %v6325_v35  ;;  %v702_v33 = vadd.f32 %v695_v56, %v6329_v41  ;;  %v711_v7 = vpop.permute.xlu1 %710  ;;  %v6684_v22 = vstv %s6534_s12  ;;  %s7383_s12 = sld [smem:[#allocation8 + $0x33]] }
 0x177   :  { %v6664_v63 = vpop.permute.xlu0 %623  ;;  %10302 = vst [vmem:[#allocation86_spill] sm:$0xff] %v6684_v22  ;;  %v6687_v35 = vstv %s6536_s13  ;;  %v6690_v41 = vstv %s6561_s0  ;;  %v6713_v22 = vstv %s6593_s17  ;;  %s6817_s17 = sld [smem:[#allocation8 + $0x43]]  ;;  %s7385_s13 = sld [smem:[#allocation8 + $0x45]] }
 0x178   :  { %10297 = vst [vmem:[#allocation81_spill] sm:$0xff] %v6664_v63  ;;  %v642_v56 = vsel %vm115_vm0, %v6664_v63, %v626_v3  ;;  %1801 = vrot.lane.b32.xlu1 %v6215_v37, %s5381_s1  ;;  %10303 = vst [vmem:[#allocation87_spill] sm:$0xff] %v6687_v35  ;;  %v6700_v3 = vstv %s6563_s14  ;;  %v6707_v35 = vstv %s6571_s15  ;;  %s7434_s0 = sld [smem:[#allocation8 + $0x34]]  ;;  %s7443_s14 = sld [smem:[#allocation8 + $0x46]] }
 0x179   :  { %10304 = vst [vmem:[#allocation88_spill] sm:$0xff] %v6690_v41  ;;  %v646_v16 = vmul.f32 %v6290_v9, %v642_v56  ;;  %v678_v26 = vmul.f32 %v6310_v24, %v642_v56  ;;  %v694_v0 = vmul.f32 %v6313_v2, %v642_v56  ;;  %1714 = vrot.lane.b32.xlu0 %v6226_v25, %s5380_s2  ;;  %10305 = vst [vmem:[#allocation89_spill] sm:$0xff] %v6700_v3  ;;  %s7453_s15 = sld [smem:[#allocation8 + $0x11]] }
 0x17a   :  { %v6704_v63 = vpop.permute.xlu1 %708  ;;  %10307 = vst [vmem:[#allocation91_spill] sm:$0xff] %v6707_v35  ;;  %v6710_v41 = vstv %s6573_s16  ;;  %10309 = vst [vmem:[#allocation93_spill] sm:$0xff] %v6713_v22  ;;  %v3875_v22 = vld [vmem:[%s9982_s5 + $0x408] sm:$0xff]  ;;  %s7463_s16 = sld [smem:[#allocation8 + $0x47]] }
 0x17b   :  { %10306 = vst [vmem:[#allocation90_spill] sm:$0xff] %v6704_v63  ;;  %10308 = vst [vmem:[#allocation92_spill] sm:$0xff] %v6710_v41  ;;  %v653_v18 = vadd.f32 %v646_v16, %v6333_v58  ;;  %v685_v3 = vadd.f32 %v678_v26, %v6347_v29  ;;  %v701_v10 = vadd.f32 %v694_v0, %v6351_v23  ;;  %v6723_v1 = vpop.permute.xlu0 %712  ;;  %v6737_v58 = vstv %s6635_s18 }
 0x17c   :  { %v727_v41 = vsel %vm169_vm1, %v6704_v63, %v711_v7  ;;  %v726_v5 = vsel %vm169_vm1, %v711_v7, %v6723_v1  ;;  %1635 = vrot.lane.b32.xlu1 %v6270_v59, %s5379_s9  ;;  %10312 = vst [vmem:[#allocation96_spill] sm:$0xff] %v6737_v58  ;;  %v6740_v29 = vstv %s6637_s19  ;;  %v663_v23 = vmul.f32 %v6307_v60, %v641_v36 }
 0x17d   :  { %10313 = vst [vmem:[#allocation97_spill] sm:$0xff] %v6740_v29  ;;  %v731_v0 = vmul.f32 %v6354_v13, %v727_v41  ;;  %v763_v16 = vmul.f32 %v6362_v15, %v727_v41  ;;  %v779_v26 = vmul.f32 %v6365_v47, %v727_v41  ;;  %1803 = vrot.lane.b32.xlu0 %v6213_v54, %s5381_s1 }
 0x17e   :  { %v662_v7 = vmul.f32 %v6307_v60, %v642_v56  ;;  %v732_v63 = vmul.f32 %v6354_v13, %v726_v5  ;;  %v764_v58 = vmul.f32 %v6362_v15, %v726_v5  ;;  %v780_v36 = vmul.f32 %v6365_v47, %v726_v5  ;;  %v6754_v29 = vpop.permute.xlu1 %797 }
 0x17f   :  { %10314 = vst [vmem:[#allocation98_spill] sm:$0xff] %v6754_v29  ;;  %v6762_v35 = vadd.f32 %v731_v0, %v653_v18  ;;  %v6764_v56 = vadd.f32 %v763_v16, %v685_v3  ;;  %v6766_v39 = vadd.f32 %v779_v26, %v701_v10  ;;  %v748_v45 = vmul.f32 %v6359_v27, %v726_v5  ;;  %v6769_v14 = vpop.permute.xlu0 %795  ;;  %v3858_v18 = vld [vmem:[%s9982_s5 + $0x380] sm:$0xff]  ;;  %v3859_v10 = vld [vmem:[%s9982_s5 + $0x388] sm:$0xff]  ;;  %v3877_v16 = vld [vmem:[%s9982_s5 + $0x418] sm:$0xff] }
 0x180   :  { %v739_v30 = vadd.f32 %v732_v63, %v654_v42  ;;  %v771_v20 = vadd.f32 %v764_v58, %v686_v57  ;;  %v787_v38 = vadd.f32 %v780_v36, %v702_v33  ;;  %1799 = vrot.lane.b32.xlu1 %v6226_v25, %s5381_s1  ;;  %v670_v5 = vadd.f32 %v663_v23, %v6321_v43  ;;  %v3876_v23 = vld [vmem:[%s9982_s5 + $0x410] sm:$0xff] }
 0x181   :  { %v811_v33 = vsel %vm223_vm2, %v6769_v14, %v6754_v29  ;;  %1637 = vrot.lane.b32.xlu0 %v6264_v51, %s5379_s9  ;;  %v6790_v42 = vstv %s6702_s22  ;;  %v4823_v63 = vpack.c.bf16 %v3875_v22, %v3874_v31  ;;  %v6798_v43 = vstv %s6718_s23  ;;  %s7106_s22 = sld [smem:[#allocation8 + $0x20]]  ;;  %s7135_s23 = sld [smem:[#allocation8 + $0x32]] }
 0x182   :  { %10316 = vst [vmem:[#allocation100_spill] sm:$0xff] %v6790_v42  ;;  %v817_v57 = vmul.f32 %v6372_v17, %v811_v33  ;;  %v849_v3 = vmul.f32 %v6378_v32, %v811_v33  ;;  %v865_v58 = vmul.f32 %v6381_v19, %v811_v33  ;;  %v6795_v0 = vpop.permute.xlu1 %631  ;;  %10318 = vst [vmem:[#allocation102_spill] sm:$0xff] %v6798_v43 }
 0x183   :  { %10317 = vst [vmem:[#allocation101_spill] sm:$0xff] %v6795_v0  ;;  %v669_v31 = vadd.f32 %v662_v7, %v6343_v21  ;;  %v747_v22 = vmul.f32 %v6359_v27, %v727_v41  ;;  %v755_v26 = vadd.f32 %v748_v45, %v670_v5  ;;  %v630_v36 = vpop.permute.xlu0 %629  ;;  %4824 = vmatprep.subr.bf16.mxu0 %v4823_v63 }
 0x184   :  { %v4825_v42 = vpack.c.bf16 %v3859_v10, %v3858_v18  ;;  %v6808_v53 = vadd.f32 %v817_v57, %v739_v30  ;;  %v833_v43 = vmul.f32 %v6375_v52, %v811_v33  ;;  %v6811_v29 = vadd.f32 %v849_v3, %v771_v20  ;;  %1888 = vrot.lane.b32.xlu1 %v6213_v54, %s5382_s10  ;;  %v3861_v3 = vld [vmem:[%s9982_s5 + $0x398] sm:$0xff] }
 0x185   :  { %v6813_v48 = vadd.f32 %v865_v58, %v787_v38  ;;  %v639_v45 = vsel %vm115_vm0, %v630_v36, %v6795_v0  ;;  %v640_v21 = vsel %vm115_vm0, %v6591_v4, %v630_v36  ;;  %1886 = vrot.lane.b32.xlu0 %v6215_v37, %s5382_s10  ;;  %v6828_v20 = vstv %s6748_s24  ;;  %v3860_v4 = vld [vmem:[%s9982_s5 + $0x390] sm:$0xff]  ;;  %v3878_v58 = vld [vmem:[%s9982_s5 + $0x420] sm:$0xff]  ;;  %v10392_v0 = vld [vmem:[#allocation55_spill] sm:$0xff] }
 0x186   :  { %10319 = vst [vmem:[#allocation103_spill] sm:$0xff] %v6828_v20  ;;  %4826 = vmatpush3.bf16.msra.mxu0 %v4825_v42  ;;  %v4827_v38 = vpack.c.bf16 %v3877_v16, %v3876_v23  ;;  %v648_v30 = vmul.f32 %v6290_v9, %v640_v21  ;;  %v649_v41 = vmul.f32 %v6290_v9, %v639_v45  ;;  %v6834_v10 = vpop.permute.xlu1 %880  ;;  %v3879_v23 = vld [vmem:[%s9982_s5 + $0x428] sm:$0xff] }
 0x187   :  { %v664_v7 = vmul.f32 %v6307_v60, %v640_v21  ;;  %v665_v18 = vmul.f32 %v6307_v60, %v639_v45  ;;  %v680_v5 = vmul.f32 %v6310_v24, %v640_v21  ;;  %v681_v33 = vmul.f32 %v6310_v24, %v639_v45  ;;  %v6843_v57 = vpop.permute.xlu0 %793 }
 0x188   :  { %v696_v42 = vmul.f32 %v6313_v2, %v640_v21  ;;  %v697_v63 = vmul.f32 %v6313_v2, %v639_v45  ;;  %10320 = vst [vmem:[#allocation104_spill] sm:$0xff] %v6843_v57  ;;  %4828 = vmatprep.subr.bf16.mxu0 %v4827_v38  ;;  %v754_v16 = vadd.f32 %v747_v22, %v669_v31 }
 0x189   :  { %v6854_v36 = vadd.f32 %v833_v43, %v755_v26  ;;  %v655_v45 = vadd.f32 %v648_v30, %v6369_v28  ;;  %v6858_v21 = vadd.f32 %v649_v41, %v6391_v62  ;;  %1722 = vrot.lane.b32.xlu1 %v6264_v51, %s5380_s2  ;;  %v671_v38 = vadd.f32 %v664_v7, %v6395_v49  ;;  %v3862_v28 = vld [vmem:[%s9982_s5 + $0x3a0] sm:$0xff]  ;;  %v3863_v62 = vld [vmem:[%s9982_s5 + $0x3a8] sm:$0xff] }
 0x18a   :  { %v6864_v2 = vadd.f32 %v665_v18, %v6411_v11  ;;  %v6867_v24 = vadd.f32 %v681_v33, %v6425_v6  ;;  %v6870_v31 = vadd.f32 %v697_v63, %v6433_v12  ;;  %1720 = vrot.lane.b32.xlu0 %v6270_v59, %s5380_s2  ;;  %v687_v49 = vadd.f32 %v680_v5, %v6415_v50  ;;  %v715_v6 = vpop.permute.xlu1 %714 }
 0x18b   :  { %v812_v11 = vsel %vm223_vm2, %v6843_v57, %v6769_v14  ;;  %v4829_v12 = vpack.c.bf16 %v3861_v3, %v3860_v4  ;;  %v4831_v43 = vpack.c.bf16 %v3879_v23, %v3878_v58  ;;  %v703_v22 = vadd.f32 %v696_v42, %v6429_v40  ;;  %v6889_v7 = vpop.permute.xlu0 %882  ;;  %v3880_v4 = vld [vmem:[%s9982_s5 + $0x430] sm:$0xff] }
 0x18c   :  { %v816_v26 = vmul.f32 %v6372_v17, %v812_v11  ;;  %v848_v30 = vmul.f32 %v6378_v32, %v812_v11  ;;  %v864_v41 = vmul.f32 %v6381_v19, %v812_v11  ;;  %v725_v50 = vsel %vm169_vm1, %v6723_v1, %v715_v6  ;;  %v3881_v1 = vld [vmem:[%s9982_s5 + $0x438] sm:$0xff] }
 0x18d   :  { %v896_v14 = vsel %vm277_vm3, %v6834_v10, %v6889_v7  ;;  %633 = vrot.lane.b32.xlu1 %v6384_v61, %s5376_s21  ;;  %v6901_v40 = vstv %s6817_s17  ;;  %4830 = vmatpush3.bf16.msra.mxu0 %v4829_v12  ;;  %v4833_v18 = vpack.c.bf16 %v3863_v62, %v3862_v28  ;;  %v832_v33 = vmul.f32 %v6375_v52, %v812_v11  ;;  %s10324_s17 = smov 70  }
 0x18e   :  { %10321 = vst [vmem:[#allocation105_spill] sm:$0xff] %v6901_v40  ;;  %v823_v5 = vadd.f32 %v816_v26, %v6762_v35  ;;  %v855_v42 = vadd.f32 %v848_v30, %v6764_v56  ;;  %v871_v63 = vadd.f32 %v864_v41, %v6766_v39  ;;  %1884 = vrot.lane.b32.xlu0 %v6226_v25, %s5382_s10  ;;  %v6919_v62 = vpop.permute.xlu1 %878  ;;  %v3864_v26 = vld [vmem:[%s9982_s5 + $0x3b0] sm:$0xff]  ;;  %v3865_v30 = vld [vmem:[%s9982_s5 + $0x3b8] sm:$0xff] }
 0x18f   :  { %v733_v3 = vmul.f32 %v6354_v13, %v725_v50  ;;  %v749_v58 = vmul.f32 %v6359_v27, %v725_v50  ;;  %v765_v23 = vmul.f32 %v6362_v15, %v725_v50  ;;  %v781_v28 = vmul.f32 %v6365_v47, %v725_v50  ;;  %10322 = vst [vmem:[#allocation106_spill] sm:$0xff] %v6919_v62  ;;  %v6924_v11 = vpop.permute.xlu0 %716 }
 0x190   :  { %4832 = vmatprep.subr.bf16.mxu0 %v4831_v43  ;;  %v902_v35 = vmul.f32 %v6436_v46, %v896_v14  ;;  %v934_v56 = vmul.f32 %v6442_v34, %v896_v14  ;;  %v950_v39 = vmul.f32 %v6445_v44, %v896_v14  ;;  %10323 = vst [vmem:[#allocation107_spill] sm:$0xff] %v6924_v11 }
 0x191   :  { %v4835_v12 = vpack.c.bf16 %v3881_v1, %v3880_v4  ;;  %v6932_v41 = vadd.f32 %v733_v3, %v655_v45  ;;  %v6934_v43 = vadd.f32 %v765_v23, %v687_v49  ;;  %v6936_v50 = vadd.f32 %v781_v28, %v703_v22  ;;  %1971 = vrot.lane.b32.xlu1 %v6215_v37, %s10324_s17  ;;  %v3882_v4 = vld [vmem:[%s9982_s5 + $0x440] sm:$0xff]  ;;  %v3883_v1 = vld [vmem:[%s9982_s5 + $0x448] sm:$0xff] }
 0x192   :  { %v918_v57 = vmul.f32 %v6439_v55, %v896_v14  ;;  %v6947_v60 = vadd.f32 %v832_v33, %v754_v16  ;;  %v909_v45 = vadd.f32 %v902_v35, %v6808_v53  ;;  %v941_v49 = vadd.f32 %v934_v56, %v6811_v29  ;;  %v10325_v14 = vld [vmem:[#allocation32_spill] sm:$0xff]  ;;  %v6965_v16 = vpop.permute.xlu1 %967  ;;  %4834 = vmatpush3.bf16.msra.mxu0 %v4833_v18  ;;  %v3906_v18 = vld [vmem:[%s9982_s5 + $0x500] sm:$0xff] }
 0x193   :  { %v957_v22 = vadd.f32 %v950_v39, %v6813_v48  ;;  %635 = vrot.lane.b32.xlu0 %v10325_v14, %s5376_s21  ;;  %v6956_v37 = vadd.f32 %v749_v58, %v671_v38  ;;  %v897_v3 = vsel %vm277_vm3, %v6919_v62, %v6834_v10  ;;  %v724_v53 = vsel %vm169_vm1, %v715_v6, %v6924_v11  ;;  %v6970_v58 = vpop.permute.xlu0 %965  ;;  %v3866_v10 = vld [vmem:[%s9982_s5 + $0x3c0] sm:$0xff]  ;;  %v3867_v6 = vld [vmem:[%s9982_s5 + $0x3c8] sm:$0xff] }
 0x194   :  { %v4837_v48 = vpack.c.bf16 %v3865_v30, %v3864_v26  ;;  %v901_v29 = vmul.f32 %v6436_v46, %v897_v3  ;;  %v933_v33 = vmul.f32 %v6442_v34, %v897_v3  ;;  %v949_v38 = vmul.f32 %v6445_v44, %v897_v3  ;;  %4836 = vmatprep.subr.bf16.mxu0 %v4835_v12  ;;  %v3907_v12 = vld [vmem:[%s9982_s5 + $0x508] sm:$0xff]  ;;  %v3890_v26 = vld [vmem:[%s9982_s5 + $0x480] sm:$0xff] }
 0x195   :  { %v4839_v23 = vpack.c.bf16 %v3883_v1, %v3882_v4  ;;  %v925_v28 = vadd.f32 %v918_v57, %v6854_v36  ;;  %v734_v35 = vmul.f32 %v6354_v13, %v724_v53  ;;  %v766_v56 = vmul.f32 %v6362_v15, %v724_v53  ;;  %1805 = vrot.lane.b32.xlu1 %v6270_v59, %s5381_s1  ;;  %v3891_v57 = vld [vmem:[%s9982_s5 + $0x488] sm:$0xff] }
 0x196   :  { %v782_v39 = vmul.f32 %v6365_v47, %v724_v53  ;;  %v6996_v36 = vadd.f32 %v901_v29, %v823_v5  ;;  %v6998_v30 = vadd.f32 %v933_v33, %v855_v42  ;;  %v7000_v4 = vadd.f32 %v949_v38, %v871_v63  ;;  %v7009_v13 = vpop.permute.xlu1 %801  ;;  %4838 = vmatpush3.bf16.msra.mxu0 %v4837_v48  ;;  %v10328_v29 = vld [vmem:[#allocation40_spill] sm:$0xff]  ;;  %v10329_v33 = vld [vmem:[#allocation41_spill] sm:$0xff]  ;;  %v10330_v38 = vld [vmem:[#allocation42_spill] sm:$0xff] }
 0x197   :  { %v750_v1 = vmul.f32 %v6359_v27, %v724_v53  ;;  %1973 = vrot.lane.b32.xlu0 %v6213_v54, %s10324_s17  ;;  %v917_v62 = vmul.f32 %v6439_v55, %v897_v3  ;;  %v741_v11 = vadd.f32 %v734_v35, %v6858_v21  ;;  %v773_v47 = vadd.f32 %v766_v56, %v6867_v24  ;;  %v800_v42 = vpop.permute.xlu0 %799  ;;  %v10327_v53 = vld [vmem:[#allocation39_spill] sm:$0xff]  ;;  %v10389_v27 = vld [vmem:[#allocation52_spill] sm:$0xff] }
 0x198   :  { %v789_v15 = vadd.f32 %v782_v39, %v6870_v31  ;;  %10326 = vst [vmem:[#allocation32_spill] sm:$0xff] %v7009_v13  ;;  %v981_v5 = vsel %vm331_vm4, %v6970_v58, %v6965_v16  ;;  %4840 = vmatprep.subr.bf16.mxu0 %v4839_v23  ;;  %v4841_v54 = vpack.c.bf16 %v3867_v6, %v3866_v10  ;;  %v10331_v10 = vld [vmem:[#allocation98_spill] sm:$0xff] }
 0x199   :  { %v4855_v63 = vpack.c.bf16 %v3907_v12, %v3906_v18  ;;  %v4857_v3 = vpack.c.bf16 %v3891_v57, %v3890_v26  ;;  %v987_v21 = vmul.f32 %v10327_v53, %v981_v5  ;;  %v1003_v24 = vmul.f32 %v10328_v29, %v981_v5  ;;  %1969 = vrot.lane.b32.xlu1 %v6226_v25, %s10324_s17 }
 0x19a   :  { %v1019_v31 = vmul.f32 %v10329_v33, %v981_v5  ;;  %v1035_v35 = vmul.f32 %v10330_v38, %v981_v5  ;;  %v757_v48 = vadd.f32 %v750_v1, %v6864_v2  ;;  %v809_v23 = vsel %vm223_vm2, %v800_v42, %v7009_v13  ;;  %v1051_v12 = vpop.permute.xlu1 %1050  ;;  %4842 = vmatpush3.bf16.msra.mxu0 %v4841_v54  ;;  %v3884_v54 = vld [vmem:[%s9982_s5 + $0x450] sm:$0xff] }
 0x19b   :  { %v810_v6 = vsel %vm223_vm2, %v10331_v10, %v800_v42  ;;  %1807 = vrot.lane.b32.xlu0 %v6264_v51, %s5381_s1  ;;  %v7031_v18 = vstv %s6954_s20  ;;  %4856 = vmatprep.subr.bf16.mxu1 %v4855_v63  ;;  %v7033_v56 = vadd.f32 %v987_v21, %v909_v45  ;;  %v7035_v39 = vadd.f32 %v1003_v24, %v925_v28  ;;  %v7045_v42 = vpop.permute.xlu0 %963  ;;  %v3885_v63 = vld [vmem:[%s9982_s5 + $0x458] sm:$0xff] }
 0x19c   :  { %10332 = vst [vmem:[#allocation98_spill] sm:$0xff] %v7031_v18  ;;  %v7037_v25 = vadd.f32 %v1019_v31, %v941_v49  ;;  %v7039_v2 = vadd.f32 %v1035_v35, %v957_v22  ;;  %v818_v26 = vmul.f32 %v6372_v17, %v810_v6  ;;  %v819_v57 = vmul.f32 %v6372_v17, %v809_v23 }
 0x19d   :  { %v834_v1 = vmul.f32 %v6375_v52, %v810_v6  ;;  %v835_v5 = vmul.f32 %v6375_v52, %v809_v23  ;;  %10333 = vst [vmem:[#allocation108_spill] sm:$0xff] %v7045_v42  ;;  %4858 = vmatpush3.bf16.msra.mxu1 %v4857_v3  ;;  %v850_v45 = vmul.f32 %v6378_v32, %v810_v6  ;;  %v7536_v17 = vstv %s7453_s15 }
 0x19e   :  { %v851_v49 = vmul.f32 %v6378_v32, %v809_v23  ;;  %v866_v22 = vmul.f32 %v6381_v19, %v810_v6  ;;  %v867_v28 = vmul.f32 %v6381_v19, %v809_v23  ;;  %720 = vrot.lane.b32.xlu1 %v10325_v14, %s5377_s26  ;;  %v924_v3 = vadd.f32 %v917_v62, %v6947_v60  ;;  %v885_v52 = vpop.permute.xlu1 %884 }
 0x19f   :  { %v825_v21 = vadd.f32 %v818_v26, %v6932_v41  ;;  %v7061_v24 = vadd.f32 %v819_v57, %v741_v11  ;;  %v7063_v31 = vadd.f32 %v835_v5, %v757_v48  ;;  %718 = vrot.lane.b32.xlu0 %v6384_v61, %s5377_s26  ;;  %v857_v35 = vadd.f32 %v850_v45, %v6934_v43  ;;  %v7081_v41 = vpop.permute.xlu0 %1052  ;;  %v3868_v57 = vld [vmem:[%s9982_s5 + $0x3d0] sm:$0xff] }
 0x1a0   :  { %v7068_v23 = vadd.f32 %v851_v49, %v773_v47  ;;  %v873_v10 = vadd.f32 %v866_v22, %v6936_v50  ;;  %v7071_v6 = vadd.f32 %v867_v28, %v789_v15  ;;  %v841_v60 = vadd.f32 %v834_v1, %v6956_v37  ;;  %v3869_v1 = vld [vmem:[%s9982_s5 + $0x3d8] sm:$0xff]  ;;  %10382 = vst [vmem:[#allocation125_spill] sm:$0xff] %v7536_v17 }
 0x1a1   :  { %v982_v62 = vsel %vm331_vm4, %v7045_v42, %v6970_v58  ;;  %v895_v11 = vsel %vm277_vm3, %v6889_v7, %v885_v52  ;;  %v4843_v47 = vpack.c.bf16 %v3885_v63, %v3884_v54 }
 0x1a2   :  { %v986_v43 = vmul.f32 %v10327_v53, %v982_v62  ;;  %v1002_v15 = vmul.f32 %v10328_v29, %v982_v62  ;;  %v1018_v50 = vmul.f32 %v10329_v33, %v982_v62  ;;  %v1034_v37 = vmul.f32 %v10330_v38, %v982_v62  ;;  %1892 = vrot.lane.b32.xlu1 %v6264_v51, %s5382_s10  ;;  %v7104_v28 = vpop.permute.xlu1 %1048 }
 0x1a3   :  { %v903_v58 = vmul.f32 %v6436_v46, %v895_v11  ;;  %v919_v48 = vmul.f32 %v6439_v55, %v895_v11  ;;  %v935_v7 = vmul.f32 %v6442_v34, %v895_v11  ;;  %v951_v26 = vmul.f32 %v6445_v44, %v895_v11  ;;  %1890 = vrot.lane.b32.xlu0 %v6270_v59, %s5382_s10  ;;  %v7116_v42 = vpop.permute.xlu0 %886 }
 0x1a4   :  { %v993_v5 = vadd.f32 %v986_v43, %v6996_v36  ;;  %v1009_v45 = vadd.f32 %v1002_v15, %v924_v3  ;;  %v1025_v49 = vadd.f32 %v1018_v50, %v6998_v30  ;;  %v1041_v22 = vadd.f32 %v1034_v37, %v7000_v4  ;;  %10334 = vst [vmem:[#allocation109_spill] sm:$0xff] %v7104_v28  ;;  %v10339_v15 = vld [vmem:[#allocation62_spill] sm:$0xff] }
 0x1a5   :  { %4844 = vmatprep.subr.bf16.mxu0 %v4843_v47  ;;  %v7108_v54 = vadd.f32 %v903_v58, %v825_v21  ;;  %v7110_v63 = vadd.f32 %v919_v48, %v841_v60  ;;  %v7112_v62 = vadd.f32 %v935_v7, %v857_v35  ;;  %v7114_v11 = vadd.f32 %v951_v26, %v873_v10  ;;  %v10336_v21 = vld [vmem:[#allocation56_spill] sm:$0xff]  ;;  %v10338_v47 = vld [vmem:[#allocation61_spill] sm:$0xff] }
 0x1a6   :  { %10335 = vst [vmem:[#allocation110_spill] sm:$0xff] %v7116_v42  ;;  %v1066_v36 = vsel %vm385_vm5, %v1051_v12, %v7081_v41  ;;  %v1067_v30 = vsel %vm385_vm5, %v7104_v28, %v1051_v12  ;;  %v894_v4 = vsel %vm277_vm3, %v885_v52, %v7116_v42  ;;  %805 = vrot.lane.b32.xlu1 %v10325_v14, %s5378_s27  ;;  %v10337_v10 = vld [vmem:[#allocation60_spill] sm:$0xff]  ;;  %v7141_v48 = vpop.permute.xlu1 %1137 }
 0x1a7   :  { %v4845_v3 = vpack.c.bf16 %v3869_v1, %v3868_v57  ;;  %v1072_v35 = vmul.f32 %v10336_v21, %v1066_v36  ;;  %v1088_v60 = vmul.f32 %v10337_v10, %v1066_v36  ;;  %v1104_v43 = vmul.f32 %v10338_v47, %v1066_v36  ;;  %803 = vrot.lane.b32.xlu0 %v6384_v61, %s5378_s27  ;;  %v3908_v7 = vld [vmem:[%s9982_s5 + $0x510] sm:$0xff]  ;;  %v7150_v28 = vpop.permute.xlu0 %1135 }
 0x1a8   :  { %v1120_v50 = vmul.f32 %v10339_v15, %v1066_v36  ;;  %v1071_v12 = vmul.f32 %v10336_v21, %v1067_v30  ;;  %v1087_v52 = vmul.f32 %v10337_v10, %v1067_v30  ;;  %v1103_v37 = vmul.f32 %v10338_v47, %v1067_v30 }
 0x1a9   :  { %v1119_v58 = vmul.f32 %v10339_v15, %v1067_v30  ;;  %4846 = vmatpush3.bf16.msra.mxu0 %v4845_v3  ;;  %v1079_v26 = vadd.f32 %v1072_v35, %v7033_v56  ;;  %v1095_v57 = vadd.f32 %v1088_v60, %v7035_v39  ;;  %v1111_v1 = vadd.f32 %v1104_v43, %v7037_v25  ;;  %v3909_v30 = vld [vmem:[%s9982_s5 + $0x518] sm:$0xff]  ;;  %v3892_v3 = vld [vmem:[%s9982_s5 + $0x490] sm:$0xff] }
 0x1aa   :  { %v1127_v36 = vadd.f32 %v1120_v50, %v7039_v2  ;;  %v3893_v56 = vld [vmem:[%s9982_s5 + $0x498] sm:$0xff]  ;;  %v7161_v39 = vadd.f32 %v1071_v12, %v993_v5  ;;  %v7163_v25 = vadd.f32 %v1087_v52, %v1009_v45  ;;  %v7165_v2 = vadd.f32 %v1103_v37, %v1025_v49  ;;  %1977 = vrot.lane.b32.xlu1 %v6264_v51, %s10324_s17  ;;  %v7181_v45 = vpop.permute.xlu1 %971  ;;  %v3886_v52 = vld [vmem:[%s9982_s5 + $0x460] sm:$0xff]  ;;  %v10345_v51 = vld [vmem:[#allocation80_spill] sm:$0xff] }
 0x1ab   :  { %v7167_v35 = vadd.f32 %v1119_v58, %v1041_v22  ;;  %v904_v60 = vmul.f32 %v6436_v46, %v894_v4  ;;  %v920_v43 = vmul.f32 %v6439_v55, %v894_v4  ;;  %v936_v50 = vmul.f32 %v6442_v34, %v894_v4  ;;  %1975 = vrot.lane.b32.xlu0 %v6270_v59, %s10324_s17  ;;  %v3887_v59 = vld [vmem:[%s9982_s5 + $0x468] sm:$0xff]  ;;  %v10344_v34 = vld [vmem:[#allocation78_spill] sm:$0xff] }
 0x1ac   :  { %v952_v42 = vmul.f32 %v6445_v44, %v894_v4  ;;  %v1151_v5 = vsel %vm439_vm6, %v7150_v28, %v7141_v48  ;;  %10340 = vst [vmem:[#allocation111_spill] sm:$0xff] %v7181_v45  ;;  %v7184_v49 = vstv %s7106_s22  ;;  %v4859_v22 = vpack.c.bf16 %v3909_v30, %v3908_v7  ;;  %v970_v44 = vpop.permute.xlu0 %969  ;;  %v10342_v7 = vld [vmem:[#allocation76_spill] sm:$0xff] }
 0x1ad   :  { %10341 = vst [vmem:[#allocation112_spill] sm:$0xff] %v7184_v49  ;;  %v4861_v12 = vpack.c.bf16 %v3893_v56, %v3892_v3  ;;  %v911_v4 = vadd.f32 %v904_v60, %v7061_v24  ;;  %v927_v37 = vadd.f32 %v920_v43, %v7063_v31  ;;  %v943_v58 = vadd.f32 %v936_v50, %v7068_v23  ;;  %v10343_v3 = vld [vmem:[#allocation77_spill] sm:$0xff] }
 0x1ae   :  { %v959_v55 = vadd.f32 %v952_v42, %v7071_v6  ;;  %v1157_v30 = vmul.f32 %v10342_v7, %v1151_v5  ;;  %v1173_v56 = vmul.f32 %v10343_v3, %v1151_v5  ;;  %v1189_v46 = vmul.f32 %v10344_v34, %v1151_v5  ;;  %890 = vrot.lane.b32.xlu1 %v10325_v14, %s5379_s9 }
 0x1af   :  { %v1205_v13 = vmul.f32 %v10345_v51, %v1151_v5  ;;  %v979_v24 = vsel %vm331_vm4, %v970_v44, %v7181_v45  ;;  %v980_v42 = vsel %vm331_vm4, %v6965_v16, %v970_v44  ;;  %888 = vrot.lane.b32.xlu0 %v6384_v61, %s5379_s9  ;;  %v7211_v31 = vstv %s7135_s23  ;;  %4860 = vmatprep.subr.bf16.mxu1 %v4859_v22  ;;  %v1221_v5 = vpop.permute.xlu1 %1220 }
 0x1b0   :  { %10346 = vst [vmem:[#allocation113_spill] sm:$0xff] %v7211_v31  ;;  %v4847_v23 = vpack.c.bf16 %v3887_v59, %v3886_v52  ;;  %v7213_v6 = vadd.f32 %v1157_v30, %v1079_v26  ;;  %v7215_v60 = vadd.f32 %v1173_v56, %v1095_v57  ;;  %v7217_v43 = vadd.f32 %v1189_v46, %v1111_v1  ;;  %v7225_v22 = vpop.permute.xlu0 %1133  ;;  %v3870_v46 = vld [vmem:[%s9982_s5 + $0x3e0] sm:$0xff]  ;;  %v3911_v52 = vld [vmem:[%s9982_s5 + $0x528] sm:$0xff] }
 0x1b1   :  { %v7219_v50 = vadd.f32 %v1205_v13, %v1127_v36  ;;  %4862 = vmatpush3.bf16.msra.mxu1 %v4861_v12  ;;  %v988_v45 = vmul.f32 %v10327_v53, %v980_v42  ;;  %v989_v44 = vmul.f32 %v10327_v53, %v979_v24  ;;  %v1004_v16 = vmul.f32 %v10328_v29, %v980_v42  ;;  %v3871_v36 = vld [vmem:[%s9982_s5 + $0x3e8] sm:$0xff]  ;;  %v3910_v12 = vld [vmem:[%s9982_s5 + $0x520] sm:$0xff] }
 0x1b2   :  { %v1005_v19 = vmul.f32 %v10328_v29, %v979_v24  ;;  %10347 = vst [vmem:[#allocation114_spill] sm:$0xff] %v7225_v22  ;;  %4848 = vmatprep.subr.bf16.mxu0 %v4847_v23  ;;  %v1020_v13 = vmul.f32 %v10329_v33, %v980_v42  ;;  %v1021_v26 = vmul.f32 %v10329_v33, %v979_v24 }
 0x1b3   :  { %v1036_v57 = vmul.f32 %v10330_v38, %v980_v42  ;;  %v1037_v1 = vmul.f32 %v10330_v38, %v979_v24  ;;  %975 = vrot.lane.b32.xlu1 %v10325_v14, %s5380_s2  ;;  %v995_v59 = vadd.f32 %v988_v45, %v7108_v54  ;;  %v7246_v30 = vadd.f32 %v989_v44, %v911_v4  ;;  %v1055_v33 = vpop.permute.xlu1 %1054 }
 0x1b4   :  { %v1011_v56 = vadd.f32 %v1004_v16, %v7110_v63  ;;  %v7249_v24 = vadd.f32 %v1005_v19, %v927_v37  ;;  %973 = vrot.lane.b32.xlu0 %v6384_v61, %s5380_s2  ;;  %v1027_v42 = vadd.f32 %v1020_v13, %v7112_v62  ;;  %v7254_v23 = vadd.f32 %v1021_v26, %v943_v58  ;;  %v7266_v63 = vpop.permute.xlu0 %1222  ;;  %v3894_v16 = vld [vmem:[%s9982_s5 + $0x4a0] sm:$0xff] }
 0x1b5   :  { %v1043_v29 = vadd.f32 %v1036_v57, %v7114_v11  ;;  %v7257_v38 = vadd.f32 %v1037_v1, %v959_v55  ;;  %v1152_v54 = vsel %vm439_vm6, %v7225_v22, %v7150_v28  ;;  %v1065_v19 = vsel %vm385_vm5, %v7081_v41, %v1055_v33 }
 0x1b6   :  { %v4849_v45 = vpack.c.bf16 %v3871_v36, %v3870_v46  ;;  %v4863_v62 = vpack.c.bf16 %v3911_v52, %v3910_v12  ;;  %v1156_v4 = vmul.f32 %v10342_v7, %v1152_v54  ;;  %v1172_v11 = vmul.f32 %v10343_v3, %v1152_v54  ;;  %v3895_v46 = vld [vmem:[%s9982_s5 + $0x4a8] sm:$0xff] }
 0x1b7   :  { %v1188_v55 = vmul.f32 %v10344_v34, %v1152_v54  ;;  %v1204_v37 = vmul.f32 %v10345_v51, %v1152_v54  ;;  %1060 = vrot.lane.b32.xlu1 %v10325_v14, %s5381_s1  ;;  %v1073_v28 = vmul.f32 %v10336_v21, %v1065_v19  ;;  %v1089_v58 = vmul.f32 %v10337_v10, %v1065_v19  ;;  %v7290_v36 = vpop.permute.xlu1 %1218 }
 0x1b8   :  { %v1105_v41 = vmul.f32 %v10338_v47, %v1065_v19  ;;  %v1121_v44 = vmul.f32 %v10339_v15, %v1065_v19  ;;  %1058 = vrot.lane.b32.xlu0 %v6384_v61, %s5381_s1  ;;  %v1163_v13 = vadd.f32 %v1156_v4, %v7161_v39  ;;  %v1179_v26 = vadd.f32 %v1172_v11, %v7163_v25  ;;  %v7300_v39 = vpop.permute.xlu0 %1056  ;;  %v10353_v11 = vld [vmem:[#allocation85_spill] sm:$0xff] }
 0x1b9   :  { %v1195_v57 = vadd.f32 %v1188_v55, %v7165_v2  ;;  %v1211_v1 = vadd.f32 %v1204_v37, %v7167_v35  ;;  %10348 = vst [vmem:[#allocation115_spill] sm:$0xff] %v7290_v36  ;;  %4850 = vmatpush3.bf16.msra.mxu0 %v4849_v45  ;;  %v1080_v12 = vadd.f32 %v1073_v28, %v995_v59  ;;  %10349 = vst [vmem:[#allocation116_spill] sm:$0xff] %v7300_v39  ;;  %v10350_v59 = vld [vmem:[#allocation82_spill] sm:$0xff] }
 0x1ba   :  { %v1096_v52 = vadd.f32 %v1089_v58, %v1011_v56  ;;  %v7296_v54 = vadd.f32 %v1105_v41, %v1027_v42  ;;  %v7298_v19 = vadd.f32 %v1121_v44, %v1043_v29  ;;  %4864 = vmatprep.subr.bf16.mxu1 %v4863_v62  ;;  %v1236_v25 = vsel %vm493_vm7, %v1221_v5, %v7266_v63  ;;  %v10351_v42 = vld [vmem:[#allocation83_spill] sm:$0xff]  ;;  %v10352_v62 = vld [vmem:[#allocation84_spill] sm:$0xff] }
 0x1bb   :  { %v1237_v2 = vsel %vm493_vm7, %v7290_v36, %v1221_v5  ;;  %v1064_v35 = vsel %vm385_vm5, %v1055_v33, %v7300_v39  ;;  %1145 = vrot.lane.b32.xlu1 %v10325_v14, %s5382_s10  ;;  %v4865_v29 = vpack.c.bf16 %v3895_v46, %v3894_v16  ;;  %v1242_v56 = vmul.f32 %v10350_v59, %v1236_v25  ;;  %v7323_v58 = vpop.permute.xlu1 %1141 }
 0x1bc   :  { %v1258_v45 = vmul.f32 %v10351_v42, %v1236_v25  ;;  %v1274_v4 = vmul.f32 %v10352_v62, %v1236_v25  ;;  %v1290_v55 = vmul.f32 %v10353_v11, %v1236_v25  ;;  %1143 = vrot.lane.b32.xlu0 %v6384_v61, %s5382_s10  ;;  %v1241_v5 = vmul.f32 %v10350_v59, %v1237_v2  ;;  %v1140_v25 = vpop.permute.xlu0 %1139 }
 0x1bd   :  { %v1257_v37 = vmul.f32 %v10351_v42, %v1237_v2  ;;  %v1273_v33 = vmul.f32 %v10352_v62, %v1237_v2  ;;  %v1289_v28 = vmul.f32 %v10353_v11, %v1237_v2  ;;  %10354 = vst [vmem:[#allocation117_spill] sm:$0xff] %v7323_v58  ;;  %4866 = vmatpush3.bf16.msra.mxu1 %v4865_v29 }
 0x1be   :  { %v1249_v41 = vadd.f32 %v1242_v56, %v7213_v6  ;;  %v7327_v44 = vadd.f32 %v1258_v45, %v7215_v60  ;;  %v1281_v16 = vadd.f32 %v1274_v4, %v7217_v43  ;;  %v1297_v46 = vadd.f32 %v1290_v55, %v7219_v50 }
 0x1bf   :  { %v7331_v36 = vadd.f32 %v1241_v5, %v1163_v13  ;;  %v7333_v22 = vadd.f32 %v1257_v37, %v1179_v26  ;;  %v7335_v2 = vadd.f32 %v1273_v33, %v1195_v57  ;;  %v7337_v39 = vadd.f32 %v1289_v28, %v1211_v1  ;;  %1230 = vrot.lane.b32.xlu1 %v10325_v14, %s10324_s17  ;;  %v7353_v14 = vpop.permute.xlu1 %1378  ;;  %v10358_v33 = vld [vmem:[#allocation33_spill] sm:$0xff] }
 0x1c0   :  { %v1074_v6 = vmul.f32 %v10336_v21, %v1064_v35  ;;  %v1090_v60 = vmul.f32 %v10337_v10, %v1064_v35  ;;  %v1106_v43 = vmul.f32 %v10338_v47, %v1064_v35  ;;  %v1122_v50 = vmul.f32 %v10339_v15, %v1064_v35  ;;  %1228 = vrot.lane.b32.xlu0 %v6384_v61, %s10324_s17  ;;  %v7365_v45 = vpop.permute.xlu0 %1376 }
 0x1c1   :  { %v1149_v13 = vsel %vm439_vm6, %v1140_v25, %v7323_v58  ;;  %v1150_v26 = vsel %vm439_vm6, %v7141_v48, %v1140_v25  ;;  %v7356_v57 = vstv %s7292_s29  ;;  %v7359_v1 = vstv %s7294_s30  ;;  %s8764_s29 = sld [smem:[#allocation9]] }
 0x1c2   :  { %10355 = vst [vmem:[#allocation118_spill] sm:$0xff] %v7356_v57  ;;  %10356 = vst [vmem:[#allocation119_spill] sm:$0xff] %v7359_v1  ;;  %v1081_v29 = vadd.f32 %v1074_v6, %v7246_v30  ;;  %v1097_v35 = vadd.f32 %v1090_v60, %v7249_v24  ;;  %v1113_v61 = vadd.f32 %v1106_v43, %v7254_v23  ;;  %v10357_v30 = vld [vmem:[#allocation34_spill] sm:$0xff] }
 0x1c3   :  { %v1129_v56 = vadd.f32 %v1122_v50, %v7257_v38  ;;  %v1158_v48 = vmul.f32 %v10342_v7, %v1150_v26  ;;  %v1159_v4 = vmul.f32 %v10342_v7, %v1149_v13  ;;  %v1174_v55 = vmul.f32 %v10343_v3, %v1150_v26  ;;  %1386 = vrot.lane.b32.xlu1 %v10357_v30, %s5376_s21  ;;  %v7381_v43 = vpop.permute.xlu1 %1226  ;;  %v10361_v7 = vld [vmem:[#allocation45_spill] sm:$0xff] }
 0x1c4   :  { %v1175_v5 = vmul.f32 %v10343_v3, %v1149_v13  ;;  %v1190_v24 = vmul.f32 %v10344_v34, %v1150_v26  ;;  %v1191_v23 = vmul.f32 %v10344_v34, %v1149_v13  ;;  %v1206_v38 = vmul.f32 %v10345_v51, %v1150_v26  ;;  %1384 = vrot.lane.b32.xlu0 %v10358_v33, %s5376_s21  ;;  %s7417_s21 = sld [smem:[#allocation8 + $0x10]] }
 0x1c5   :  { %v1207_v37 = vmul.f32 %v10345_v51, %v1149_v13  ;;  %v1165_v28 = vadd.f32 %v1158_v48, %v1080_v12  ;;  %v1166_v25 = vadd.f32 %v1159_v4, %v1081_v29  ;;  %v1181_v6 = vadd.f32 %v1174_v55, %v1096_v52  ;;  %10359 = vst [vmem:[#allocation120_spill] sm:$0xff] %v7381_v43  ;;  %v1225_v13 = vpop.permute.xlu0 %1224  ;;  %v10360_v51 = vld [vmem:[#allocation43_spill] sm:$0xff] }
 0x1c6   :  { %v1182_v60 = vadd.f32 %v1175_v5, %v1097_v35  ;;  %v1197_v50 = vadd.f32 %v1190_v24, %v7296_v54  ;;  %v1198_v58 = vadd.f32 %v1191_v23, %v1113_v61  ;;  %v1213_v26 = vadd.f32 %v1206_v38, %v7298_v19  ;;  %v10362_v54 = vld [vmem:[#allocation46_spill] sm:$0xff]  ;;  %v10365_v35 = vld [vmem:[#allocation89_spill] sm:$0xff] }
 0x1c7   :  { %v1214_v34 = vadd.f32 %v1207_v37, %v1129_v56  ;;  %v1320_v3 = vadd.f32 %v10360_v51, %v1249_v41  ;;  %v1352_v12 = vadd.f32 %v10361_v7, %v1281_v16  ;;  %v7395_v52 = vsel %vm115_vm0, %v7365_v45, %v7353_v14  ;;  %1471 = vrot.lane.b32.xlu1 %v10357_v30, %s5377_s26  ;;  %v10363_v51 = vld [vmem:[#allocation86_spill] sm:$0xff]  ;;  %v10364_v7 = vld [vmem:[#allocation88_spill] sm:$0xff]  ;;  %v1462_v55 = vpop.permute.xlu1 %1461 }
 0x1c8   :  { %v1234_v29 = vsel %vm493_vm7, %v1225_v13, %v7381_v43  ;;  %v1368_v19 = vadd.f32 %v10362_v54, %v1297_v46  ;;  %v1398_v41 = vmul.f32 %v10363_v51, %v7395_v52  ;;  %v1430_v16 = vmul.f32 %v10364_v7, %v7395_v52  ;;  %1469 = vrot.lane.b32.xlu0 %v10358_v33, %s5377_s26  ;;  %s7424_s26 = sld [smem:[#allocation8 + $0x22]] }
 0x1c9   :  { %v1446_v61 = vmul.f32 %v10365_v35, %v7395_v52  ;;  %v1235_v56 = vsel %vm493_vm7, %v7266_v63, %v1225_v13  ;;  %v1244_v48 = vmul.f32 %v10350_v59, %v1234_v29  ;;  %v1260_v46 = vmul.f32 %v10351_v42, %v1234_v29  ;;  %v7419_v38 = vpop.permute.xlu0 %1374 }
 0x1ca   :  { %v1276_v4 = vmul.f32 %v10352_v62, %v1234_v29  ;;  %v1405_v5 = vadd.f32 %v1398_v41, %v1320_v3  ;;  %v1437_v24 = vadd.f32 %v1430_v16, %v1352_v12  ;;  %10366 = vst [vmem:[#allocation43_spill] sm:$0xff] %v7419_v38  ;;  %v7422_v37 = vstv %s7367_s8 }
 0x1cb   :  { %v1453_v23 = vadd.f32 %v1446_v61, %v1368_v19  ;;  %10367 = vst [vmem:[#allocation45_spill] sm:$0xff] %v7422_v37  ;;  %v1243_v63 = vmul.f32 %v10350_v59, %v1235_v56  ;;  %v7427_v13 = vadd.f32 %v1244_v48, %v1166_v25  ;;  %v1259_v54 = vmul.f32 %v10351_v42, %v1235_v56  ;;  %v7445_v16 = vpop.permute.xlu1 %1459 }
 0x1cc   :  { %v7430_v43 = vadd.f32 %v1260_v46, %v1182_v60  ;;  %1556 = vrot.lane.b32.xlu1 %v10357_v30, %s5378_s27  ;;  %v1275_v3 = vmul.f32 %v10352_v62, %v1235_v56  ;;  %v7437_v12 = vadd.f32 %v1276_v4, %v1198_v58  ;;  %v1291_v19 = vmul.f32 %v10353_v11, %v1235_v56 }
 0x1cd   :  { %v1292_v41 = vmul.f32 %v10353_v11, %v1234_v29  ;;  %1554 = vrot.lane.b32.xlu0 %v10358_v33, %s5378_s27  ;;  %v1250_v25 = vadd.f32 %v1243_v63, %v1165_v28  ;;  %v1266_v60 = vadd.f32 %v1259_v54, %v1181_v6  ;;  %10368 = vst [vmem:[#allocation46_spill] sm:$0xff] %v7445_v16  ;;  %v7448_v61 = vstv %s7383_s12  ;;  %v10371_v29 = vld [vmem:[#allocation47_spill] sm:$0xff]  ;;  %v7459_v11 = vpop.permute.xlu0 %1463  ;;  %s7461_s27 = sld [smem:[#allocation8 + $0x35]]  ;;  %v10372_v28 = vld [vmem:[#allocation49_spill] sm:$0xff]  ;;  %v10373_v63 = vld [vmem:[#allocation50_spill] sm:$0xff] }
 0x1ce   :  { %10369 = vst [vmem:[#allocation121_spill] sm:$0xff] %v7448_v61  ;;  %v7451_v48 = vstv %s7385_s13  ;;  %v1282_v58 = vadd.f32 %v1275_v3, %v1197_v50  ;;  %v1298_v46 = vadd.f32 %v1291_v19, %v1213_v26  ;;  %v1319_v4 = vadd.f32 %v10371_v29, %v7331_v36  ;;  %v10374_v26 = vld [vmem:[#allocation91_spill] sm:$0xff]  ;;  %v10375_v19 = vld [vmem:[#allocation93_spill] sm:$0xff]  ;;  %v10376_v29 = vld [vmem:[#allocation94_spill] sm:$0xff]  ;;  %s9205_s13 = sld [smem:[#allocation9 + $0x2]] }
 0x1cf   :  { %10370 = vst [vmem:[#allocation122_spill] sm:$0xff] %v7451_v48  ;;  %v7455_v56 = vadd.f32 %v1292_v41, %v1214_v34  ;;  %v1351_v6 = vadd.f32 %v10372_v28, %v7335_v2  ;;  %v1367_v54 = vadd.f32 %v10373_v63, %v7337_v39  ;;  %v7473_v34 = vsel %vm115_vm0, %v7419_v38, %v7365_v45  ;;  %v7501_v63 = vpop.permute.xlu1 %1548 }
 0x1d0   :  { %v7478_v36 = vsel %vm169_vm1, %v7445_v16, %v1462_v55  ;;  %1641 = vrot.lane.b32.xlu1 %v10357_v30, %s5379_s9  ;;  %v1397_v2 = vmul.f32 %v10363_v51, %v7473_v34  ;;  %v1429_v39 = vmul.f32 %v10364_v7, %v7473_v34  ;;  %v1445_v50 = vmul.f32 %v10365_v35, %v7473_v34 }
 0x1d1   :  { %v7491_v45 = vsel %vm169_vm1, %v1462_v55, %v7459_v11  ;;  %1639 = vrot.lane.b32.xlu0 %v10358_v33, %s5379_s9  ;;  %v1482_v3 = vmul.f32 %v10374_v26, %v7478_v36  ;;  %v1514_v41 = vmul.f32 %v10375_v19, %v7478_v36  ;;  %v1530_v28 = vmul.f32 %v10376_v29, %v7478_v36  ;;  %v7506_v42 = vpop.permute.xlu0 %1546  ;;  %s7561_s9 = sld [smem:[#allocation8 + $0x23]] }
 0x1d2   :  { %v7504_v16 = vstv %s7417_s21  ;;  %v1404_v55 = vadd.f32 %v1397_v2, %v1319_v4  ;;  %v1436_v38 = vadd.f32 %v1429_v39, %v1351_v6  ;;  %v1452_v62 = vadd.f32 %v1445_v50, %v1367_v54 }
 0x1d3   :  { %10377 = vst [vmem:[#allocation47_spill] sm:$0xff] %v7504_v16  ;;  %v7509_v59 = vstv %s7424_s26  ;;  %v1483_v10 = vmul.f32 %v10374_v26, %v7491_v45  ;;  %v1515_v15 = vmul.f32 %v10375_v19, %v7491_v45  ;;  %v1531_v47 = vmul.f32 %v10376_v29, %v7491_v45  ;;  %v7533_v32 = vpop.permute.xlu1 %1382  ;;  %v10394_v16 = vld [vmem:[#allocation58_spill] sm:$0xff]  ;;  %s9572_s26 = sld [smem:[#allocation9 + $0x3]] }
 0x1d4   :  { %10378 = vst [vmem:[#allocation49_spill] sm:$0xff] %v7509_v59  ;;  %1726 = vrot.lane.b32.xlu1 %v10357_v30, %s5380_s2  ;;  %v7520_v4 = vstv %s7434_s0  ;;  %v7522_v6 = vadd.f32 %v1482_v3, %v1404_v55  ;;  %v7524_v54 = vadd.f32 %v1514_v41, %v1436_v38  ;;  %v7526_v2 = vadd.f32 %v1530_v28, %v1452_v62  ;;  %v10383_v62 = vld [vmem:[#allocation51_spill] sm:$0xff]  ;;  %v10391_v59 = vld [vmem:[#allocation54_spill] sm:$0xff] }
 0x1d5   :  { %10379 = vst [vmem:[#allocation50_spill] sm:$0xff] %v7520_v4  ;;  %1724 = vrot.lane.b32.xlu0 %v10358_v33, %s5380_s2  ;;  %v7531_v39 = vstv %s7443_s14  ;;  %v1490_v50 = vadd.f32 %v1483_v10, %v1405_v5  ;;  %v1522_v21 = vadd.f32 %v1515_v15, %v1437_v24  ;;  %v1538_v53 = vadd.f32 %v1531_v47, %v1453_v23  ;;  %v1381_v41 = vpop.permute.xlu0 %1380  ;;  %v10386_v10 = vld [vmem:[#allocation95_spill] sm:$0xff]  ;;  %v10387_v15 = vld [vmem:[#allocation97_spill] sm:$0xff] }
 0x1d6   :  { %10380 = vst [vmem:[#allocation123_spill] sm:$0xff] %v7531_v39  ;;  %10381 = vst [vmem:[#allocation124_spill] sm:$0xff] %v7533_v32  ;;  %v7542_v38 = vsel %vm223_vm2, %v7506_v42, %v7501_v63  ;;  %v1321_v3 = vadd.f32 %v10383_v62, %v1250_v25  ;;  %v7546_v28 = vstv %s7461_s27  ;;  %v7549_v55 = vstv %s7463_s16  ;;  %v10388_v24 = vld [vmem:[#allocation99_spill] sm:$0xff]  ;;  %v3888_v25 = vld [vmem:[%s9982_s5 + $0x470] sm:$0xff] }
 0x1d7   :  { %10384 = vst [vmem:[#allocation51_spill] sm:$0xff] %v7546_v28  ;;  %10385 = vst [vmem:[#allocation126_spill] sm:$0xff] %v7549_v55  ;;  %v1568_v47 = vmul.f32 %v10386_v10, %v7542_v38  ;;  %v1600_v5 = vmul.f32 %v10387_v15, %v7542_v38  ;;  %v1616_v23 = vmul.f32 %v10388_v24, %v7542_v38  ;;  %v3889_v62 = vld [vmem:[%s9982_s5 + $0x478] sm:$0xff] }
 0x1d8   :  { %v1322_v17 = vadd.f32 %v10389_v27, %v7427_v13  ;;  %1811 = vrot.lane.b32.xlu1 %v10357_v30, %s5381_s1  ;;  %v10390_v55 = vld [vmem:[#allocation53_spill] sm:$0xff]  ;;  %v1338_v9 = vadd.f32 %v10391_v59, %v7430_v43  ;;  %v1353_v27 = vadd.f32 %v10392_v0, %v1282_v58  ;;  %v1369_v48 = vadd.f32 %v10394_v16, %v1298_v46  ;;  %v10395_v59 = vld [vmem:[#allocation59_spill] sm:$0xff] }
 0x1d9   :  { %v1337_v28 = vadd.f32 %v10390_v55, %v1266_v60  ;;  %v10393_v13 = vld [vmem:[#allocation57_spill] sm:$0xff]  ;;  %1809 = vrot.lane.b32.xlu0 %v10358_v33, %s5381_s1  ;;  %v7577_v49 = vadd.f32 %v1568_v47, %v1490_v50  ;;  %v7579_v39 = vadd.f32 %v1600_v5, %v1522_v21  ;;  %v7581_v4 = vadd.f32 %v1616_v23, %v1538_v53  ;;  %v7584_v60 = vpop.permute.xlu1 %1631  ;;  %v7594_v58 = vpop.permute.xlu0 %1544  ;;  %v10397_v46 = vld [vmem:[#allocation87_spill] sm:$0xff]  ;;  %v3872_v5 = vld [vmem:[%s9982_s5 + $0x3f0] sm:$0xff] }
 0x1da   :  { %v1354_v37 = vadd.f32 %v10393_v13, %v7437_v12  ;;  %v1370_v43 = vadd.f32 %v10395_v59, %v7455_v56  ;;  %v1390_v0 = vsel %vm115_vm0, %v1381_v41, %v7533_v32  ;;  %v1391_v12 = vsel %vm115_vm0, %v7353_v14, %v1381_v41  ;;  %10396 = vst [vmem:[#allocation52_spill] sm:$0xff] %v7594_v58  ;;  %v3873_v23 = vld [vmem:[%s9982_s5 + $0x3f8] sm:$0xff] }
 0x1db   :  { %v4851_v21 = vpack.c.bf16 %v3889_v62, %v3888_v25  ;;  %v1399_v53 = vmul.f32 %v10363_v51, %v1391_v12  ;;  %v1400_v16 = vmul.f32 %v10363_v51, %v1390_v0  ;;  %v1415_v50 = vmul.f32 %v10397_v46, %v1391_v12 }
 0x1dc   :  { %v1416_v55 = vmul.f32 %v10397_v46, %v1390_v0  ;;  %1896 = vrot.lane.b32.xlu1 %v10357_v30, %s5382_s10  ;;  %v1431_v56 = vmul.f32 %v10364_v7, %v1391_v12  ;;  %v1432_v47 = vmul.f32 %v10364_v7, %v1390_v0  ;;  %v1447_v14 = vmul.f32 %v10365_v35, %v1391_v12 }
 0x1dd   :  { %v1448_v41 = vmul.f32 %v10365_v35, %v1390_v0  ;;  %1894 = vrot.lane.b32.xlu0 %v10358_v33, %s5382_s10  ;;  %v1406_v25 = vadd.f32 %v1399_v53, %v1321_v3  ;;  %v7614_v62 = vadd.f32 %v1400_v16, %v1322_v17  ;;  %v1422_v13 = vadd.f32 %v1415_v50, %v1337_v28  ;;  %v1466_v12 = vpop.permute.xlu1 %1465  ;;  %v7622_v51 = vpop.permute.xlu0 %1633  ;;  %s7624_s10 = sld [smem:[#allocation9 + $0x1]] }
 0x1de   :  { %v7616_v59 = vadd.f32 %v1416_v55, %v1338_v9  ;;  %4852 = vmatprep.subr.bf16.mxu0 %v4851_v21  ;;  %v1438_v0 = vadd.f32 %v1431_v56, %v1353_v27  ;;  %v7618_v32 = vadd.f32 %v1432_v47, %v1354_v37  ;;  %v1454_v35 = vadd.f32 %v1447_v14, %v1369_v48  ;;  %v3912_v55 = vld [vmem:[%s9982_s5 + $0x530] sm:$0xff] }
 0x1df   :  { %v7620_v7 = vadd.f32 %v1448_v41, %v1370_v43  ;;  %v7630_v17 = vsel %vm223_vm2, %v7594_v58, %v7506_v42  ;;  %v1476_v9 = vsel %vm169_vm1, %v7459_v11, %v1466_v12  ;;  %v7638_v37 = vstv %s7561_s9  ;;  %v10399_v43 = vld [vmem:[#allocation92_spill] sm:$0xff] }
 0x1e0   :  { %1981 = vrot.lane.b32.xlu1 %v10357_v30, %s10324_s17  ;;  %10398 = vst [vmem:[#allocation53_spill] sm:$0xff] %v7638_v37  ;;  %v4853_v48 = vpack.c.bf16 %v3873_v23, %v3872_v5  ;;  %v1567_v3 = vmul.f32 %v10386_v10, %v7630_v17  ;;  %v1599_v28 = vmul.f32 %v10387_v15, %v7630_v17  ;;  %v3913_v23 = vld [vmem:[%s9982_s5 + $0x538] sm:$0xff] }
 0x1e1   :  { %v1615_v42 = vmul.f32 %v10388_v24, %v7630_v17  ;;  %v7650_v11 = vsel %vm277_vm3, %v7584_v60, %v7622_v51  ;;  %1979 = vrot.lane.b32.xlu0 %v10358_v33, %s10324_s17  ;;  %v1484_v27 = vmul.f32 %v10374_v26, %v1476_v9  ;;  %v1500_v21 = vmul.f32 %v10399_v43, %v1476_v9  ;;  %v7658_v50 = vpop.permute.xlu1 %1629  ;;  %v7668_v5 = vpop.permute.xlu0 %1467 }
 0x1e2   :  { %v1516_v53 = vmul.f32 %v10375_v19, %v1476_v9  ;;  %v1532_v16 = vmul.f32 %v10376_v29, %v1476_v9  ;;  %10400 = vst [vmem:[#allocation54_spill] sm:$0xff] %v7658_v50  ;;  %4854 = vmatpush3.bf16.msra.mxu0 %v4853_v48  ;;  %v1414_v56 = vmul.f32 %v10397_v46, %v7395_v52  ;;  %10401 = vst [vmem:[#allocation55_spill] sm:$0xff] %v7668_v5  ;;  %v3896_v9 = vld [vmem:[%s9982_s5 + $0x4b0] sm:$0xff]  ;;  %v3897_v52 = vld [vmem:[%s9982_s5 + $0x4b8] sm:$0xff] }
 0x1e3   :  { %v1574_v47 = vadd.f32 %v1567_v3, %v7522_v6  ;;  %v1606_v14 = vadd.f32 %v1599_v28, %v7524_v54  ;;  %v1622_v41 = vadd.f32 %v1615_v42, %v7526_v2  ;;  %v7679_v48 = vadd.f32 %v1484_v27, %v1406_v25  ;;  %v10402_v3 = vld [vmem:[#allocation44_spill] sm:$0xff] }
 0x1e4   :  { %v7681_v6 = vadd.f32 %v1500_v21, %v1422_v13  ;;  %v7683_v54 = vadd.f32 %v1516_v53, %v1438_v0  ;;  %v7685_v2 = vadd.f32 %v1532_v16, %v1454_v35  ;;  %v1336_v28 = vadd.f32 %v10402_v3, %v7327_v44  ;;  %v10403_v42 = vld [vmem:[#allocation100_spill] sm:$0xff] }
 0x1e5   :  { %v1653_v58 = vmul.f32 %v10403_v42, %v7650_v11  ;;  %v1685_v33 = vmul.f32 %v6828_v20, %v7650_v11  ;;  %v1701_v25 = vmul.f32 %v6901_v40, %v7650_v11  ;;  %v7699_v13 = vsel %vm277_vm3, %v7658_v50, %v7584_v60  ;;  %v7704_v44 = vpop.permute.xlu1 %1718  ;;  %v1717_v3 = vpop.permute.xlu0 %1716 }
 0x1e6   :  { %v1475_v35 = vsel %vm169_vm1, %v1466_v12, %v7668_v5  ;;  %v4867_v0 = vpack.c.bf16 %v3913_v23, %v3912_v55  ;;  %v4869_v27 = vpack.c.bf16 %v3897_v52, %v3896_v9  ;;  %v7710_v30 = vstv %s7624_s10 }
 0x1e7   :  { %v1660_v21 = vadd.f32 %v1653_v58, %v7577_v49  ;;  %v1692_v53 = vadd.f32 %v1685_v33, %v7579_v39  ;;  %v1708_v16 = vadd.f32 %v1701_v25, %v7581_v4  ;;  %v1421_v37 = vadd.f32 %v1414_v56, %v1336_v28  ;;  %v3914_v58 = vld [vmem:[%s9982_s5 + $0x540] sm:$0xff]  ;;  %v3915_v56 = vld [vmem:[%s9982_s5 + $0x548] sm:$0xff] }
 0x1e8   :  { %v1652_v60 = vmul.f32 %v10403_v42, %v7699_v13  ;;  %v1684_v12 = vmul.f32 %v6828_v20, %v7699_v13  ;;  %v1700_v55 = vmul.f32 %v6901_v40, %v7699_v13  ;;  %4868 = vmatprep.subr.bf16.mxu1 %v4867_v0  ;;  %v1485_v49 = vmul.f32 %v10374_v26, %v1475_v35 }
 0x1e9   :  { %v1501_v33 = vmul.f32 %v10399_v43, %v1475_v35  ;;  %v1517_v4 = vmul.f32 %v10375_v19, %v1475_v35  ;;  %v1533_v39 = vmul.f32 %v10376_v29, %v1475_v35  ;;  %4870 = vmatpush3.bf16.msra.mxu1 %v4869_v27  ;;  %v1413_v23 = vmul.f32 %v10397_v46, %v7473_v34  ;;  %v7736_v25 = vpop.permute.xlu1 %1552  ;;  %v1551_v5 = vpop.permute.xlu0 %1550  ;;  %v3921_v29 = vld [vmem:[%s9982_s5 + $0x578] sm:$0xff] }
 0x1ea   :  { %v7730_v9 = vadd.f32 %v1652_v60, %v1574_v47  ;;  %v7732_v52 = vadd.f32 %v1684_v12, %v1606_v14  ;;  %v7734_v28 = vadd.f32 %v1700_v55, %v1622_v41  ;;  %10404 = vst [vmem:[#allocation57_spill] sm:$0xff] %v7736_v25  ;;  %v1492_v35 = vadd.f32 %v1485_v49, %v7614_v62 }
 0x1eb   :  { %v7740_v0 = vadd.f32 %v1501_v33, %v7616_v59  ;;  %v1524_v27 = vadd.f32 %v1517_v4, %v7618_v32  ;;  %v1540_v50 = vadd.f32 %v1533_v39, %v7620_v7  ;;  %v7747_v34 = vsel %vm331_vm4, %v1717_v3, %v7704_v44  ;;  %v10405_v32 = vld [vmem:[#allocation48_spill] sm:$0xff]  ;;  %v3898_v33 = vld [vmem:[%s9982_s5 + $0x4c0] sm:$0xff] }
 0x1ec   :  { %v7752_v47 = vsel %vm223_vm2, %v1551_v5, %v7736_v25  ;;  %v1561_v62 = vsel %vm223_vm2, %v7501_v63, %v1551_v5  ;;  %v4871_v59 = vpack.c.bf16 %v3915_v56, %v3914_v58  ;;  %v1335_v14 = vadd.f32 %v10405_v32, %v7333_v22  ;;  %v10406_v5 = vld [vmem:[#allocation96_spill] sm:$0xff] }
 0x1ed   :  { %v1738_v7 = vmul.f32 %v7031_v18, %v7747_v34  ;;  %v1770_v41 = vmul.f32 %v7211_v31, %v7747_v34  ;;  %v1786_v60 = vmul.f32 %v7356_v57, %v7747_v34  ;;  %v1499_v12 = vmul.f32 %v10399_v43, %v7491_v45  ;;  %v7771_v22 = vpop.permute.xlu1 %1801  ;;  %v7786_v56 = vpop.permute.xlu0 %1714  ;;  %v3916_v32 = vld [vmem:[%s9982_s5 + $0x550] sm:$0xff] }
 0x1ee   :  { %v1569_v55 = vmul.f32 %v10386_v10, %v1561_v62  ;;  %v1570_v63 = vmul.f32 %v10386_v10, %v7752_v47  ;;  %v1585_v49 = vmul.f32 %v10406_v5, %v1561_v62  ;;  %4872 = vmatprep.subr.bf16.mxu1 %v4871_v59  ;;  %v7778_v4 = vmul.f32 %v10399_v43, %v7478_v36  ;;  %v3899_v59 = vld [vmem:[%s9982_s5 + $0x4c8] sm:$0xff]  ;;  %v3917_v36 = vld [vmem:[%s9982_s5 + $0x558] sm:$0xff] }
 0x1ef   :  { %v7780_v39 = vadd.f32 %v1738_v7, %v1660_v21  ;;  %v7782_v45 = vadd.f32 %v1770_v41, %v1692_v53  ;;  %v7784_v58 = vadd.f32 %v1786_v60, %v1708_v16  ;;  %10407 = vst [vmem:[#allocation58_spill] sm:$0xff] %v7786_v56  ;;  %v1420_v21 = vadd.f32 %v1413_v23, %v1335_v14  ;;  %v3900_v23 = vld [vmem:[%s9982_s5 + $0x4d0] sm:$0xff] }
 0x1f0   :  { %v1576_v53 = vadd.f32 %v1569_v55, %v7679_v48  ;;  %v7798_v7 = vadd.f32 %v1570_v63, %v1492_v35  ;;  %v1592_v16 = vadd.f32 %v1585_v49, %v7681_v6  ;;  %v1601_v41 = vmul.f32 %v10387_v15, %v1561_v62  ;;  %v3901_v48 = vld [vmem:[%s9982_s5 + $0x4d8] sm:$0xff]  ;;  %v3918_v63 = vld [vmem:[%s9982_s5 + $0x560] sm:$0xff]  ;;  %v3919_v49 = vld [vmem:[%s9982_s5 + $0x568] sm:$0xff] }
 0x1f1   :  { %v1602_v60 = vmul.f32 %v10387_v15, %v7752_v47  ;;  %v1617_v43 = vmul.f32 %v10388_v24, %v1561_v62  ;;  %v1618_v10 = vmul.f32 %v10388_v24, %v7752_v47  ;;  %v1506_v35 = vadd.f32 %v1499_v12, %v1421_v37  ;;  %v1636_v14 = vpop.permute.xlu1 %1635 }
 0x1f2   :  { %v7816_v6 = vsel %vm331_vm4, %v7786_v56, %v1717_v3  ;;  %v4873_v55 = vpack.c.bf16 %v3899_v59, %v3898_v33  ;;  %v4875_v62 = vpack.c.bf16 %v3917_v36, %v3916_v32  ;;  %v1608_v24 = vadd.f32 %v1601_v41, %v7683_v54  ;;  %v7830_v3 = vpop.permute.xlu0 %1803 }
 0x1f3   :  { %v7825_v15 = vadd.f32 %v1602_v60, %v1524_v27  ;;  %v1624_v37 = vadd.f32 %v1617_v43, %v7685_v2  ;;  %v7828_v12 = vadd.f32 %v1618_v10, %v1540_v50  ;;  %v1737_v33 = vmul.f32 %v7031_v18, %v7816_v6  ;;  %v3902_v2 = vld [vmem:[%s9982_s5 + $0x4e0] sm:$0xff] }
 0x1f4   :  { %v1769_v59 = vmul.f32 %v7211_v31, %v7816_v6  ;;  %v1785_v32 = vmul.f32 %v7356_v57, %v7816_v6  ;;  %4874 = vmatpush3.bf16.msra.mxu1 %v4873_v55  ;;  %v4877_v36 = vpack.c.bf16 %v3901_v48, %v3900_v23  ;;  %v1584_v54 = vmul.f32 %v10406_v5, %v7542_v38  ;;  %v3903_v38 = vld [vmem:[%s9982_s5 + $0x4e8] sm:$0xff]  ;;  %v10409_v55 = vld [vmem:[#allocation102_spill] sm:$0xff] }
 0x1f5   :  { %v1646_v10 = vsel %vm277_vm3, %v7622_v51, %v1636_v14  ;;  %v7847_v43 = vsel %vm385_vm5, %v7771_v22, %v7830_v3  ;;  %4876 = vmatprep.subr.bf16.mxu1 %v4875_v62  ;;  %v4879_v50 = vpack.c.bf16 %v3919_v49, %v3918_v63  ;;  %v1583_v27 = vmul.f32 %v10406_v5, %v7630_v17  ;;  %v7860_v23 = vpop.permute.xlu1 %1799 }
 0x1f6   :  { %v1744_v51 = vadd.f32 %v1737_v33, %v7730_v9  ;;  %v1776_v41 = vadd.f32 %v1769_v59, %v7732_v52  ;;  %v1792_v60 = vadd.f32 %v1785_v32, %v7734_v28  ;;  %10408 = vst [vmem:[#allocation59_spill] sm:$0xff] %v7860_v23  ;;  %v1654_v48 = vmul.f32 %v10403_v42, %v1646_v10  ;;  %v7866_v56 = vpop.permute.xlu0 %1637  ;;  %v10411_v52 = vld [vmem:[#allocation122_spill] sm:$0xff] }
 0x1f7   :  { %v1670_v62 = vmul.f32 %v10409_v55, %v1646_v10  ;;  %v1686_v63 = vmul.f32 %v6828_v20, %v1646_v10  ;;  %v1702_v49 = vmul.f32 %v6901_v40, %v1646_v10  ;;  %10410 = vst [vmem:[#allocation44_spill] sm:$0xff] %v7866_v56  ;;  %v1823_v17 = vmul.f32 %v7359_v1, %v7847_v43  ;;  %v3920_v10 = vld [vmem:[%s9982_s5 + $0x570] sm:$0xff] }
 0x1f8   :  { %v1855_v9 = vmul.f32 %v7448_v61, %v7847_v43  ;;  %v1871_v28 = vmul.f32 %v10411_v52, %v7847_v43  ;;  %4878 = vmatpush3.bf16.msra.mxu1 %v4877_v36  ;;  %v4881_v33 = vpack.c.bf16 %v3903_v38, %v3902_v2  ;;  %v1661_v59 = vadd.f32 %v1654_v48, %v1576_v53 }
 0x1f9   :  { %v7874_v32 = vadd.f32 %v1670_v62, %v1592_v16  ;;  %v1693_v25 = vadd.f32 %v1686_v63, %v1608_v24  ;;  %v1709_v46 = vadd.f32 %v1702_v49, %v1624_v37  ;;  %4880 = vmatprep.subr.bf16.mxu1 %v4879_v50  ;;  %v1830_v19 = vadd.f32 %v1823_v17, %v7780_v39  ;;  %v7891_v53 = vpop.permute.xlu1 %1888 }
 0x1fa   :  { %v1862_v26 = vadd.f32 %v1855_v9, %v7782_v45  ;;  %v1878_v36 = vadd.f32 %v1871_v28, %v7784_v58  ;;  %v7889_v24 = vsel %vm385_vm5, %v7860_v23, %v7771_v22  ;;  %v1505_v16 = vadd.f32 %v7778_v4, %v1420_v21  ;;  %v1887_v58 = vpop.permute.xlu0 %1886  ;;  %v10417_v28 = vld [vmem:[#allocation112_spill] sm:$0xff] }
 0x1fb   :  { %10412 = vst [vmem:[#allocation48_spill] sm:$0xff] %v7874_v32  ;;  %v1822_v37 = vmul.f32 %v7359_v1, %v7889_v24  ;;  %v1854_v39 = vmul.f32 %v7448_v61, %v7889_v24  ;;  %v1870_v45 = vmul.f32 %v10411_v52, %v7889_v24  ;;  %v1591_v50 = vadd.f32 %v1584_v54, %v1506_v35 }
 0x1fc   :  { %v7903_v22 = vsel %vm277_vm3, %v1636_v14, %v7866_v56  ;;  %v7908_v4 = vsel %vm439_vm6, %v1887_v58, %v7891_v53  ;;  %4882 = vmatpush3.bf16.msra.mxu1 %v4881_v33  ;;  %v4883_v21 = vpack.c.bf16 %v3921_v29, %v3920_v10  ;;  %v1590_v2 = vadd.f32 %v1583_v27, %v1505_v16  ;;  %v10414_v27 = vld [vmem:[#allocation47_spill] sm:$0xff]  ;;  %v10433_v56 = vld [vmem:[#allocation49_spill] sm:$0xff] }
 0x1fd   :  { %v1829_v38 = vadd.f32 %v1822_v37, %v1744_v51  ;;  %v1861_v48 = vadd.f32 %v1854_v39, %v1776_v41  ;;  %v1877_v62 = vadd.f32 %v1870_v45, %v1792_v60  ;;  %v1669_v63 = vmul.f32 %v10409_v55, %v7650_v11  ;;  %v7918_v49 = vpop.permute.xlu1 %1722  ;;  %v10415_v11 = vld [vmem:[#allocation50_spill] sm:$0xff]  ;;  %v10416_v60 = vld [vmem:[#allocation123_spill] sm:$0xff] }
 0x1fe   :  { %v1655_v35 = vmul.f32 %v10403_v42, %v7903_v22  ;;  %v1687_v14 = vmul.f32 %v6828_v20, %v7903_v22  ;;  %v1703_v54 = vmul.f32 %v6901_v40, %v7903_v22  ;;  %10413 = vst [vmem:[#allocation102_spill] sm:$0xff] %v7918_v49  ;;  %4884 = vmatprep.subr.bf16.mxu1 %v4883_v21  ;;  %v1721_v9 = vpop.permute.xlu0 %1720 }
 0x1ff   :  { %v1668_v29 = vmul.f32 %v10409_v55, %v7699_v13  ;;  %v1908_v51 = vmul.f32 %v10414_v27, %v7908_v4  ;;  %v1940_v41 = vmul.f32 %v10415_v11, %v7908_v4  ;;  %v1956_v17 = vmul.f32 %v10416_v60, %v7908_v4 }
 0x200   :  { %v1754_v33 = vmul.f32 %v10417_v28, %v7747_v34  ;;  %v1662_v10 = vadd.f32 %v1655_v35, %v7798_v7  ;;  %v1694_v16 = vadd.f32 %v1687_v14, %v7825_v15  ;;  %v1710_v37 = vadd.f32 %v1703_v54, %v7828_v12 }
 0x201   :  { %v7933_v13 = vadd.f32 %v1908_v51, %v1830_v19  ;;  %v7935_v39 = vadd.f32 %v1940_v41, %v1862_v26  ;;  %v7937_v45 = vadd.f32 %v1956_v17, %v1878_v36  ;;  %v7942_v21 = vsel %vm331_vm4, %v1721_v9, %v7918_v49  ;;  %v634_v19 = vpop.permute.xlu1 %633  ;;  %v10423_v17 = vld [vmem:[#allocation45_spill] sm:$0xff] }
 0x202   :  { %v1676_v23 = vadd.f32 %v1669_v63, %v1591_v50  ;;  %v7947_v34 = vsel %vm331_vm4, %v7704_v44, %v1721_v9  ;;  %v1740_v15 = vmul.f32 %v7031_v18, %v7942_v21  ;;  %v1772_v26 = vmul.f32 %v7211_v31, %v7942_v21  ;;  %v7959_v63 = vpop.permute.xlu0 %1884 }
 0x203   :  { %10418 = vst [vmem:[#allocation112_spill] sm:$0xff] %v7933_v13  ;;  %10419 = vst [vmem:[#allocation127_spill] sm:$0xff] %v7935_v39  ;;  %v1675_v7 = vadd.f32 %v1668_v29, %v1590_v2  ;;  %v1739_v12 = vmul.f32 %v7031_v18, %v7947_v34  ;;  %v1771_v36 = vmul.f32 %v7211_v31, %v7947_v34  ;;  %v10424_v39 = vld [vmem:[#allocation101_spill] sm:$0xff]  ;;  %v10429_v13 = vld [vmem:[#allocation63_spill] sm:$0xff] }
 0x204   :  { %10420 = vst [vmem:[#allocation128_spill] sm:$0xff] %v7937_v45  ;;  %10421 = vst [vmem:[#allocation129_spill] sm:$0xff] %v7947_v34  ;;  %v1787_v50 = vmul.f32 %v7356_v57, %v7947_v34  ;;  %v1761_v44 = vadd.f32 %v1754_v33, %v1676_v23  ;;  %v7961_v35 = vadd.f32 %v1740_v15, %v1662_v10  ;;  %v10432_v31 = vld [vmem:[#allocation65_spill] sm:$0xff] }
 0x205   :  { %10422 = vst [vmem:[#allocation130_spill] sm:$0xff] %v7959_v63  ;;  %v7963_v14 = vadd.f32 %v1772_v26, %v1694_v16  ;;  %v1788_v54 = vmul.f32 %v7356_v57, %v7942_v21  ;;  %v1753_v2 = vmul.f32 %v10417_v28, %v7816_v6  ;;  %v1746_v29 = vadd.f32 %v1739_v12, %v1661_v59  ;;  %v7979_v10 = vpop.permute.xlu1 %1971  ;;  %v10425_v16 = vld [vmem:[#allocation17_spill] sm:$0xff]  ;;  %v10426_v59 = vld [vmem:[#allocation16_spill] sm:$0xff]  ;;  %v10428_v26 = vld [vmem:[#allocation26_spill] sm:$0xff] }
 0x206   :  { %v1778_v51 = vadd.f32 %v1771_v36, %v1693_v25  ;;  %v1794_v41 = vadd.f32 %v1787_v50, %v1709_v46  ;;  %v1839_v9 = vmul.f32 %v10423_v17, %v7847_v43  ;;  %v638_v23 = vsel %vm115_vm0, %v10424_v39, %v634_v19  ;;  %v10427_v46 = vld [vmem:[#allocation18_spill] sm:$0xff]  ;;  %v3904_v50 = vld [vmem:[%s9982_s5 + $0x4f0] sm:$0xff] }
 0x207   :  { %v7971_v45 = vadd.f32 %v1788_v54, %v1710_v37  ;;  %v1903_v33 = vsel %vm439_vm6, %v7959_v63, %v1887_v58  ;;  %v650_v6 = vmul.f32 %v10425_v16, %v638_v23  ;;  %v666_v25 = vmul.f32 %v10426_v59, %v638_v23  ;;  %v636_v37 = vpop.permute.xlu0 %635  ;;  %v3905_v54 = vld [vmem:[%s9982_s5 + $0x4f8] sm:$0xff]  ;;  %v10430_v63 = vld [vmem:[#allocation28_spill] sm:$0xff] }
 0x208   :  { %v682_v15 = vmul.f32 %v10427_v46, %v638_v23  ;;  %v698_v43 = vmul.f32 %v10428_v26, %v638_v23  ;;  %v1838_v12 = vmul.f32 %v10423_v17, %v7889_v24  ;;  %v1907_v39 = vmul.f32 %v10414_v27, %v1903_v33  ;;  %v10431_v24 = vld [vmem:[#allocation64_spill] sm:$0xff] }
 0x209   :  { %v1939_v36 = vmul.f32 %v10415_v11, %v1903_v33  ;;  %v1955_v58 = vmul.f32 %v10416_v60, %v1903_v33  ;;  %v7997_v23 = vadd.f32 %v650_v6, %v10429_v13  ;;  %v8000_v49 = vadd.f32 %v666_v25, %v10430_v63  ;;  %v1806_v17 = vpop.permute.xlu1 %1805  ;;  %v10434_v6 = vld [vmem:[#allocation81_spill] sm:$0xff] }
 0x20a   :  { %v8003_v57 = vadd.f32 %v682_v15, %v10431_v24  ;;  %v8006_v18 = vadd.f32 %v698_v43, %v10432_v31  ;;  %v1924_v40 = vmul.f32 %v10433_v56, %v7908_v4  ;;  %v1914_v20 = vadd.f32 %v1907_v39, %v1829_v38  ;;  %v10436_v39 = vld [vmem:[#allocation69_spill] sm:$0xff]  ;;  %v10440_v24 = vld [vmem:[#allocation67_spill] sm:$0xff] }
 0x20b   :  { %v1946_v42 = vadd.f32 %v1939_v36, %v1861_v48  ;;  %v1962_v32 = vadd.f32 %v1955_v58, %v1877_v62  ;;  %v1760_v34 = vadd.f32 %v1753_v2, %v1675_v7  ;;  %v637_v13 = vsel %vm115_vm0, %v634_v19, %v636_v37  ;;  %v8015_v25 = vpop.permute.xlu0 %1973  ;;  %v10435_v2 = vld [vmem:[#allocation68_spill] sm:$0xff]  ;;  %v10439_v58 = vld [vmem:[#allocation66_spill] sm:$0xff] }
 0x20c   :  { %v643_v63 = vsel %vm115_vm0, %v636_v37, %v10434_v6  ;;  %v4885_v15 = vpack.c.bf16 %v3905_v54, %v3904_v50  ;;  %v651_v31 = vmul.f32 %v10425_v16, %v637_v13  ;;  %v667_v43 = vmul.f32 %v10426_v59, %v637_v13 }
 0x20d   :  { %v668_v4 = vmul.f32 %v10426_v59, %v643_v63  ;;  %v1846_v38 = vadd.f32 %v1839_v9, %v1761_v44  ;;  %v8022_v48 = vmul.f32 %v10406_v5, %v7752_v47  ;;  %v8024_v62 = vadd.f32 %v1838_v12, %v1760_v34  ;;  %v8037_v9 = vpop.permute.xlu1 %1969 }
 0x20e   :  { %v652_v19 = vmul.f32 %v10425_v16, %v643_v63  ;;  %v8030_v7 = vsel %vm385_vm5, %v7830_v3, %v1806_v17  ;;  %4886 = vmatpush3.bf16.msra.mxu1 %v4885_v15  ;;  %v8033_v37 = vadd.f32 %v667_v43, %v10435_v2  ;;  %v683_v44 = vmul.f32 %v10427_v46, %v637_v13 }
 0x20f   :  { %v675_v59 = vadd.f32 %v668_v4, %v10436_v39  ;;  %10437 = vst [vmem:[#allocation101_spill] sm:$0xff] %v8037_v9  ;;  %v8039_v47 = vadd.f32 %v1924_v40, %v1846_v38  ;;  %v8042_v34 = vmul.f32 %v10433_v56, %v1903_v33  ;;  %v684_v16 = vmul.f32 %v10427_v46, %v643_v63  ;;  %v8047_v36 = vpop.permute.xlu0 %1807  ;;  %v10443_v39 = vld [vmem:[#allocation72_spill] sm:$0xff] }
 0x210   :  { %v699_v3 = vmul.f32 %v10428_v26, %v637_v13  ;;  %v700_v12 = vmul.f32 %v10428_v26, %v643_v63  ;;  %10438 = vst [vmem:[#allocation17_spill] sm:$0xff] %v8047_v36  ;;  %v658_v50 = vadd.f32 %v651_v31, %v10439_v58  ;;  %v1824_v54 = vmul.f32 %v7359_v1, %v8030_v7  ;;  %v10441_v13 = vld [vmem:[#allocation70_spill] sm:$0xff] }
 0x211   :  { %v1856_v40 = vmul.f32 %v7448_v61, %v8030_v7  ;;  %v1872_v33 = vmul.f32 %v10411_v52, %v8030_v7  ;;  %v659_v6 = vadd.f32 %v652_v19, %v10440_v24  ;;  %v1988_v46 = vsel %vm493_vm7, %v8037_v9, %v7979_v10  ;;  %v721_v4 = vpop.permute.xlu1 %720  ;;  %v10442_v19 = vld [vmem:[#allocation71_spill] sm:$0xff]  ;;  %v10444_v24 = vld [vmem:[#allocation73_spill] sm:$0xff] }
 0x212   :  { %v8064_v26 = vsel %vm385_vm5, %v1806_v17, %v8047_v36  ;;  %v690_v63 = vadd.f32 %v683_v44, %v10441_v13  ;;  %v8067_v15 = vadd.f32 %v1824_v54, %v1746_v29  ;;  %v10173_v38 = vmov 0.0|0.0   ;;  %v10445_v17 = vld [vmem:[#allocation125_spill] sm:$0xff]  ;;  %v10448_v44 = vld [vmem:[#allocation126_spill] sm:$0xff] }
 0x213   :  { %v8069_v31 = vadd.f32 %v1856_v40, %v1778_v51  ;;  %v8071_v43 = vadd.f32 %v1872_v33, %v1794_v41  ;;  %4919 = vmatprep.subr.bf16.mxu1 %v10173_v38  ;;  %v691_v2 = vadd.f32 %v684_v16, %v10442_v19  ;;  %v706_v58 = vadd.f32 %v699_v3, %v10443_v39  ;;  %v719_v5 = vpop.permute.xlu0 %718  ;;  %v10447_v51 = vld [vmem:[#allocation51_spill] sm:$0xff]  ;;  %v10450_v3 = vld [vmem:[#allocation53_spill] sm:$0xff] }
 0x214   :  { %v707_v9 = vadd.f32 %v700_v12, %v10444_v24  ;;  %v1992_v36 = vmul.f32 %v10445_v17, %v1988_v46  ;;  %v8082_v29 = vsel %vm493_vm7, %v7979_v10, %v8015_v25  ;;  %v2024_v41 = vmul.f32 %v10447_v51, %v1988_v46  ;;  %v10453_v24 = vld [vmem:[#allocation90_spill] sm:$0xff] }
 0x215   :  { %10446 = vst [vmem:[#allocation16_spill] sm:$0xff] %v8082_v29  ;;  %v2040_v54 = vmul.f32 %v10448_v44, %v1988_v46  ;;  %v1825_v16 = vmul.f32 %v7359_v1, %v8064_v26  ;;  %v2008_v12 = vmul.f32 %v10450_v3, %v1988_v46  ;;  %v1857_v33 = vmul.f32 %v7448_v61, %v8064_v26  ;;  %v10454_v46 = vld [vmem:[#allocation22_spill] sm:$0xff]  ;;  %v10455_v61 = vld [vmem:[#allocation29_spill] sm:$0xff] }
 0x216   :  { %v8088_v40 = vadd.f32 %v1992_v36, %v1914_v20  ;;  %v1873_v13 = vmul.f32 %v10411_v52, %v8064_v26  ;;  %v8095_v19 = vadd.f32 %v2024_v41, %v1946_v42  ;;  %v728_v38 = vsel %vm169_vm1, %v721_v4, %v10453_v24  ;;  %v10456_v44 = vld [vmem:[#allocation25_spill] sm:$0xff]  ;;  %v10457_v42 = vld [vmem:[#allocation20_spill] sm:$0xff] }
 0x217   :  { %v8097_v10 = vadd.f32 %v2040_v54, %v1962_v32  ;;  %v1832_v39 = vadd.f32 %v1825_v16, %v7961_v35  ;;  %v1864_v20 = vadd.f32 %v1857_v33, %v7963_v14  ;;  %v753_v1 = vmul.f32 %v10455_v61, %v728_v38  ;;  %v10458_v35 = vld [vmem:[#allocation107_spill] sm:$0xff]  ;;  %v8114_v16 = vpop.permute.xlu1 %1892  ;;  %v1891_v14 = vpop.permute.xlu0 %1890 }
 0x218   :  { %10449 = vst [vmem:[#allocation18_spill] sm:$0xff] %v8088_v40  ;;  %10451 = vst [vmem:[#allocation26_spill] sm:$0xff] %v8095_v19  ;;  %v1880_v36 = vadd.f32 %v1873_v13, %v7971_v45  ;;  %v737_v40 = vmul.f32 %v10454_v46, %v728_v38  ;;  %v769_v52 = vmul.f32 %v10456_v44, %v728_v38 }
 0x219   :  { %10452 = vst [vmem:[#allocation63_spill] sm:$0xff] %v8097_v10  ;;  %v785_v41 = vmul.f32 %v10457_v42, %v728_v38  ;;  %v722_v32 = vsel %vm169_vm1, %v719_v5, %v721_v4  ;;  %v723_v54 = vsel %vm169_vm1, %v10458_v35, %v719_v5  ;;  %10459 = vst [vmem:[#allocation28_spill] sm:$0xff] %v8114_v16 }
 0x21a   :  { %v744_v33 = vadd.f32 %v737_v40, %v659_v6  ;;  %v8116_v45 = vadd.f32 %v753_v1, %v675_v59  ;;  %v735_v13 = vmul.f32 %v10454_v46, %v723_v54  ;;  %v736_v24 = vmul.f32 %v10454_v46, %v722_v32 }
 0x21b   :  { %v776_v10 = vadd.f32 %v769_v52, %v691_v2  ;;  %v792_v19 = vadd.f32 %v785_v41, %v707_v9  ;;  %v751_v38 = vmul.f32 %v10455_v61, %v723_v54  ;;  %v752_v4 = vmul.f32 %v10455_v61, %v722_v32 }
 0x21c   :  { %v8123_v51 = vadd.f32 %v735_v13, %v7997_v23  ;;  %v8125_v5 = vadd.f32 %v736_v24, %v658_v50  ;;  %v767_v35 = vmul.f32 %v10456_v44, %v723_v54  ;;  %v768_v1 = vmul.f32 %v10456_v44, %v722_v32 }
 0x21d   :  { %v8130_v59 = vadd.f32 %v751_v38, %v8000_v49  ;;  %v8133_v6 = vadd.f32 %v752_v4, %v8033_v37  ;;  %v783_v52 = vmul.f32 %v10457_v42, %v723_v54  ;;  %v784_v9 = vmul.f32 %v10457_v42, %v722_v32  ;;  %v10460_v32 = vld [vmem:[#allocation34_spill] sm:$0xff]  ;;  %v10461_v54 = vld [vmem:[#allocation19_spill] sm:$0xff] }
 0x21e   :  { %v774_v61 = vadd.f32 %v767_v35, %v8003_v57  ;;  %v775_v23 = vadd.f32 %v768_v1, %v690_v63  ;;  %v2009_v50 = vmul.f32 %v10450_v3, %v8082_v29  ;;  %v8143_v2 = vsel %vm439_vm6, %v1891_v14, %v8114_v16  ;;  %v806_v57 = vpop.permute.xlu1 %805  ;;  %v804_v63 = vpop.permute.xlu0 %803 }
 0x21f   :  { %v790_v49 = vadd.f32 %v783_v52, %v8006_v18  ;;  %v791_v44 = vadd.f32 %v784_v9, %v706_v58  ;;  %v1901_v37 = vsel %vm439_vm6, %v7891_v53, %v1891_v14  ;;  %v1910_v40 = vmul.f32 %v10414_v27, %v8143_v2 }
 0x220   :  { %v1930_v46 = vadd.f32 %v8042_v34, %v8024_v62  ;;  %v2016_v42 = vadd.f32 %v2009_v50, %v8039_v47  ;;  %v1909_v41 = vmul.f32 %v10414_v27, %v1901_v37  ;;  %v8157_v18 = vmul.f32 %v10461_v54, %v10460_v32 }
 0x221   :  { %v8159_v58 = vadd.f32 %v1910_v40, %v1832_v39  ;;  %v1941_v53 = vmul.f32 %v10415_v11, %v1901_v37  ;;  %v1942_v14 = vmul.f32 %v10415_v11, %v8143_v2  ;;  %v1957_v13 = vmul.f32 %v10416_v60, %v1901_v37  ;;  %v10467_v40 = vld [vmem:[#allocation30_spill] sm:$0xff] }
 0x222   :  { %v1593_v62 = vadd.f32 %v8022_v48, %v7740_v0  ;;  %v2073_v47 = vadd.f32 %v7710_v30, %v2016_v42  ;;  %v1916_v34 = vadd.f32 %v1909_v41, %v8067_v15  ;;  %v1958_v24 = vmul.f32 %v10416_v60, %v8143_v2  ;;  %v10465_v0 = vld [vmem:[#allocation104_spill] sm:$0xff]  ;;  %v10470_v42 = vld [vmem:[#allocation31_spill] sm:$0xff] }
 0x223   :  { %10462 = vst [vmem:[#allocation64_spill] sm:$0xff] %v8159_v58  ;;  %v1948_v39 = vadd.f32 %v1941_v53, %v8069_v31  ;;  %v8172_v38 = vadd.f32 %v1942_v14, %v1864_v20  ;;  %v1964_v4 = vadd.f32 %v1957_v13, %v8071_v43  ;;  %v2015_v35 = vadd.f32 %v2008_v12, %v1930_v46  ;;  %v10466_v20 = vld [vmem:[#allocation23_spill] sm:$0xff]  ;;  %v8187_v12 = vpop.permute.xlu1 %1977  ;;  %v8189_v46 = vpop.permute.xlu0 %1975 }
 0x224   :  { %v1671_v1 = vmul.f32 %v10409_v55, %v7903_v22  ;;  %v2080_v52 = vmax.f32 %v2073_v47, 0.0  ;;  %v8177_v9 = vadd.f32 %v1958_v24, %v1880_v36  ;;  %v813_v48 = vsel %vm223_vm2, %v806_v57, %v10465_v0  ;;  %10468 = vst [vmem:[#allocation81_spill] sm:$0xff] %v8187_v12  ;;  %v10469_v22 = vld [vmem:[#allocation129_spill] sm:$0xff]  ;;  %v10472_v24 = vld [vmem:[#allocation14_spill] sm:$0xff] }
 0x225   :  { %10463 = vst [vmem:[#allocation65_spill] sm:$0xff] %v8172_v38  ;;  %v1756_v15 = vmul.f32 %v10417_v28, %v7942_v21  ;;  %v2072_v31 = vadd.f32 %v7710_v30, %v2015_v35  ;;  %v822_v50 = vmul.f32 %v10466_v20, %v813_v48  ;;  %v854_v43 = vmul.f32 %v10467_v40, %v813_v48  ;;  %v10471_v21 = vld [vmem:[#allocation32_spill] sm:$0xff]  ;;  %v10473_v35 = vld [vmem:[#allocation15_spill] sm:$0xff] }
 0x226   :  { %10464 = vst [vmem:[#allocation49_spill] sm:$0xff] %v8177_v9  ;;  %v1755_v36 = vmul.f32 %v10417_v28, %v10469_v22  ;;  %2452 = vmatprep.mubr.f32.mxu0 %v2080_v52  ;;  %v870_v41 = vmul.f32 %v10470_v42, %v813_v48  ;;  %v8196_v32 = vsel %vm223_vm2, %v804_v63, %v806_v57  ;;  %v10474_v52 = vld [vmem:[#allocation45_spill] sm:$0xff] }
 0x227   :  { %v808_v53 = vsel %vm223_vm2, %v10471_v21, %v804_v63  ;;  %v2079_v14 = vmax.f32 %v2072_v31, 0.0  ;;  %v829_v13 = vadd.f32 %v822_v50, %v744_v33  ;;  %v861_v47 = vadd.f32 %v854_v43, %v776_v10  ;;  %v10475_v10 = vld [vmem:[#allocation21_spill] sm:$0xff]  ;;  %v10476_v50 = vld [vmem:[#allocation48_spill] sm:$0xff] }
 0x228   :  { %v8203_v0 = vmul.f32 %v10473_v35, %v10472_v24  ;;  %v1678_v9 = vadd.f32 %v1671_v1, %v1593_v62  ;;  %v1840_v22 = vmul.f32 %v10474_v52, %v8030_v7  ;;  %v877_v38 = vadd.f32 %v870_v41, %v792_v19  ;;  %v889_v35 = vpop.permute.xlu0 %888 }
 0x229   :  { %v820_v58 = vmul.f32 %v10466_v20, %v808_v53  ;;  %2453 = vmatmul.mubr.f32.vlgmr.msra.gmra.mrb[0].mxu0 %v2079_v14  ;;  %v852_v57 = vmul.f32 %v10467_v40, %v808_v53  ;;  %v853_v63 = vmul.f32 %v10467_v40, %v8196_v32  ;;  %v868_v33 = vmul.f32 %v10470_v42, %v808_v53  ;;  %v891_v14 = vpop.permute.xlu1 %890 }
 0x22a   :  { %v8214_v31 = vmul.f32 %v10475_v10, %v10472_v24  ;;  %v1762_v62 = vadd.f32 %v1755_v36, %v10476_v50  ;;  %v8217_v1 = vadd.f32 %v1756_v15, %v1678_v9  ;;  %v869_v19 = vmul.f32 %v10470_v42, %v8196_v32  ;;  %v10479_v42 = vld [vmem:[#allocation126_spill] sm:$0xff] }
 0x22b   :  { %v827_v7 = vadd.f32 %v820_v58, %v8123_v51  ;;  %v859_v43 = vadd.f32 %v852_v57, %v774_v61  ;;  %v860_v41 = vadd.f32 %v853_v63, %v775_v23  ;;  %v875_v21 = vadd.f32 %v868_v33, %v790_v49  ;;  %v10477_v61 = vld [vmem:[#allocation27_spill] sm:$0xff] }
 0x22c   :  { %v1986_v40 = vsel %vm493_vm7, %v8015_v25, %v8189_v46  ;;  %v1847_v16 = vadd.f32 %v1840_v22, %v1762_v62  ;;  %v8228_v9 = vmul.f32 %v10474_v52, %v8064_v26  ;;  %v876_v15 = vadd.f32 %v869_v19, %v791_v44  ;;  %v10478_v49 = vld [vmem:[#allocation51_spill] sm:$0xff]  ;;  %v10481_v22 = vld [vmem:[#allocation106_spill] sm:$0xff]  ;;  %v974_v60 = vpop.permute.xlu0 %973 }
 0x22d   :  { %v1994_v51 = vmul.f32 %v10445_v17, %v1986_v40  ;;  %v1925_v58 = vmul.f32 %v10433_v56, %v1901_v37  ;;  %v838_v23 = vmul.f32 %v10477_v61, %v813_v48  ;;  %v2026_v36 = vmul.f32 %v10478_v49, %v1986_v40  ;;  %v10482_v44 = vld [vmem:[#allocation110_spill] sm:$0xff]  ;;  %v10485_v62 = vld [vmem:[#allocation35_spill] sm:$0xff] }
 0x22e   :  { %v2042_v57 = vmul.f32 %v10479_v42, %v1986_v40  ;;  %v837_v25 = vmul.f32 %v10477_v61, %v8196_v32  ;;  %v898_v26 = vsel %vm277_vm3, %v891_v14, %v10481_v22  ;;  %v893_v33 = vsel %vm277_vm3, %v10482_v44, %v889_v35  ;;  %v10486_v42 = vld [vmem:[#allocation37_spill] sm:$0xff] }
 0x22f   :  { %v8237_v63 = vadd.f32 %v1994_v51, %v1916_v34  ;;  %v836_v37 = vmul.f32 %v10477_v61, %v808_v53  ;;  %v8246_v48 = vadd.f32 %v2026_v36, %v1948_v39  ;;  %v907_v19 = vmul.f32 %v10485_v62, %v898_v26  ;;  %v10487_v34 = vld [vmem:[#allocation38_spill] sm:$0xff]  ;;  %v976_v61 = vpop.permute.xlu1 %975 }
 0x230   :  { %v8248_v50 = vadd.f32 %v2042_v57, %v1964_v4  ;;  %v939_v49 = vmul.f32 %v10486_v42, %v898_v26  ;;  %v955_v51 = vmul.f32 %v10487_v34, %v898_v26  ;;  %v905_v22 = vmul.f32 %v10485_v62, %v893_v33 }
 0x231   :  { %10480 = vst [vmem:[#allocation68_spill] sm:$0xff] %v8237_v63  ;;  %10483 = vst [vmem:[#allocation69_spill] sm:$0xff] %v8246_v48  ;;  %v8255_v63 = vsel %vm277_vm3, %v889_v35, %v891_v14  ;;  %v1926_v44 = vmul.f32 %v10433_v56, %v8143_v2  ;;  %v1932_v53 = vadd.f32 %v1925_v58, %v1847_v16  ;;  %v10488_v35 = vld [vmem:[#allocation36_spill] sm:$0xff] }
 0x232   :  { %10484 = vst [vmem:[#allocation66_spill] sm:$0xff] %v8248_v50  ;;  %v845_v39 = vadd.f32 %v838_v23, %v8116_v45  ;;  %v914_v4 = vadd.f32 %v907_v19, %v829_v13  ;;  %v844_v36 = vadd.f32 %v837_v25, %v8133_v6  ;;  %v946_v57 = vadd.f32 %v939_v49, %v861_v47  ;;  %v10489_v13 = vld [vmem:[#allocation108_spill] sm:$0xff]  ;;  %v10491_v25 = vld [vmem:[#allocation41_spill] sm:$0xff] }
 0x233   :  { %v962_v50 = vadd.f32 %v955_v51, %v877_v38  ;;  %v912_v48 = vadd.f32 %v905_v22, %v827_v7  ;;  %v843_v11 = vadd.f32 %v836_v37, %v8130_v59  ;;  %v923_v14 = vmul.f32 %v10488_v35, %v898_v26  ;;  %v10490_v7 = vld [vmem:[#allocation39_spill] sm:$0xff] }
 0x234   :  { %v937_v27 = vmul.f32 %v10486_v42, %v893_v33  ;;  %v938_v2 = vmul.f32 %v10486_v42, %v8255_v63  ;;  %v921_v16 = vmul.f32 %v10488_v35, %v893_v33  ;;  %v953_v45 = vmul.f32 %v10487_v34, %v893_v33  ;;  %v10492_v33 = vld [vmem:[#allocation42_spill] sm:$0xff] }
 0x235   :  { %v954_v6 = vmul.f32 %v10487_v34, %v8255_v63  ;;  %v983_v38 = vsel %vm331_vm4, %v976_v61, %v10489_v13  ;;  %v8277_v23 = vsel %vm331_vm4, %v974_v60, %v976_v61  ;;  %v8285_v19 = vsel %vm493_vm7, %v8189_v46, %v8187_v12 }
 0x236   :  { %v944_v47 = vadd.f32 %v937_v27, %v859_v43  ;;  %v945_v59 = vadd.f32 %v938_v2, %v860_v41  ;;  %v992_v58 = vmul.f32 %v10490_v7, %v983_v38  ;;  %v960_v49 = vadd.f32 %v953_v45, %v875_v21  ;;  %10493 = vst [vmem:[#allocation67_spill] sm:$0xff] %v8285_v19  ;;  %v10494_v41 = vld [vmem:[#allocation111_spill] sm:$0xff] }
 0x237   :  { %v961_v42 = vadd.f32 %v954_v6, %v876_v15  ;;  %v1024_v26 = vmul.f32 %v10491_v25, %v983_v38  ;;  %v1040_v37 = vmul.f32 %v10492_v33, %v983_v38  ;;  %v2010_v27 = vmul.f32 %v10450_v3, %v1986_v40  ;;  %v10495_v40 = vld [vmem:[#allocation40_spill] sm:$0xff] }
 0x238   :  { %v999_v43 = vadd.f32 %v992_v58, %v914_v4  ;;  %v978_v34 = vsel %vm331_vm4, %v10494_v41, %v974_v60  ;;  %v930_v51 = vadd.f32 %v923_v14, %v845_v39  ;;  %v922_v61 = vmul.f32 %v10488_v35, %v8255_v63  ;;  %v1059_v39 = vpop.permute.xlu0 %1058  ;;  %v10497_v41 = vld [vmem:[#allocation116_spill] sm:$0xff] }
 0x239   :  { %v1031_v21 = vadd.f32 %v1024_v26, %v946_v57  ;;  %v1047_v15 = vadd.f32 %v1040_v37, %v962_v50  ;;  %v990_v22 = vmul.f32 %v10490_v7, %v978_v34  ;;  %v928_v2 = vadd.f32 %v921_v16, %v843_v11  ;;  %v1061_v50 = vpop.permute.xlu1 %1060 }
 0x23a   :  { %v1022_v45 = vmul.f32 %v10491_v25, %v978_v34  ;;  %v1023_v46 = vmul.f32 %v10491_v25, %v8277_v23  ;;  %v1008_v4 = vmul.f32 %v10495_v40, %v983_v38  ;;  %v1038_v13 = vmul.f32 %v10492_v33, %v978_v34 }
 0x23b   :  { %v997_v6 = vadd.f32 %v990_v22, %v912_v48  ;;  %v1039_v60 = vmul.f32 %v10492_v33, %v8277_v23  ;;  %v1006_v57 = vmul.f32 %v10495_v40, %v978_v34  ;;  %v1848_v11 = vadd.f32 %v8228_v9, %v8217_v1  ;;  %v10496_v33 = vld [vmem:[#allocation109_spill] sm:$0xff]  ;;  %v10498_v9 = vld [vmem:[#allocation56_spill] sm:$0xff] }
 0x23c   :  { %v1029_v14 = vadd.f32 %v1022_v45, %v944_v47  ;;  %v1030_v35 = vadd.f32 %v1023_v46, %v945_v59  ;;  %v1045_v16 = vadd.f32 %v1038_v13, %v960_v49  ;;  %v2011_v38 = vmul.f32 %v10450_v3, %v8285_v19 }
 0x23d   :  { %v1046_v58 = vadd.f32 %v1039_v60, %v961_v42  ;;  %v2017_v48 = vadd.f32 %v2010_v27, %v1932_v53  ;;  %v1007_v25 = vmul.f32 %v10495_v40, %v8277_v23  ;;  %v1933_v26 = vadd.f32 %v1926_v44, %v1848_v11  ;;  %v10499_v42 = vld [vmem:[#allocation61_spill] sm:$0xff]  ;;  %v10500_v27 = vld [vmem:[#allocation62_spill] sm:$0xff] }
 0x23e   :  { %v1068_v37 = vsel %vm385_vm5, %v1061_v50, %v10496_v33  ;;  %v1063_v47 = vsel %vm385_vm5, %v10497_v41, %v1059_v39  ;;  %v929_v59 = vadd.f32 %v922_v61, %v844_v36  ;;  %v8320_v44 = vsel %vm385_vm5, %v1059_v39, %v1061_v50  ;;  %v1146_v36 = vpop.permute.xlu1 %1145  ;;  %v1144_v39 = vpop.permute.xlu0 %1143 }
 0x23f   :  { %v2074_v1 = vadd.f32 %v7710_v30, %v2017_v48  ;;  %v1077_v49 = vmul.f32 %v10498_v9, %v1068_v37  ;;  %v1109_v34 = vmul.f32 %v10499_v42, %v1068_v37  ;;  %v2018_v53 = vadd.f32 %v2011_v38, %v1933_v26  ;;  %v10501_v38 = vld [vmem:[#allocation60_spill] sm:$0xff] }
 0x240   :  { %v1125_v22 = vmul.f32 %v10500_v27, %v1068_v37  ;;  %v1075_v45 = vmul.f32 %v10498_v9, %v1063_v47  ;;  %v1015_v46 = vadd.f32 %v1008_v4, %v930_v51  ;;  %v1013_v40 = vadd.f32 %v1006_v57, %v928_v2 }
 0x241   :  { %v1084_v13 = vadd.f32 %v1077_v49, %v999_v43  ;;  %v1116_v60 = vadd.f32 %v1109_v34, %v1031_v21  ;;  %v1014_v61 = vadd.f32 %v1007_v25, %v929_v59  ;;  %v2075_v11 = vadd.f32 %v7710_v30, %v2018_v53  ;;  %v10502_v21 = vld [vmem:[#allocation114_spill] sm:$0xff]  ;;  %v10503_v59 = vld [vmem:[#allocation76_spill] sm:$0xff]  ;;  %v10504_v49 = vld [vmem:[#allocation77_spill] sm:$0xff] }
 0x242   :  { %v1132_v48 = vadd.f32 %v1125_v22, %v1047_v15  ;;  %v1082_v33 = vadd.f32 %v1075_v45, %v997_v6  ;;  %v2081_v41 = vmax.f32 %v2074_v1, 0.0  ;;  %v1093_v26 = vmul.f32 %v10501_v38, %v1068_v37  ;;  %v10505_v34 = vld [vmem:[#allocation78_spill] sm:$0xff]  ;;  %v10507_v45 = vld [vmem:[#allocation117_spill] sm:$0xff] }
 0x243   :  { %v1107_v3 = vmul.f32 %v10499_v42, %v1063_v47  ;;  %v1108_v50 = vmul.f32 %v10499_v42, %v8320_v44  ;;  %v2082_v12 = vmax.f32 %v2075_v11, 0.0  ;;  %v1123_v51 = vmul.f32 %v10500_v27, %v1063_v47 }
 0x244   :  { %v1124_v43 = vmul.f32 %v10500_v27, %v8320_v44  ;;  %v1153_v15 = vsel %vm439_vm6, %v1146_v36, %v10502_v21  ;;  %v1091_v2 = vmul.f32 %v10501_v38, %v1063_v47  ;;  %v1092_v4 = vmul.f32 %v10501_v38, %v8320_v44  ;;  %v10506_v27 = vld [vmem:[#allocation80_spill] sm:$0xff] }
 0x245   :  { %v1114_v6 = vadd.f32 %v1107_v3, %v1029_v14  ;;  %v1115_v57 = vadd.f32 %v1108_v50, %v1030_v35  ;;  %2522 = vmatprep.mubr.f32.mxu1 %v2082_v12  ;;  %v1130_v25 = vadd.f32 %v1123_v51, %v1045_v16  ;;  %v1162_v1 = vmul.f32 %v10503_v59, %v1153_v15  ;;  %v10508_v16 = vld [vmem:[#allocation33_spill] sm:$0xff]  ;;  %v1231_v51 = vpop.permute.xlu1 %1230 }
 0x246   :  { %v1131_v37 = vadd.f32 %v1124_v43, %v1046_v58  ;;  %v1178_v42 = vmul.f32 %v10504_v49, %v1153_v15  ;;  %2523 = vmatmul.mubr.f32.vlgmr.msra.gmra.mrb[0].mxu1 %v2081_v41  ;;  %v1194_v53 = vmul.f32 %v10505_v34, %v1153_v15  ;;  %v1210_v22 = vmul.f32 %v10506_v27, %v1153_v15  ;;  %v1229_v43 = vpop.permute.xlu0 %1228 }
 0x247   :  { %v8343_v47 = vsel %vm439_vm6, %v1144_v39, %v1146_v36  ;;  %v1148_v3 = vsel %vm439_vm6, %v10507_v45, %v1144_v39  ;;  %v1100_v12 = vadd.f32 %v1093_v26, %v1015_v46  ;;  %v1169_v14 = vadd.f32 %v1162_v1, %v1084_v13  ;;  %v10510_v1 = vld [vmem:[#allocation82_spill] sm:$0xff] }
 0x248   :  { %v1160_v35 = vmul.f32 %v10503_v59, %v1148_v3  ;;  %v1333_v58 = vmul.f32 %v10475_v10, %v10508_v16  ;;  %v1098_v11 = vadd.f32 %v1091_v2, %v1013_v40  ;;  %v1099_v41 = vadd.f32 %v1092_v4, %v1014_v61 }
 0x249   :  { %v1201_v38 = vadd.f32 %v1194_v53, %v1116_v60  ;;  %v1217_v50 = vadd.f32 %v1210_v22, %v1132_v48  ;;  %v1176_v36 = vmul.f32 %v10504_v49, %v1148_v3  ;;  %v1192_v15 = vmul.f32 %v10505_v34, %v1148_v3  ;;  %v10509_v48 = vld [vmem:[#allocation115_spill] sm:$0xff]  ;;  %v10512_v22 = vld [vmem:[#allocation84_spill] sm:$0xff] }
 0x24a   :  { %v1167_v21 = vadd.f32 %v1160_v35, %v1082_v33  ;;  %v1193_v46 = vmul.f32 %v10505_v34, %v8343_v47  ;;  %v1185_v13 = vadd.f32 %v1178_v42, %v1100_v12  ;;  %v1177_v26 = vmul.f32 %v10504_v49, %v8343_v47  ;;  %v10511_v49 = vld [vmem:[#allocation83_spill] sm:$0xff] }
 0x24b   :  { %v1208_v10 = vmul.f32 %v10506_v27, %v1148_v3  ;;  %v1209_v40 = vmul.f32 %v10506_v27, %v8343_v47  ;;  %v1199_v60 = vadd.f32 %v1192_v15, %v1114_v6  ;;  %v1238_v33 = vsel %vm493_vm7, %v1231_v51, %v10509_v48  ;;  %v10513_v27 = vld [vmem:[#allocation85_spill] sm:$0xff] }
 0x24c   :  { %v1200_v61 = vadd.f32 %v1193_v46, %v1115_v57  ;;  %v8365_v39 = vsel %vm493_vm7, %v1229_v43, %v1231_v51  ;;  %v1247_v42 = vmul.f32 %v10510_v1, %v1238_v33  ;;  %v1263_v34 = vmul.f32 %v10511_v49, %v1238_v33  ;;  %v10514_v57 = vld [vmem:[#allocation120_spill] sm:$0xff] }
 0x24d   :  { %v1215_v2 = vadd.f32 %v1208_v10, %v1130_v25  ;;  %v1216_v4 = vadd.f32 %v1209_v40, %v1131_v37  ;;  %v1183_v53 = vadd.f32 %v1176_v36, %v1098_v11  ;;  %v1279_v45 = vmul.f32 %v10512_v22, %v1238_v33 }
 0x24e   :  { %v1295_v6 = vmul.f32 %v10513_v27, %v1238_v33  ;;  %v1233_v3 = vsel %vm493_vm7, %v10514_v57, %v1229_v43  ;;  %v1254_v12 = vadd.f32 %v1247_v42, %v1169_v14  ;;  %v1270_v35 = vadd.f32 %v1263_v34, %v1185_v13  ;;  %v1387_v43 = vpop.permute.xlu1 %1386  ;;  %v10516_v42 = vld [vmem:[#allocation75_spill] sm:$0xff] }
 0x24f   :  { %v1245_v51 = vmul.f32 %v10510_v1, %v1233_v3  ;;  %v1261_v25 = vmul.f32 %v10511_v49, %v1233_v3  ;;  %v1184_v37 = vadd.f32 %v1177_v26, %v1099_v41  ;;  %v1286_v15 = vadd.f32 %v1279_v45, %v1201_v38  ;;  %v10515_v41 = vld [vmem:[#allocation74_spill] sm:$0xff]  ;;  %v10518_v57 = vld [vmem:[#allocation43_spill] sm:$0xff] }
 0x250   :  { %v1302_v46 = vadd.f32 %v1295_v6, %v1217_v50  ;;  %v1262_v11 = vmul.f32 %v10511_v49, %v8365_v39  ;;  %v1277_v40 = vmul.f32 %v10512_v22, %v1233_v3  ;;  %v1278_v48 = vmul.f32 %v10512_v22, %v8365_v39 }
 0x251   :  { %v1252_v36 = vadd.f32 %v1245_v51, %v1167_v21  ;;  %v1268_v10 = vadd.f32 %v1261_v25, %v1183_v53  ;;  %v1293_v13 = vmul.f32 %v10513_v27, %v1233_v3  ;;  %v1294_v33 = vmul.f32 %v10513_v27, %v8365_v39  ;;  %v10517_v21 = vld [vmem:[#allocation79_spill] sm:$0xff]  ;;  %v1385_v53 = vpop.permute.xlu0 %1384  ;;  %v10519_v27 = vld [vmem:[#allocation86_spill] sm:$0xff]  ;;  %v10522_v25 = vld [vmem:[#allocation24_spill] sm:$0xff] }
 0x252   :  { %v1269_v14 = vadd.f32 %v1262_v11, %v1184_v37  ;;  %v1325_v38 = vadd.f32 %v10515_v41, %v1254_v12  ;;  %v1284_v50 = vadd.f32 %v1277_v40, %v1199_v60  ;;  %v1285_v26 = vadd.f32 %v1278_v48, %v1200_v61  ;;  %v10520_v60 = vld [vmem:[#allocation88_spill] sm:$0xff] }
 0x253   :  { %v8386_v49 = vadd.f32 %v10516_v42, %v1270_v35  ;;  %v1357_v34 = vadd.f32 %v10517_v21, %v1286_v15  ;;  %v1300_v45 = vadd.f32 %v1293_v13, %v1215_v2  ;;  %v1301_v6 = vadd.f32 %v1294_v33, %v1216_v4  ;;  %v10521_v35 = vld [vmem:[#allocation89_spill] sm:$0xff]  ;;  %v1472_v13 = vpop.permute.xlu1 %1471 }
 0x254   :  { %v1373_v22 = vadd.f32 %v8157_v18, %v1302_v46  ;;  %v8393_v3 = vsel %vm115_vm0, %v1387_v43, %v10518_v57  ;;  %v1348_v2 = vmul.f32 %v10522_v25, %v10472_v24  ;;  %v8404_v4 = vadd.f32 %v8214_v31, %v1268_v10 }
 0x255   :  { %v1403_v12 = vmul.f32 %v10519_v27, %v8393_v3  ;;  %v1435_v61 = vmul.f32 %v10520_v60, %v8393_v3  ;;  %v1451_v51 = vmul.f32 %v10521_v35, %v8393_v3  ;;  %v8406_v18 = vadd.f32 %v1333_v58, %v1269_v14  ;;  %v1470_v21 = vpop.permute.xlu0 %1469 }
 0x256   :  { %v1349_v37 = vmul.f32 %v10522_v25, %v10508_v16  ;;  %v1364_v15 = vmul.f32 %v10461_v54, %v10472_v24  ;;  %v1365_v48 = vmul.f32 %v10461_v54, %v10508_v16  ;;  %v821_v33 = vmul.f32 %v10466_v20, %v8196_v32  ;;  %v10523_v24 = vld [vmem:[#allocation124_spill] sm:$0xff]  ;;  %v10524_v32 = vld [vmem:[#allocation46_spill] sm:$0xff] }
 0x257   :  { %v1410_v46 = vadd.f32 %v1403_v12, %v1325_v38  ;;  %v1442_v11 = vadd.f32 %v1435_v61, %v1357_v34  ;;  %v1458_v40 = vadd.f32 %v1451_v51, %v1373_v22  ;;  %v1323_v31 = vadd.f32 %v8203_v0, %v1252_v36  ;;  %v10525_v12 = vld [vmem:[#allocation91_spill] sm:$0xff]  ;;  %v10526_v61 = vld [vmem:[#allocation93_spill] sm:$0xff] }
 0x258   :  { %v1355_v58 = vadd.f32 %v1348_v2, %v1284_v50  ;;  %v1356_v10 = vadd.f32 %v1349_v37, %v1285_v26  ;;  %v1371_v14 = vadd.f32 %v1364_v15, %v1300_v45  ;;  %v1372_v41 = vadd.f32 %v1365_v48, %v1301_v6  ;;  %v3938_v37 = vld [vmem:[%s9982_s5 + $0x600] sm:$0xff] }
 0x259   :  { %v8419_v42 = vsel %vm115_vm0, %v1385_v53, %v1387_v43  ;;  %v1389_v38 = vsel %vm115_vm0, %v10523_v24, %v1385_v53  ;;  %v906_v54 = vmul.f32 %v10485_v62, %v8255_v63  ;;  %v8430_v0 = vsel %vm169_vm1, %v1472_v13, %v10524_v32  ;;  %v1557_v32 = vpop.permute.xlu1 %1556 }
 0x25a   :  { %v1401_v20 = vmul.f32 %v10519_v27, %v1389_v38  ;;  %v1433_v36 = vmul.f32 %v10520_v60, %v1389_v38  ;;  %v1434_v43 = vmul.f32 %v10520_v60, %v8419_v42  ;;  %v1449_v50 = vmul.f32 %v10521_v35, %v1389_v38 }
 0x25b   :  { %v1450_v26 = vmul.f32 %v10521_v35, %v8419_v42  ;;  %v828_v34 = vadd.f32 %v821_v33, %v8125_v5  ;;  %v991_v63 = vmul.f32 %v10490_v7, %v8277_v23  ;;  %v8443_v53 = vsel %vm169_vm1, %v1470_v21, %v1472_v13  ;;  %v10527_v5 = vld [vmem:[#allocation94_spill] sm:$0xff]  ;;  %v10528_v7 = vld [vmem:[#allocation55_spill] sm:$0xff] }
 0x25c   :  { %v1408_v62 = vadd.f32 %v1401_v20, %v1323_v31  ;;  %v1440_v45 = vadd.f32 %v1433_v36, %v1355_v58  ;;  %v1441_v6 = vadd.f32 %v1434_v43, %v1356_v10  ;;  %v1456_v22 = vadd.f32 %v1449_v50, %v1371_v14  ;;  %v3939_v33 = vld [vmem:[%s9982_s5 + $0x608] sm:$0xff]  ;;  %v3954_v31 = vld [vmem:[%s9982_s5 + $0x680] sm:$0xff]  ;;  %v1555_v36 = vpop.permute.xlu0 %1554 }
 0x25d   :  { %v1457_v57 = vadd.f32 %v1450_v26, %v1372_v41  ;;  %v1488_v60 = vmul.f32 %v10525_v12, %v8430_v0  ;;  %v1520_v35 = vmul.f32 %v10526_v61, %v8430_v0  ;;  %v1536_v51 = vmul.f32 %v10527_v5, %v8430_v0  ;;  %v3955_v58 = vld [vmem:[%s9982_s5 + $0x688] sm:$0xff]  ;;  %v3922_v14 = vld [vmem:[%s9982_s5 + $0x580] sm:$0xff] }
 0x25e   :  { %v913_v25 = vadd.f32 %v906_v54, %v828_v34  ;;  %v1474_v23 = vsel %vm169_vm1, %v10528_v7, %v1470_v21  ;;  %v1519_v2 = vmul.f32 %v10526_v61, %v8443_v53  ;;  %v8470_v10 = vmul.f32 %v10445_v17, %v8082_v29  ;;  %v3923_v41 = vld [vmem:[%s9982_s5 + $0x588] sm:$0xff]  ;;  %v10531_v7 = vld [vmem:[#allocation57_spill] sm:$0xff] }
 0x25f   :  { %v1495_v15 = vadd.f32 %v1488_v60, %v1410_v46  ;;  %v1527_v48 = vadd.f32 %v1520_v35, %v1442_v11  ;;  %v1543_v13 = vadd.f32 %v1536_v51, %v1458_v40  ;;  %v8474_v46 = vmul.f32 %v10445_v17, %v8285_v19  ;;  %v10529_v43 = vld [vmem:[#allocation87_spill] sm:$0xff]  ;;  %v10538_v19 = vld [vmem:[#allocation100_spill] sm:$0xff] }
 0x260   :  { %v8476_v11 = vadd.f32 %v991_v63, %v913_v25  ;;  %v1486_v40 = vmul.f32 %v10525_v12, %v1474_v23  ;;  %v1518_v24 = vmul.f32 %v10526_v61, %v1474_v23  ;;  %v1526_v21 = vadd.f32 %v1519_v2, %v1441_v6  ;;  %v10530_v61 = vld [vmem:[#allocation52_spill] sm:$0xff]  ;;  %v10539_v12 = vld [vmem:[#allocation103_spill] sm:$0xff] }
 0x261   :  { %v1534_v54 = vmul.f32 %v10527_v5, %v1474_v23  ;;  %v1535_v20 = vmul.f32 %v10527_v5, %v8443_v53  ;;  %v1419_v50 = vmul.f32 %v10529_v43, %v8393_v3  ;;  %v4887_v34 = vpack.c.bf16 %v3939_v33, %v3938_v37 }
 0x262   :  { %v1493_v26 = vadd.f32 %v1486_v40, %v1408_v62  ;;  %v4920_v63 = vpack.c.bf16 %v3955_v58, %v3954_v31  ;;  %v1525_v60 = vadd.f32 %v1518_v24, %v1440_v45  ;;  %v4889_v25 = vpack.c.bf16 %v3923_v41, %v3922_v14  ;;  %v10533_v45 = vld [vmem:[#allocation97_spill] sm:$0xff]  ;;  %v3940_v58 = vld [vmem:[%s9982_s5 + $0x610] sm:$0xff] }
 0x263   :  { %v1541_v35 = vadd.f32 %v1534_v54, %v1456_v22  ;;  %v1542_v51 = vadd.f32 %v1535_v20, %v1457_v57  ;;  %v8493_v6 = vmul.f32 %v10498_v9, %v8320_v44  ;;  %4888 = vmatprep.subr.bf16.mxu0 %v4887_v34  ;;  %v8498_v5 = vsel %vm223_vm2, %v1557_v32, %v10530_v61  ;;  %v10532_v9 = vld [vmem:[#allocation95_spill] sm:$0xff]  ;;  %v3941_v40 = vld [vmem:[%s9982_s5 + $0x618] sm:$0xff]  ;;  %v3924_v20 = vld [vmem:[%s9982_s5 + $0x590] sm:$0xff] }
 0x264   :  { %4921 = vmatpush3.bf16.msra.mxu1 %v4920_v63  ;;  %v8503_v3 = vsel %vm223_vm2, %v10531_v7, %v1555_v36  ;;  %v8507_v62 = vmul.f32 %v10503_v59, %v8343_v47  ;;  %4890 = vmatpush3.bf16.msra.mxu0 %v4889_v25  ;;  %v1573_v44 = vmul.f32 %v10532_v9, %v8498_v5  ;;  %v10534_v57 = vld [vmem:[#allocation99_spill] sm:$0xff]  ;;  %v10535_v47 = vmov 0.0|0.0   ;;  %v3957_v54 = vld [vmem:[%s9982_s5 + $0x698] sm:$0xff] }
 0x265   :  { %v1605_v22 = vmul.f32 %v10533_v45, %v8498_v5  ;;  %v1621_v2 = vmul.f32 %v10534_v57, %v8498_v5  ;;  %v1426_v37 = vadd.f32 %v1419_v50, %v8386_v49  ;;  %v1417_v33 = vmul.f32 %v10529_v43, %v1389_v38  ;;  %4922 = vmatprep.subr.bf16.mxu1 %v10535_v47  ;;  %v3956_v49 = vld [vmem:[%s9982_s5 + $0x690] sm:$0xff] }
 0x266   :  { %v8519_v31 = vsel %vm223_vm2, %v1555_v36, %v1557_v32  ;;  %v1571_v59 = vmul.f32 %v10532_v9, %v8503_v3  ;;  %v1418_v38 = vmul.f32 %v10529_v43, %v8419_v42  ;;  %v1580_v14 = vadd.f32 %v1573_v44, %v1495_v15  ;;  %v3925_v32 = vld [vmem:[%s9982_s5 + $0x598] sm:$0xff]  ;;  %v1642_v36 = vpop.permute.xlu1 %1641  ;;  %v10536_v50 = vld [vmem:[#allocation92_spill] sm:$0xff] }
 0x267   :  { %v1612_v41 = vadd.f32 %v1605_v22, %v1527_v48  ;;  %v1628_v24 = vadd.f32 %v1621_v2, %v1543_v13  ;;  %v1504_v34 = vmul.f32 %v10536_v50, %v8430_v0  ;;  %v1502_v15 = vmul.f32 %v10536_v50, %v1474_v23  ;;  %v10537_v22 = vld [vmem:[#allocation54_spill] sm:$0xff]  ;;  %v1640_v23 = vpop.permute.xlu0 %1639 }
 0x268   :  { %v1578_v48 = vadd.f32 %v1571_v59, %v1493_v26  ;;  %v1603_v13 = vmul.f32 %v10533_v45, %v8503_v3  ;;  %v1604_v43 = vmul.f32 %v10533_v45, %v8519_v31  ;;  %v1619_v63 = vmul.f32 %v10534_v57, %v8503_v3 }
 0x269   :  { %v1620_v25 = vmul.f32 %v10534_v57, %v8519_v31  ;;  %v4891_v61 = vpack.c.bf16 %v3941_v40, %v3940_v58  ;;  %v4923_v7 = vpack.c.bf16 %v3957_v54, %v3956_v49  ;;  %v4893_v44 = vpack.c.bf16 %v3925_v32, %v3924_v20  ;;  %v10540_v58 = vld [vmem:[#allocation105_spill] sm:$0xff]  ;;  %v10541_v54 = vld [vmem:[#allocation44_spill] sm:$0xff] }
 0x26a   :  { %v1649_v0 = vsel %vm277_vm3, %v1642_v36, %v10537_v22  ;;  %v1610_v26 = vadd.f32 %v1603_v13, %v1525_v60  ;;  %v1611_v2 = vadd.f32 %v1604_v43, %v1526_v21  ;;  %v1626_v59 = vadd.f32 %v1619_v63, %v1541_v35  ;;  %v3942_v43 = vld [vmem:[%s9982_s5 + $0x620] sm:$0xff] }
 0x26b   :  { %v1627_v29 = vadd.f32 %v1620_v25, %v1542_v51  ;;  %v1424_v45 = vadd.f32 %v1417_v33, %v8404_v4  ;;  %4892 = vmatprep.subr.bf16.mxu0 %v4891_v61  ;;  %4924 = vmatpush3.bf16.msra.mxu1 %v4923_v7  ;;  %v1658_v9 = vmul.f32 %v10538_v19, %v1649_v0  ;;  %v10192_v33 = vmov 0.0  }
 0x26c   :  { %v1690_v57 = vmul.f32 %v10539_v12, %v1649_v0  ;;  %4894 = vmatpush3.bf16.msra.mxu0 %v4893_v44  ;;  %v1706_v40 = vmul.f32 %v10540_v58, %v1649_v0  ;;  %v8564_v49 = vsel %vm277_vm3, %v1640_v23, %v1642_v36  ;;  %v1644_v21 = vsel %vm277_vm3, %v10541_v54, %v1640_v23 }
 0x26d   :  { %4925 = vmatprep.subr.bf16.mxu1 %v10535_v47  ;;  %v1425_v4 = vadd.f32 %v1418_v38, %v8406_v18  ;;  %v1665_v60 = vadd.f32 %v1658_v9, %v1580_v14  ;;  %v1656_v51 = vmul.f32 %v10538_v19, %v1644_v21  ;;  %4715 = vmatprep.mubr.msk.f32.mxu1 %vm5385_vm8, %v10192_v33  ;;  %v3943_v18 = vld [vmem:[%s9982_s5 + $0x628] sm:$0xff]  ;;  %v3958_v9 = vld [vmem:[%s9982_s5 + $0x6a0] sm:$0xff] }
 0x26e   :  { %v1697_v35 = vadd.f32 %v1690_v57, %v1612_v41  ;;  %v1511_v20 = vadd.f32 %v1504_v34, %v1426_v37  ;;  %v1503_v32 = vmul.f32 %v10536_v50, %v8443_v53  ;;  %v1509_v36 = vadd.f32 %v1502_v15, %v1424_v45  ;;  %v3926_v50 = vld [vmem:[%s9982_s5 + $0x5a0] sm:$0xff]  ;;  %v3927_v34 = vld [vmem:[%s9982_s5 + $0x5a8] sm:$0xff]  ;;  %v1727_v15 = vpop.permute.xlu1 %1726  ;;  %v1725_v45 = vpop.permute.xlu0 %1724  ;;  %v3944_v57 = vld [vmem:[%s9982_s5 + $0x630] sm:$0xff] }
 0x26f   :  { %v1713_v13 = vadd.f32 %v1706_v40, %v1628_v24  ;;  %v1663_v38 = vadd.f32 %v1656_v51, %v1578_v48  ;;  %v1688_v37 = vmul.f32 %v10539_v12, %v1644_v21  ;;  %v1689_v14 = vmul.f32 %v10539_v12, %v8564_v49  ;;  %v3959_v24 = vld [vmem:[%s9982_s5 + $0x6a8] sm:$0xff]  ;;  %v10542_v48 = vld [vmem:[#allocation96_spill] sm:$0xff]  ;;  %v10543_v51 = vld [vmem:[#allocation58_spill] sm:$0xff] }
 0x270   :  { %v1704_v41 = vmul.f32 %v10540_v58, %v1644_v21  ;;  %v1589_v63 = vmul.f32 %v10542_v48, %v8498_v5  ;;  %v1587_v12 = vmul.f32 %v10542_v48, %v8503_v3  ;;  %v1588_v25 = vmul.f32 %v10542_v48, %v8519_v31  ;;  %v3945_v5 = vld [vmem:[%s9982_s5 + $0x638] sm:$0xff] }
 0x271   :  { %v1705_v61 = vmul.f32 %v10540_v58, %v8564_v49  ;;  %v1695_v7 = vadd.f32 %v1688_v37, %v1610_v26  ;;  %v1696_v44 = vadd.f32 %v1689_v14, %v1611_v2  ;;  %v4895_v23 = vpack.c.bf16 %v3943_v18, %v3942_v43  ;;  %v10544_v2 = vld [vmem:[#allocation98_spill] sm:$0xff]  ;;  %v10545_v43 = vld [vmem:[#allocation113_spill] sm:$0xff] }
 0x272   :  { %v1711_v22 = vadd.f32 %v1704_v41, %v1626_v59  ;;  %v4926_v40 = vpack.c.bf16 %v3959_v24, %v3958_v9  ;;  %v4897_v54 = vpack.c.bf16 %v3927_v34, %v3926_v50  ;;  %v1734_v58 = vsel %vm331_vm4, %v1727_v15, %v10543_v51  ;;  %v10546_v37 = vld [vmem:[#allocation118_spill] sm:$0xff] }
 0x273   :  { %v1712_v3 = vadd.f32 %v1705_v61, %v1627_v29  ;;  %v1674_v26 = vmul.f32 %v10409_v55, %v1649_v0  ;;  %4896 = vmatprep.subr.bf16.mxu0 %v4895_v23  ;;  %v1743_v59 = vmul.f32 %v10544_v2, %v1734_v58  ;;  %v1775_v18 = vmul.f32 %v10545_v43, %v1734_v58  ;;  %v10547_v9 = vld [vmem:[#allocation102_spill] sm:$0xff] }
 0x274   :  { %v1791_v14 = vmul.f32 %v10546_v37, %v1734_v58  ;;  %4927 = vmatpush3.bf16.msra.mxu1 %v4926_v40  ;;  %4898 = vmatpush3.bf16.msra.mxu0 %v4897_v54  ;;  %v8621_v29 = vsel %vm331_vm4, %v1725_v45, %v1727_v15  ;;  %v1729_v41 = vsel %vm331_vm4, %v10547_v9, %v1725_v45  ;;  %v3960_v15 = vld [vmem:[%s9982_s5 + $0x6b0] sm:$0xff] }
 0x275   :  { %v4899_v24 = vpack.c.bf16 %v3945_v5, %v3944_v57  ;;  %v1510_v50 = vadd.f32 %v1503_v32, %v1425_v4  ;;  %v1750_v0 = vadd.f32 %v1743_v59, %v1665_v60  ;;  %v1782_v34 = vadd.f32 %v1775_v18, %v1697_v35  ;;  %4928 = vmatprep.subr.bf16.mxu1 %v10535_v47  ;;  %v3929_v32 = vld [vmem:[%s9982_s5 + $0x5b8] sm:$0xff]  ;;  %v1810_v5 = vpop.permute.xlu0 %1809 }
 0x276   :  { %v1798_v48 = vadd.f32 %v1791_v14, %v1713_v13  ;;  %v1596_v61 = vadd.f32 %v1589_v63, %v1511_v20  ;;  %v1594_v23 = vadd.f32 %v1587_v12, %v1509_v36  ;;  %v1672_v40 = vmul.f32 %v10409_v55, %v1644_v21  ;;  %v3961_v21 = vld [vmem:[%s9982_s5 + $0x6b8] sm:$0xff]  ;;  %v3928_v20 = vld [vmem:[%s9982_s5 + $0x5b0] sm:$0xff]  ;;  %v1812_v36 = vpop.permute.xlu1 %1811 }
 0x277   :  { %v1741_v54 = vmul.f32 %v10544_v2, %v1729_v41  ;;  %4900 = vmatprep.subr.bf16.mxu0 %v4899_v24  ;;  %v1773_v45 = vmul.f32 %v10545_v43, %v1729_v41  ;;  %v1774_v4 = vmul.f32 %v10545_v43, %v8621_v29  ;;  %v1789_v60 = vmul.f32 %v10546_v37, %v1729_v41  ;;  %v10548_v24 = vld [vmem:[#allocation59_spill] sm:$0xff] }
 0x278   :  { %v1790_v35 = vmul.f32 %v10546_v37, %v8621_v29  ;;  %v1595_v13 = vadd.f32 %v1588_v25, %v1510_v50  ;;  %v1681_v63 = vadd.f32 %v1674_v26, %v1596_v61  ;;  %v1673_v12 = vmul.f32 %v10409_v55, %v8564_v49  ;;  %v10549_v2 = vld [vmem:[#allocation119_spill] sm:$0xff]  ;;  %v10550_v25 = vld [vmem:[#allocation121_spill] sm:$0xff]  ;;  %v10551_v50 = vld [vmem:[#allocation122_spill] sm:$0xff] }
 0x279   :  { %v1748_v57 = vadd.f32 %v1741_v54, %v1663_v38  ;;  %v1780_v51 = vadd.f32 %v1773_v45, %v1695_v7  ;;  %v1781_v59 = vadd.f32 %v1774_v4, %v1696_v44  ;;  %v1796_v43 = vadd.f32 %v1789_v60, %v1711_v22  ;;  %v10552_v44 = vld [vmem:[#allocation17_spill] sm:$0xff]  ;;  %v3962_v45 = vld [vmem:[%s9982_s5 + $0x6c0] sm:$0xff]  ;;  %v3963_v4 = vld [vmem:[%s9982_s5 + $0x6c8] sm:$0xff] }
 0x27a   :  { %v1797_v18 = vadd.f32 %v1790_v35, %v1712_v3  ;;  %v1679_v37 = vadd.f32 %v1672_v40, %v1594_v23  ;;  %v4929_v14 = vpack.c.bf16 %v3961_v21, %v3960_v15  ;;  %v4901_v9 = vpack.c.bf16 %v3929_v32, %v3928_v20  ;;  %v3946_v3 = vld [vmem:[%s9982_s5 + $0x640] sm:$0xff]  ;;  %v1897_v20 = vpop.permute.xlu1 %1896  ;;  %v1895_v32 = vpop.permute.xlu0 %1894 }
 0x27b   :  { %v1819_v33 = vsel %vm385_vm5, %v1812_v36, %v10548_v24  ;;  %v8657_v55 = vsel %vm385_vm5, %v1810_v5, %v1812_v36  ;;  %v1680_v38 = vadd.f32 %v1673_v12, %v1595_v13  ;;  %v1759_v7 = vmul.f32 %v10417_v28, %v1734_v58  ;;  %v3947_v58 = vld [vmem:[%s9982_s5 + $0x648] sm:$0xff] }
 0x27c   :  { %v1828_v19 = vmul.f32 %v10549_v2, %v1819_v33  ;;  %v1860_v26 = vmul.f32 %v10550_v25, %v1819_v33  ;;  %v1876_v61 = vmul.f32 %v10551_v50, %v1819_v33  ;;  %4930 = vmatpush3.bf16.msra.mxu1 %v4929_v14  ;;  %4902 = vmatpush3.bf16.msra.mxu0 %v4901_v9 }
 0x27d   :  { %v1814_v22 = vsel %vm385_vm5, %v10552_v44, %v1810_v5  ;;  %v1757_v23 = vmul.f32 %v10417_v28, %v1729_v41  ;;  %4931 = vmatprep.subr.bf16.mxu1 %v10535_v47  ;;  %v1758_v41 = vmul.f32 %v10417_v28, %v8621_v29  ;;  %v1859_v60 = vmul.f32 %v10550_v25, %v8657_v55  ;;  %v3930_v28 = vld [vmem:[%s9982_s5 + $0x5c0] sm:$0xff] }
 0x27e   :  { %v1835_v40 = vadd.f32 %v1828_v19, %v1750_v0  ;;  %v1867_v54 = vadd.f32 %v1860_v26, %v1782_v34  ;;  %v1883_v15 = vadd.f32 %v1876_v61, %v1798_v48  ;;  %v1844_v19 = vmul.f32 %v10474_v52, %v1819_v33  ;;  %v3931_v33 = vld [vmem:[%s9982_s5 + $0x5c8] sm:$0xff] }
 0x27f   :  { %v1826_v0 = vmul.f32 %v10549_v2, %v1814_v22  ;;  %v1843_v34 = vmul.f32 %v10474_v52, %v8657_v55  ;;  %v1858_v48 = vmul.f32 %v10550_v25, %v1814_v22  ;;  %v1874_v35 = vmul.f32 %v10551_v50, %v1814_v22 }
 0x280   :  { %v1875_v21 = vmul.f32 %v10551_v50, %v8657_v55  ;;  %v1842_v13 = vmul.f32 %v10474_v52, %v1814_v22  ;;  %v4903_v12 = vpack.c.bf16 %v3947_v58, %v3946_v3  ;;  %v4932_v5 = vpack.c.bf16 %v3963_v4, %v3962_v45  ;;  %v10553_v50 = vld [vmem:[#allocation130_spill] sm:$0xff]  ;;  %v10557_v58 = vld [vmem:[#allocation28_spill] sm:$0xff] }
 0x281   :  { %v1833_v36 = vadd.f32 %v1826_v0, %v1748_v57  ;;  %v1865_v14 = vadd.f32 %v1858_v48, %v1780_v51  ;;  %v1866_v9 = vadd.f32 %v1859_v60, %v1781_v59  ;;  %v1881_v24 = vadd.f32 %v1874_v35, %v1796_v43  ;;  %v10554_v0 = vld [vmem:[#allocation47_spill] sm:$0xff]  ;;  %v10555_v22 = vld [vmem:[#allocation50_spill] sm:$0xff] }
 0x282   :  { %v1882_v25 = vadd.f32 %v1875_v21, %v1797_v18  ;;  %4904 = vmatprep.subr.bf16.mxu0 %v4903_v12  ;;  %4933 = vmatpush3.bf16.msra.mxu1 %v4932_v5  ;;  %v4905_v26 = vpack.c.bf16 %v3931_v33, %v3930_v28  ;;  %v1904_v61 = vsel %vm439_vm6, %v1897_v20, %v10553_v50  ;;  %v10556_v51 = vld [vmem:[#allocation123_spill] sm:$0xff] }
 0x283   :  { %v8701_v44 = vsel %vm439_vm6, %v1895_v32, %v1897_v20  ;;  %v1766_v57 = vadd.f32 %v1759_v7, %v1681_v63  ;;  %v1913_v52 = vmul.f32 %v10554_v0, %v1904_v61  ;;  %v1945_v3 = vmul.f32 %v10555_v22, %v1904_v61  ;;  %4934 = vmatprep.subr.bf16.mxu1 %v10535_v47  ;;  %v3948_v63 = vld [vmem:[%s9982_s5 + $0x650] sm:$0xff] }
 0x284   :  { %v1961_v59 = vmul.f32 %v10556_v51, %v1904_v61  ;;  %v1764_v43 = vadd.f32 %v1757_v23, %v1679_v37  ;;  %v1765_v18 = vadd.f32 %v1758_v41, %v1680_v38  ;;  %4906 = vmatpush3.bf16.msra.mxu0 %v4905_v26  ;;  %v1899_v45 = vsel %vm439_vm6, %v10557_v58, %v1895_v32  ;;  %v3949_v37 = vld [vmem:[%s9982_s5 + $0x658] sm:$0xff]  ;;  %v3964_v38 = vld [vmem:[%s9982_s5 + $0x6d0] sm:$0xff]  ;;  %v1982_v32 = vpop.permute.xlu1 %1981  ;;  %v10562_v58 = vld [vmem:[#allocation126_spill] sm:$0xff] }
 0x285   :  { %v1944_v4 = vmul.f32 %v10555_v22, %v8701_v44  ;;  %v1851_v7 = vadd.f32 %v1844_v19, %v1766_v57  ;;  %v1920_v48 = vadd.f32 %v1913_v52, %v1835_v40  ;;  %v1952_v60 = vadd.f32 %v1945_v3, %v1867_v54  ;;  %v3965_v23 = vld [vmem:[%s9982_s5 + $0x6d8] sm:$0xff]  ;;  %v3932_v54 = vld [vmem:[%s9982_s5 + $0x5d0] sm:$0xff] }
 0x286   :  { %v1968_v35 = vadd.f32 %v1961_v59, %v1883_v15  ;;  %v1849_v41 = vadd.f32 %v1842_v13, %v1764_v43  ;;  %v1850_v21 = vadd.f32 %v1843_v34, %v1765_v18  ;;  %v1929_v28 = vmul.f32 %v10433_v56, %v1904_v61  ;;  %v3933_v15 = vld [vmem:[%s9982_s5 + $0x5d8] sm:$0xff]  ;;  %v1980_v13 = vpop.permute.xlu0 %1979  ;;  %v10561_v43 = vld [vmem:[#allocation51_spill] sm:$0xff] }
 0x287   :  { %v1911_v40 = vmul.f32 %v10554_v0, %v1899_v45  ;;  %v1943_v19 = vmul.f32 %v10555_v22, %v1899_v45  ;;  %v8733_v33 = vadd.f32 %v1944_v4, %v1866_v9  ;;  %v1959_v20 = vmul.f32 %v10556_v51, %v1899_v45  ;;  %v10558_v9 = vld [vmem:[#allocation101_spill] sm:$0xff]  ;;  %v3950_v4 = vld [vmem:[%s9982_s5 + $0x660] sm:$0xff] }
 0x288   :  { %v1960_v34 = vmul.f32 %v10556_v51, %v8701_v44  ;;  %v1927_v5 = vmul.f32 %v10433_v56, %v1899_v45  ;;  %v4907_v26 = vpack.c.bf16 %v3949_v37, %v3948_v63  ;;  %v4935_v50 = vpack.c.bf16 %v3965_v23, %v3964_v38  ;;  %v3951_v63 = vld [vmem:[%s9982_s5 + $0x668] sm:$0xff] }
 0x289   :  { %v1918_v12 = vadd.f32 %v1911_v40, %v1833_v36  ;;  %v1950_v61 = vadd.f32 %v1943_v19, %v1865_v14  ;;  %v1966_v57 = vadd.f32 %v1959_v20, %v1881_v24  ;;  %v4909_v3 = vpack.c.bf16 %v3933_v15, %v3932_v54  ;;  %v10559_v36 = vld [vmem:[#allocation81_spill] sm:$0xff]  ;;  %v3967_v54 = vld [vmem:[%s9982_s5 + $0x6e8] sm:$0xff]  ;;  %v3934_v15 = vld [vmem:[%s9982_s5 + $0x5e0] sm:$0xff] }
 0x28a   :  { %v8739_v52 = vadd.f32 %v1960_v34, %v1882_v25  ;;  %4908 = vmatprep.subr.bf16.mxu0 %v4907_v26  ;;  %4936 = vmatpush3.bf16.msra.mxu1 %v4935_v50  ;;  %v1989_v22 = vsel %vm493_vm7, %v1982_v32, %v10558_v9  ;;  %v8746_v51 = vsel %vm493_vm7, %v1980_v13, %v1982_v32  ;;  %v10560_v24 = vld [vmem:[#allocation53_spill] sm:$0xff]  ;;  %v3952_v34 = vld [vmem:[%s9982_s5 + $0x670] sm:$0xff] }
 0x28b   :  { %v1984_v59 = vsel %vm493_vm7, %v10559_v36, %v1980_v13  ;;  %4910 = vmatpush3.bf16.msra.mxu0 %v4909_v3  ;;  %v1998_v14 = vmul.f32 %v10445_v17, %v1989_v22  ;;  %v2014_v25 = vmul.f32 %v10560_v24, %v1989_v22  ;;  %v2030_v18 = vmul.f32 %v10561_v43, %v1989_v22  ;;  %v3953_v32 = vld [vmem:[%s9982_s5 + $0x678] sm:$0xff]  ;;  %v3968_v13 = vld [vmem:[%s9982_s5 + $0x6f0] sm:$0xff]  ;;  %v2204_v36 = vld [vmem:[%s9982_s5 + $0x180] sm:$0xff] }
 0x28c   :  { %v2046_v45 = vmul.f32 %v10562_v58, %v1989_v22  ;;  %v1936_v37 = vadd.f32 %v1929_v28, %v1851_v7  ;;  %v1928_v38 = vmul.f32 %v10433_v56, %v8701_v44  ;;  %v1996_v23 = vmul.f32 %v10445_v17, %v1984_v59  ;;  %4937 = vmatprep.subr.bf16.mxu1 %v10535_v47  ;;  %v3935_v7 = vld [vmem:[%s9982_s5 + $0x5e8] sm:$0xff]  ;;  %v3937_v50 = vld [vmem:[%s9982_s5 + $0x5f8] sm:$0xff] }
 0x28d   :  { %v2012_v40 = vmul.f32 %v10560_v24, %v1984_v59  ;;  %v1934_v28 = vadd.f32 %v1927_v5, %v1849_v41  ;;  %v8780_v56 = vadd.f32 %v1998_v14, %v1920_v48  ;;  %v8782_v19 = vadd.f32 %v2030_v18, %v1952_v60  ;;  %v3936_v5 = vld [vmem:[%s9982_s5 + $0x5f0] sm:$0xff]  ;;  %v2205_v14 = vld [vmem:[%s9982_s5 + $0x188] sm:$0xff] }
 0x28e   :  { %v8784_v20 = vadd.f32 %v2046_v45, %v1968_v35  ;;  %v2021_v26 = vadd.f32 %v2014_v25, %v1936_v37  ;;  %v8795_v41 = vadd.f32 %v1996_v23, %v1918_v12  ;;  %v2013_v48 = vmul.f32 %v10560_v24, %v8746_v51  ;;  %v3969_v35 = vld [vmem:[%s9982_s5 + $0x6f8] sm:$0xff]  ;;  %v2172_v37 = vld [vmem:[%s9982_s5 + $0x80] sm:$0xff] }
 0x28f   :  { %v2028_v60 = vmul.f32 %v10561_v43, %v1984_v59  ;;  %v2019_v3 = vadd.f32 %v2012_v40, %v1934_v28  ;;  %v2044_v12 = vmul.f32 %v10562_v58, %v1984_v59  ;;  %v4911_v9 = vpack.c.bf16 %v3951_v63, %v3950_v4  ;;  %v2173_v59 = vld [vmem:[%s9982_s5 + $0x88] sm:$0xff]  ;;  %v2188_v23 = vld [vmem:[%s9982_s5 + $0x100] sm:$0xff]  ;;  %v10563_v28 = vld [vmem:[#allocation64_spill] sm:$0xff] }
 0x290   :  { %v4938_v22 = vpack.c.bf16 %v3967_v54, %v3966_v8  ;;  %v1935_v24 = vadd.f32 %v1928_v38, %v1850_v21  ;;  %v4913_v18 = vpack.c.bf16 %v3935_v7, %v3934_v15  ;;  %v4915_v45 = vpack.c.bf16 %v3953_v32, %v3952_v34  ;;  %v2156_v15 = vld [vmem:[%s9982_s5] sm:$0xff]  ;;  %v2157_v7 = vld [vmem:[%s9982_s5 + $0x8] sm:$0xff] }
 0x291   :  { %v8816_v25 = vadd.f32 %v2028_v60, %v1950_v61  ;;  %v8824_v4 = vadd.f32 %v2044_v12, %v1966_v57  ;;  %4912 = vmatprep.subr.bf16.mxu0 %v4911_v9  ;;  %v4941_v63 = vpack.c.bf16 %v3969_v35, %v3968_v13  ;;  %v4917_v8 = vpack.c.bf16 %v3937_v50, %v3936_v5  ;;  %v2189_v57 = vld [vmem:[%s9982_s5 + $0x108] sm:$0xff]  ;;  %v10564_v60 = vld [vmem:[#allocation112_spill] sm:$0xff]  ;;  %v2207_v50 = vld [vmem:[%s9982_s5 + $0x198] sm:$0xff] }
 0x292   :  { %4939 = vmatpush3.bf16.msra.mxu1 %v4938_v22  ;;  %4914 = vmatpush3.bf16.msra.mxu0 %v4913_v18  ;;  %v4975_v21 = vpack.c.bf16 %v2205_v14, %v2204_v36  ;;  %v2020_v61 = vadd.f32 %v2013_v48, %v1935_v24  ;;  %v2078_v38 = vadd.f32 %v7710_v30, %v2021_v26  ;;  %v8844_v32 = vstv %s8764_s29  ;;  %v2206_v5 = vld [vmem:[%s9982_s5 + $0x190] sm:$0xff]  ;;  %v2159_v18 = vld [vmem:[%s9982_s5 + $0x18] sm:$0xff] }
 0x293   :  { %4940 = vmatprep.subr.bf16.mxu1 %v10535_v47  ;;  %4916 = vmatprep.subr.bf16.mxu0 %v4915_v45  ;;  %v4943_v40 = vpack.c.bf16 %v2173_v59, %v2172_v37  ;;  %v2076_v54 = vadd.f32 %v7710_v30, %v2019_v3  ;;  %v2002_v34 = vadd.f32 %v8474_v46, %v10563_v28  ;;  %v2158_v36 = vld [vmem:[%s9982_s5 + $0x10] sm:$0xff]  ;;  %v2208_v45 = vld [vmem:[%s9982_s5 + $0x1a0] sm:$0xff]  ;;  %v2209_v37 = vld [vmem:[%s9982_s5 + $0x1a8] sm:$0xff] }
 0x294   :  { %v1083_v13 = vadd.f32 %v8493_v6, %v8476_v11  ;;  %v2077_v26 = vadd.f32 %v7710_v30, %v2020_v61  ;;  %v2085_v48 = vmax.f32 %v2078_v38, 0.0  ;;  %v2000_v35 = vadd.f32 %v8470_v10, %v10564_v60  ;;  %v2174_v10 = vld [vmem:[%s9982_s5 + $0x90] sm:$0xff]  ;;  %v2175_v6 = vld [vmem:[%s9982_s5 + $0x98] sm:$0xff] }
 0x295   :  { %v1246_v46 = vmul.f32 %v10510_v1, %v8365_v39  ;;  %v4977_v3 = vpack.c.bf16 %v2189_v57, %v2188_v23  ;;  %v2083_v11 = vmax.f32 %v2076_v54, 0.0  ;;  %v2059_v30 = vadd.f32 %v8844_v32, %v2002_v34  ;;  %v2190_v39 = vld [vmem:[%s9982_s5 + $0x110] sm:$0xff]  ;;  %v2191_v1 = vld [vmem:[%s9982_s5 + $0x118] sm:$0xff]  ;;  %v2193_v54 = vld [vmem:[%s9982_s5 + $0x128] sm:$0xff] }
 0x296   :  { %4942 = vmatpush3.bf16.msra.mxu1 %v4941_v63  ;;  %4918 = vmatpush3.bf16.msra.mxu0 %v4917_v8  ;;  %v2084_v12 = vmax.f32 %v2077_v26, 0.0  ;;  %v4945_v9 = vpack.c.bf16 %v2157_v7, %v2156_v15  ;;  %v2057_v22 = vadd.f32 %v8844_v32, %v2000_v35  ;;  %v1168_v14 = vadd.f32 %v8507_v62, %v1083_v13  ;;  %v2176_v62 = vld [vmem:[%s9982_s5 + $0xa0] sm:$0xff]  ;;  %v2177_v8 = vld [vmem:[%s9982_s5 + $0xa8] sm:$0xff]  ;;  %v2210_v26 = vld [vmem:[%s9982_s5 + $0x1b0] sm:$0xff] }
 0x297   :  { %4976 = vmatprep.subr.bf16.mxu1 %v4975_v21  ;;  %4944 = vmatprep.subr.bf16.mxu0 %v4943_v40  ;;  %v4979_v24 = vpack.c.bf16 %v2207_v50, %v2206_v5  ;;  %v2066_v59 = vmax.f32 %v2059_v30, 0.0  ;;  %v4947_v63 = vpack.c.bf16 %v2175_v6, %v2174_v10  ;;  %v4981_v38 = vpack.c.bf16 %v2191_v1, %v2190_v39  ;;  %v2192_v40 = vld [vmem:[%s9982_s5 + $0x120] sm:$0xff]  ;;  %v10565_v7 = vld [vmem:[#allocation15_spill] sm:$0xff]  ;;  %v2179_v60 = vld [vmem:[%s9982_s5 + $0xb8] sm:$0xff] }
 0x298   :  { %2592 = vmatprep.mubr.f32.mxu0 %v2084_v12  ;;  %v1253_v21 = vadd.f32 %v1246_v46, %v1168_v14  ;;  %v2064_v61 = vmax.f32 %v2057_v22, 0.0  ;;  %v4949_v23 = vpack.c.bf16 %v2159_v18, %v2158_v36  ;;  %v4983_v57 = vpack.c.bf16 %v2209_v37, %v2208_v45  ;;  %v2160_v15 = vld [vmem:[%s9982_s5 + $0x20] sm:$0xff]  ;;  %v2161_v13 = vld [vmem:[%s9982_s5 + $0x28] sm:$0xff]  ;;  %v2195_v30 = vld [vmem:[%s9982_s5 + $0x138] sm:$0xff] }
 0x299   :  { %4716 = vmatmul.mubr.f32.vlgmr.msra.gmra.mrb[2].mxu1 %v2085_v48  ;;  %2593 = vmatmul.mubr.f32.vlgmr.msra.gmra.mrb[2].mxu0 %v2083_v11  ;;  %v1317_v28 = vmul.f32 %v10565_v7, %v10508_v16  ;;  %v4951_v34 = vpack.c.bf16 %v2177_v8, %v2176_v62  ;;  %v2211_v48 = vld [vmem:[%s9982_s5 + $0x1b8] sm:$0xff]  ;;  %v2178_v16 = vld [vmem:[%s9982_s5 + $0xb0] sm:$0xff]  ;;  %v1402_v5 = vmul.f32 %v10519_v27, %v8419_v42  ;;  %v10566_v27 = vld [vmem:[#allocation91_spill] sm:$0xff] }
 0x29a   :  { %4978 = vmatpush3.bf16.msra.mxu1 %v4977_v3  ;;  %4946 = vmatpush3.bf16.msra.mxu0 %v4945_v9  ;;  %v4985_v50 = vpack.c.bf16 %v2193_v54, %v2192_v40  ;;  %v4953_v46 = vpack.c.bf16 %v2161_v13, %v2160_v15  ;;  %v4987_v3 = vpack.c.bf16 %v2211_v48, %v2210_v26  ;;  %v2194_v11 = vld [vmem:[%s9982_s5 + $0x130] sm:$0xff]  ;;  %v2163_v12 = vld [vmem:[%s9982_s5 + $0x38] sm:$0xff]  ;;  %v2212_v9 = vld [vmem:[%s9982_s5 + $0x1c0] sm:$0xff] }
 0x29b   :  { %2802 = vmatprep.mubr.f32.mxu1 %v2066_v59  ;;  %2732 = vmatprep.mubr.f32.mxu0 %v2064_v61  ;;  %v1324_v35 = vadd.f32 %v1317_v28, %v1253_v21  ;;  %v2162_v10 = vld [vmem:[%s9982_s5 + $0x30] sm:$0xff]  ;;  %v1487_v42 = vmul.f32 %v10566_v27, %v8443_v53  ;;  %v4955_v6 = vpack.c.bf16 %v2179_v60, %v2178_v16  ;;  %v2213_v22 = vld [vmem:[%s9982_s5 + $0x1c8] sm:$0xff]  ;;  %v2180_v39 = vld [vmem:[%s9982_s5 + $0xc0] sm:$0xff] }
 0x29c   :  { %4980 = vmatprep.subr.bf16.mxu1 %v4979_v24  ;;  %4948 = vmatprep.subr.bf16.mxu0 %v4947_v63  ;;  %v2181_v53 = vld [vmem:[%s9982_s5 + $0xc8] sm:$0xff]  ;;  %v4989_v24 = vpack.c.bf16 %v2195_v30, %v2194_v11  ;;  %v4957_v18 = vpack.c.bf16 %v2163_v12, %v2162_v10  ;;  %v4991_v45 = vpack.c.bf16 %v2213_v22, %v2212_v9  ;;  %v2196_v37 = vld [vmem:[%s9982_s5 + $0x140] sm:$0xff]  ;;  %v10569_v21 = vld [vmem:[#allocation100_spill] sm:$0xff] }
 0x29d   :  { %v1409_v1 = vadd.f32 %v1402_v5, %v1324_v35  ;;  %v10567_v36 = vld [vmem:[#allocation95_spill] sm:$0xff]  ;;  %v2164_v63 = vld [vmem:[%s9982_s5 + $0x40] sm:$0xff]  ;;  %v1657_v61 = vmul.f32 %v10569_v21, %v8564_v49  ;;  %v2215_v40 = vld [vmem:[%s9982_s5 + $0x1d8] sm:$0xff]  ;;  %v1827_v27 = vmul.f32 %v10549_v2, %v8657_v55 }
 0x29e   :  { %4982 = vmatpush3.bf16.msra.mxu1 %v4981_v38  ;;  %4950 = vmatpush3.bf16.msra.mxu0 %v4949_v23  ;;  %v1572_v14 = vmul.f32 %v10567_v36, %v8519_v31  ;;  %v2197_v59 = vld [vmem:[%s9982_s5 + $0x148] sm:$0xff]  ;;  %v4959_v38 = vpack.c.bf16 %v2181_v53, %v2180_v39  ;;  %v10570_v54 = vld [vmem:[#allocation16_spill] sm:$0xff]  ;;  %v2183_v7 = vld [vmem:[%s9982_s5 + $0xd8] sm:$0xff]  ;;  %v1912_v53 = vmul.f32 %v10554_v0, %v8701_v44 }
 0x29f   :  { %4984 = vmatprep.subr.bf16.mxu1 %v4983_v57  ;;  %4952 = vmatprep.subr.bf16.mxu0 %v4951_v34  ;;  %v10568_v62 = vld [vmem:[#allocation67_spill] sm:$0xff]  ;;  %v1494_v8 = vadd.f32 %v1487_v42, %v1409_v1  ;;  %v2214_v57 = vld [vmem:[%s9982_s5 + $0x1d0] sm:$0xff]  ;;  %v2025_v15 = vmul.f32 %v10561_v43, %v10570_v54  ;;  %v10571_v34 = vld [vmem:[#allocation98_spill] sm:$0xff]  ;;  %v4993_v26 = vpack.c.bf16 %v2197_v59, %v2196_v37 }
 0x2a0   :  { %v2027_v31 = vmul.f32 %v10561_v43, %v10568_v62  ;;  %v2165_v23 = vld [vmem:[%s9982_s5 + $0x48] sm:$0xff]  ;;  %v2182_v49 = vld [vmem:[%s9982_s5 + $0xd0] sm:$0xff]  ;;  %v1742_v13 = vmul.f32 %v10571_v34, %v8621_v29  ;;  %v4995_v16 = vpack.c.bf16 %v2215_v40, %v2214_v57  ;;  %v2199_v35 = vld [vmem:[%s9982_s5 + $0x158] sm:$0xff]  ;;  %v1997_v37 = vmul.f32 %v10445_v17, %v8746_v51 }
 0x2a1   :  { %v1579_v28 = vadd.f32 %v1572_v14, %v1494_v8  ;;  %v4961_v48 = vpack.c.bf16 %v2165_v23, %v2164_v63  ;;  %v2198_v60 = vld [vmem:[%s9982_s5 + $0x150] sm:$0xff]  ;;  %v4963_v29 = vpack.c.bf16 %v2183_v7, %v2182_v49  ;;  %v2217_v11 = vld [vmem:[%s9982_s5 + $0x1e8] sm:$0xff]  ;;  %v10572_v30 = vld [vmem:[#allocation65_spill] sm:$0xff]  ;;  %v2029_v23 = vmul.f32 %v10561_v43, %v8746_v51 }
 0x2a2   :  { %4986 = vmatpush3.bf16.msra.mxu1 %v4985_v50  ;;  %4954 = vmatpush3.bf16.msra.mxu0 %v4953_v46  ;;  %v2166_v5 = vld [vmem:[%s9982_s5 + $0x50] sm:$0xff]  ;;  %v2167_v46 = vld [vmem:[%s9982_s5 + $0x58] sm:$0xff]  ;;  %v8999_v10 = vadd.f32 %v2027_v31, %v10572_v30  ;;  %v2184_v42 = vld [vmem:[%s9982_s5 + $0xe0] sm:$0xff]  ;;  %v4997_v39 = vpack.c.bf16 %v2199_v35, %v2198_v60 }
 0x2a3   :  { %4988 = vmatprep.subr.bf16.mxu1 %v4987_v3  ;;  %4956 = vmatprep.subr.bf16.mxu0 %v4955_v6  ;;  %v1664_v50 = vadd.f32 %v1657_v61, %v1579_v28  ;;  %v2216_v3 = vld [vmem:[%s9982_s5 + $0x1e0] sm:$0xff]  ;;  %v2185_v6 = vld [vmem:[%s9982_s5 + $0xe8] sm:$0xff]  ;;  %v4965_v2 = vpack.c.bf16 %v2167_v46, %v2166_v5  ;;  %v2218_v0 = vld [vmem:[%s9982_s5 + $0x1f0] sm:$0xff]  ;;  %v9077_v46 = vadd.f32 %v2029_v23, %v8733_v33 }
 0x2a4   :  { %v10573_v12 = vld [vmem:[#allocation127_spill] sm:$0xff]  ;;  %v4999_v55 = vpack.c.bf16 %v2217_v11, %v2216_v3  ;;  %v2200_v1 = vld [vmem:[%s9982_s5 + $0x160] sm:$0xff]  ;;  %v2186_v59 = vld [vmem:[%s9982_s5 + $0xf0] sm:$0xff] }
 0x2a5   :  { %v9010_v9 = vadd.f32 %v2025_v15, %v10573_v12  ;;  %v1749_v22 = vadd.f32 %v1742_v13, %v1664_v50  ;;  %v2201_v36 = vld [vmem:[%s9982_s5 + $0x168] sm:$0xff]  ;;  %v2168_v14 = vld [vmem:[%s9982_s5 + $0x60] sm:$0xff]  ;;  %v2187_v63 = vld [vmem:[%s9982_s5 + $0xf8] sm:$0xff] }
 0x2a6   :  { %4990 = vmatpush3.bf16.msra.mxu1 %v4989_v24  ;;  %4958 = vmatpush3.bf16.msra.mxu0 %v4957_v18  ;;  %v4967_v24 = vpack.c.bf16 %v2185_v6, %v2184_v42  ;;  %v2169_v44 = vld [vmem:[%s9982_s5 + $0x68] sm:$0xff]  ;;  %v2219_v18 = vld [vmem:[%s9982_s5 + $0x1f8] sm:$0xff]  ;;  %v5001_v31 = vpack.c.bf16 %v2201_v36, %v2200_v1  ;;  %v4971_v57 = vpack.c.bf16 %v2187_v63, %v2186_v59  ;;  %v2170_v40 = vld [vmem:[%s9982_s5 + $0x70] sm:$0xff] }
 0x2a7   :  { %4992 = vmatprep.subr.bf16.mxu1 %v4991_v45  ;;  %4960 = vmatprep.subr.bf16.mxu0 %v4959_v38  ;;  %v1834_v45 = vadd.f32 %v1827_v27, %v1749_v22  ;;  %v4969_v21 = vpack.c.bf16 %v2169_v44, %v2168_v14  ;;  %v5003_v61 = vpack.c.bf16 %v2219_v18, %v2218_v0  ;;  %v2202_v38 = vld [vmem:[%s9982_s5 + $0x170] sm:$0xff]  ;;  %v2203_v17 = vld [vmem:[%s9982_s5 + $0x178] sm:$0xff]  ;;  %v2236_v49 = vld [vmem:[%s9982_s5 + $0x280] sm:$0xff] }
 0x2a8   :  { %v2171_v15 = vld [vmem:[%s9982_s5 + $0x78] sm:$0xff]  ;;  %v2237_v7 = vld [vmem:[%s9982_s5 + $0x288] sm:$0xff]  ;;  %v5005_v43 = vpack.c.bf16 %v2203_v17, %v2202_v38  ;;  %v10574_v13 = vld [vmem:[#allocation68_spill] sm:$0xff]  ;;  %v2043_v22 = vmul.f32 %v10562_v58, %v10568_v62  ;;  %v2041_v1 = vmul.f32 %v10562_v58, %v10570_v54 }
 0x2a9   :  { %v1919_v8 = vadd.f32 %v1912_v53, %v1834_v45  ;;  %v4973_v34 = vpack.c.bf16 %v2171_v15, %v2170_v40  ;;  %v10575_v60 = vld [vmem:[#allocation18_spill] sm:$0xff]  ;;  %v5007_v5 = vpack.c.bf16 %v2237_v7, %v2236_v49  ;;  %v2238_v11 = vld [vmem:[%s9982_s5 + $0x290] sm:$0xff]  ;;  %v2239_v30 = vld [vmem:[%s9982_s5 + $0x298] sm:$0xff] }
 0x2aa   :  { %4994 = vmatpush3.bf16.msra.mxu1 %v4993_v26  ;;  %4962 = vmatpush3.bf16.msra.mxu0 %v4961_v48  ;;  %v2058_v26 = vadd.f32 %v8844_v32, %v10574_v13  ;;  %v2252_v48 = vld [vmem:[%s9982_s5 + $0x300] sm:$0xff]  ;;  %v2056_v35 = vadd.f32 %v8844_v32, %v10575_v60  ;;  %v2254_v33 = vld [vmem:[%s9982_s5 + $0x310] sm:$0xff]  ;;  %v2255_v12 = vld [vmem:[%s9982_s5 + $0x318] sm:$0xff]  ;;  %v5011_v53 = vpack.c.bf16 %v2239_v30, %v2238_v11 }
 0x2ab   :  { %4996 = vmatprep.subr.bf16.mxu1 %v4995_v16  ;;  %4964 = vmatprep.subr.bf16.mxu0 %v4963_v29  ;;  %v2004_v28 = vadd.f32 %v1997_v37, %v1919_v8  ;;  %v2253_v16 = vld [vmem:[%s9982_s5 + $0x308] sm:$0xff]  ;;  %v2220_v50 = vld [vmem:[%s9982_s5 + $0x200] sm:$0xff]  ;;  %v10576_v59 = vld [vmem:[#allocation49_spill] sm:$0xff] }
 0x2ac   :  { %v2221_v29 = vld [vmem:[%s9982_s5 + $0x208] sm:$0xff]  ;;  %v5040_v27 = vpack.c.bf16 %v2253_v16, %v2252_v48  ;;  %v2065_v42 = vmax.f32 %v2058_v26, 0.0  ;;  %v2240_v62 = vld [vmem:[%s9982_s5 + $0x2a0] sm:$0xff]  ;;  %v9123_v63 = vadd.f32 %v2043_v22, %v10576_v59  ;;  %v2243_v8 = vld [vmem:[%s9982_s5 + $0x2b8] sm:$0xff]  ;;  %v2045_v16 = vmul.f32 %v10562_v58, %v8746_v51 }
 0x2ad   :  { %v2061_v3 = vadd.f32 %v8844_v32, %v2004_v28  ;;  %v5009_v6 = vpack.c.bf16 %v2221_v29, %v2220_v50  ;;  %v2241_v14 = vld [vmem:[%s9982_s5 + $0x2a8] sm:$0xff]  ;;  %v2256_v54 = vld [vmem:[%s9982_s5 + $0x320] sm:$0xff]  ;;  %v2259_v40 = vld [vmem:[%s9982_s5 + $0x338] sm:$0xff] }
 0x2ae   :  { %4998 = vmatpush3.bf16.msra.mxu1 %v4997_v39  ;;  %4966 = vmatpush3.bf16.msra.mxu0 %v4965_v2  ;;  %v2063_v39 = vmax.f32 %v2056_v35, 0.0  ;;  %v2222_v2 = vld [vmem:[%s9982_s5 + $0x210] sm:$0xff]  ;;  %v2257_v0 = vld [vmem:[%s9982_s5 + $0x328] sm:$0xff]  ;;  %v5015_v18 = vpack.c.bf16 %v2241_v14, %v2240_v62  ;;  %v2224_v45 = vld [vmem:[%s9982_s5 + $0x220] sm:$0xff] }
 0x2af   :  { %5000 = vmatprep.subr.bf16.mxu1 %v4999_v55  ;;  %4968 = vmatprep.subr.bf16.mxu0 %v4967_v24  ;;  %v2223_v55 = vld [vmem:[%s9982_s5 + $0x218] sm:$0xff]  ;;  %v2068_v36 = vmax.f32 %v2061_v3, 0.0  ;;  %v5043_v24 = vpack.c.bf16 %v2255_v12, %v2254_v33  ;;  %v2225_v37 = vld [vmem:[%s9982_s5 + $0x228] sm:$0xff]  ;;  %v5046_v17 = vpack.c.bf16 %v2257_v0, %v2256_v54  ;;  %v2226_v49 = vld [vmem:[%s9982_s5 + $0x230] sm:$0xff] }
 0x2b0   :  { %v5013_v44 = vpack.c.bf16 %v2223_v55, %v2222_v2  ;;  %v5017_v23 = vpack.c.bf16 %v2225_v37, %v2224_v45  ;;  %v2227_v7 = vld [vmem:[%s9982_s5 + $0x238] sm:$0xff]  ;;  %v2244_v28 = vld [vmem:[%s9982_s5 + $0x2c0] sm:$0xff]  ;;  %v2261_v48 = vld [vmem:[%s9982_s5 + $0x348] sm:$0xff] }
 0x2b1   :  { %v5021_v13 = vpack.c.bf16 %v2227_v7, %v2226_v49  ;;  %v2260_v26 = vld [vmem:[%s9982_s5 + $0x340] sm:$0xff]  ;;  %v2246_v50 = vld [vmem:[%s9982_s5 + $0x2d0] sm:$0xff]  ;;  %v2247_v29 = vld [vmem:[%s9982_s5 + $0x2d8] sm:$0xff]  ;;  %v9254_v49 = vstv %s9205_s13  ;;  %v2060_v7 = vadd.f32 %v8844_v32, %v8795_v41 }
 0x2b2   :  { %5002 = vmatpush3.bf16.msra.mxu1 %v5001_v31  ;;  %4970 = vmatpush3.bf16.msra.mxu0 %v4969_v21  ;;  %v2242_v31 = vld [vmem:[%s9982_s5 + $0x2b0] sm:$0xff]  ;;  %v10577_v21 = vmov 0.0   ;;  %v2228_v35 = vld [vmem:[%s9982_s5 + $0x240] sm:$0xff]  ;;  %v5052_v51 = vpack.c.bf16 %v2261_v48, %v2260_v26  ;;  %v2263_v11 = vld [vmem:[%s9982_s5 + $0x358] sm:$0xff]  ;;  %v5027_v30 = vpack.c.bf16 %v2247_v29, %v2246_v50  ;;  %v2089_v26 = vadd.f32 %v9254_v49, %v9010_v9 }
 0x2b3   :  { %5004 = vmatprep.subr.bf16.mxu1 %v5003_v61  ;;  %4972 = vmatprep.subr.bf16.mxu0 %v4971_v57  ;;  %v10578_v61 = vld [vmem:[#allocation128_spill] sm:$0xff]  ;;  %v5019_v15 = vpack.c.bf16 %v2243_v8, %v2242_v31  ;;  %v2248_v33 = vld [vmem:[%s9982_s5 + $0x2e0] sm:$0xff]  ;;  %v2249_v12 = vld [vmem:[%s9982_s5 + $0x2e8] sm:$0xff]  ;;  %v2067_v50 = vmax.f32 %v2060_v7, 0.0 }
 0x2b4   :  { %v9134_v38 = vadd.f32 %v2041_v1, %v10578_v61  ;;  %v2258_v57 = vld [vmem:[%s9982_s5 + $0x330] sm:$0xff]  ;;  %v5031_v2 = vpack.c.bf16 %v2249_v12, %v2248_v33  ;;  %v2232_v55 = vld [vmem:[%s9982_s5 + $0x260] sm:$0xff]  ;;  %v2233_v1 = vld [vmem:[%s9982_s5 + $0x268] sm:$0xff]  ;;  %v2096_v33 = vmax.f32 %v2089_v26, 0.0 }
 0x2b5   :  { %v2262_v3 = vld [vmem:[%s9982_s5 + $0x350] sm:$0xff]  ;;  %v2251_v62 = vld [vmem:[%s9982_s5 + $0x2f8] sm:$0xff]  ;;  %v4018_v37 = vld [vmem:[%s9982_s5 + $0x880] sm:$0xff] }
 0x2b6   :  { %5006 = vmatpush3.bf16.msra.mxu1 %v5005_v43  ;;  %4974 = vmatpush3.bf16.msra.mxu0 %v4973_v34  ;;  %v2245_v43 = vld [vmem:[%s9982_s5 + $0x2c8] sm:$0xff]  ;;  %v5049_v34 = vpack.c.bf16 %v2259_v40, %v2258_v57  ;;  %v5055_v22 = vpack.c.bf16 %v2263_v11, %v2262_v3  ;;  %v2267_v54 = vld [vmem:[%s9982_s5 + $0x378] sm:$0xff]  ;;  %v2234_v0 = vld [vmem:[%s9982_s5 + $0x270] sm:$0xff] }
 0x2b7   :  { %5039 = vmatprep.subr.bf16.mxu1 %v10535_v47  ;;  %5008 = vmatprep.subr.bf16.mxu0 %v5007_v5  ;;  %v5023_v60 = vpack.c.bf16 %v2245_v43, %v2244_v28  ;;  %v2229_v5 = vld [vmem:[%s9982_s5 + $0x248] sm:$0xff]  ;;  %v2235_v45 = vld [vmem:[%s9982_s5 + $0x278] sm:$0xff]  ;;  %v3986_v31 = vld [vmem:[%s9982_s5 + $0x780] sm:$0xff] }
 0x2b8   :  { %v5025_v58 = vpack.c.bf16 %v2229_v5, %v2228_v35  ;;  %v4019_v59 = vld [vmem:[%s9982_s5 + $0x888] sm:$0xff]  ;;  %v4002_v40 = vld [vmem:[%s9982_s5 + $0x800] sm:$0xff]  ;;  %v4021_v41 = vld [vmem:[%s9982_s5 + $0x898] sm:$0xff] }
 0x2b9   :  { %2803 = vmatmul.mubr.f32.vlgmr.msra.gmra.mrb[4].mxu1 %v2065_v42  ;;  %2733 = vmatmul.mubr.f32.vlgmr.msra.gmra.mrb[4].mxu0 %v2063_v39  ;;  %v2231_v42 = vld [vmem:[%s9982_s5 + $0x258] sm:$0xff]  ;;  %v3987_v8 = vld [vmem:[%s9982_s5 + $0x788] sm:$0xff]  ;;  %v5095_v57 = vpack.c.bf16 %v4019_v59, %v4018_v37  ;;  %v3988_v48 = vld [vmem:[%s9982_s5 + $0x790] sm:$0xff] }
 0x2ba   :  { %5041 = vmatpush3.bf16.msra.mxu1 %v5040_v27  ;;  %5010 = vmatpush3.bf16.msra.mxu0 %v5009_v6  ;;  %v2230_v27 = vld [vmem:[%s9982_s5 + $0x250] sm:$0xff]  ;;  %v9190_v6 = vadd.f32 %v2045_v16, %v8739_v52  ;;  %v2265_v52 = vld [vmem:[%s9982_s5 + $0x368] sm:$0xff]  ;;  %v5063_v28 = vpack.c.bf16 %v3987_v8, %v3986_v31  ;;  %v4005_v9 = vld [vmem:[%s9982_s5 + $0x818] sm:$0xff] }
 0x2bb   :  { %2872 = vmatprep.mubr.f32.mxu0 %v2068_v36  ;;  %5042 = vmatprep.subr.bf16.mxu1 %v10535_v47  ;;  %v5029_v39 = vpack.c.bf16 %v2231_v42, %v2230_v27  ;;  %v2250_v36 = vld [vmem:[%s9982_s5 + $0x2f0] sm:$0xff]  ;;  %v3971_v43 = vld [vmem:[%s9982_s5 + $0x708] sm:$0xff]  ;;  %v3990_v27 = vld [vmem:[%s9982_s5 + $0x7a0] sm:$0xff] }
 0x2bc   :  { %5012 = vmatprep.subr.bf16.mxu0 %v5011_v53  ;;  %4750 = vmatprep.mubr.msk.f32.mxu1 %vm5385_vm8, %v10577_v21  ;;  %v2264_v53 = vld [vmem:[%s9982_s5 + $0x360] sm:$0xff]  ;;  %v4004_v35 = vld [vmem:[%s9982_s5 + $0x810] sm:$0xff]  ;;  %v4023_v3 = vld [vmem:[%s9982_s5 + $0x8a8] sm:$0xff] }
 0x2bd   :  { %v5058_v14 = vpack.c.bf16 %v2265_v52, %v2264_v53  ;;  %v3972_v5 = vld [vmem:[%s9982_s5 + $0x710] sm:$0xff]  ;;  %v3991_v42 = vld [vmem:[%s9982_s5 + $0x7a8] sm:$0xff]  ;;  %v5101_v12 = vpack.c.bf16 %v4005_v9, %v4004_v35  ;;  %v4006_v53 = vld [vmem:[%s9982_s5 + $0x820] sm:$0xff] }
 0x2be   :  { %5044 = vmatpush3.bf16.msra.mxu1 %v5043_v24  ;;  %5014 = vmatpush3.bf16.msra.mxu0 %v5013_v44  ;;  %v5033_v24 = vpack.c.bf16 %v2233_v1, %v2232_v55  ;;  %v2266_v44 = vld [vmem:[%s9982_s5 + $0x370] sm:$0xff]  ;;  %v4007_v52 = vld [vmem:[%s9982_s5 + $0x828] sm:$0xff]  ;;  %v5071_v55 = vpack.c.bf16 %v3991_v42, %v3990_v27  ;;  %v3977_v31 = vld [vmem:[%s9982_s5 + $0x738] sm:$0xff] }
 0x2bf   :  { %5045 = vmatprep.subr.bf16.mxu1 %v10535_v47  ;;  %5016 = vmatprep.subr.bf16.mxu0 %v5015_v18  ;;  %v5035_v18 = vpack.c.bf16 %v2251_v62, %v2250_v36  ;;  %v5061_v61 = vpack.c.bf16 %v2267_v54, %v2266_v44  ;;  %v3975_v1 = vld [vmem:[%s9982_s5 + $0x728] sm:$0xff]  ;;  %v4024_v36 = vld [vmem:[%s9982_s5 + $0x8b0] sm:$0xff]  ;;  %v4025_v62 = vld [vmem:[%s9982_s5 + $0x8b8] sm:$0xff]  ;;  %v5105_v44 = vpack.c.bf16 %v4007_v52, %v4006_v53 }
 0x2c0   :  { %v3976_v37 = vld [vmem:[%s9982_s5 + $0x730] sm:$0xff]  ;;  %v4026_v8 = vld [vmem:[%s9982_s5 + $0x8c0] sm:$0xff]  ;;  %v3997_v26 = vld [vmem:[%s9982_s5 + $0x7d8] sm:$0xff] }
 0x2c1   :  { %v4010_v7 = vld [vmem:[%s9982_s5 + $0x840] sm:$0xff]  ;;  %v4013_v35 = vld [vmem:[%s9982_s5 + $0x858] sm:$0xff]  ;;  %v3980_v9 = vld [vmem:[%s9982_s5 + $0x750] sm:$0xff] }
 0x2c2   :  { %5047 = vmatpush3.bf16.msra.mxu1 %v5046_v17  ;;  %5018 = vmatpush3.bf16.msra.mxu0 %v5017_v23  ;;  %v5037_v17 = vpack.c.bf16 %v2235_v45, %v2234_v0  ;;  %v2062_v23 = vadd.f32 %v8844_v32, %v8780_v56  ;;  %v3970_v56 = vld [vmem:[%s9982_s5 + $0x700] sm:$0xff]  ;;  %v5107_v0 = vpack.c.bf16 %v4025_v62, %v4024_v36  ;;  %v4009_v45 = vld [vmem:[%s9982_s5 + $0x838] sm:$0xff]  ;;  %v4032_v53 = vld [vmem:[%s9982_s5 + $0x8f0] sm:$0xff] }
 0x2c3   :  { %5048 = vmatprep.subr.bf16.mxu1 %v10535_v47  ;;  %5020 = vmatprep.subr.bf16.mxu0 %v5019_v15  ;;  %v4003_v15 = vld [vmem:[%s9982_s5 + $0x808] sm:$0xff]  ;;  %v4014_v42 = vld [vmem:[%s9982_s5 + $0x860] sm:$0xff]  ;;  %v4033_v52 = vld [vmem:[%s9982_s5 + $0x8f8] sm:$0xff] }
 0x2c4   :  { %v5097_v32 = vpack.c.bf16 %v4003_v15, %v4002_v40  ;;  %v2069_v16 = vmax.f32 %v2062_v23, 0.0  ;;  %v3995_v23 = vld [vmem:[%s9982_s5 + $0x7c8] sm:$0xff]  ;;  %v5077_v40 = vpack.c.bf16 %v3977_v31, %v3976_v37  ;;  %v5123_v62 = vpack.c.bf16 %v4033_v52, %v4032_v53  ;;  %v10579_v31 = vld [vmem:[#allocation69_spill] sm:$0xff]  ;;  %v4072_v53 = vld [vmem:[%s9982_s5 + $0xa30] sm:$0xff] }
 0x2c5   :  { %v4073_v52 = vld [vmem:[%s9982_s5 + $0xa38] sm:$0xff] }
 0x2c6   :  { %5050 = vmatpush3.bf16.msra.mxu1 %v5049_v34  ;;  %5022 = vmatpush3.bf16.msra.mxu0 %v5021_v13  ;;  %v2091_v34 = vadd.f32 %v9254_v49, %v8999_v10  ;;  %v4020_v13 = vld [vmem:[%s9982_s5 + $0x890] sm:$0xff]  ;;  %v3989_v10 = vld [vmem:[%s9982_s5 + $0x798] sm:$0xff] }
 0x2c7   :  { %5051 = vmatprep.subr.bf16.mxu1 %v10535_v47  ;;  %5024 = vmatprep.subr.bf16.mxu0 %v5023_v60  ;;  %v5065_v60 = vpack.c.bf16 %v3971_v43, %v3970_v56  ;;  %v5099_v29 = vpack.c.bf16 %v4021_v41, %v4020_v13  ;;  %v3978_v56 = vld [vmem:[%s9982_s5 + $0x740] sm:$0xff]  ;;  %v4028_v13 = vld [vmem:[%s9982_s5 + $0x8d0] sm:$0xff]  ;;  %v4029_v41 = vld [vmem:[%s9982_s5 + $0x8d8] sm:$0xff] }
 0x2c8   :  { %v2098_v11 = vmax.f32 %v2091_v34, 0.0  ;;  %v3979_v34 = vld [vmem:[%s9982_s5 + $0x748] sm:$0xff] }
 0x2ca   :  { %5053 = vmatpush3.bf16.msra.mxu1 %v5052_v51  ;;  %5026 = vmatpush3.bf16.msra.mxu0 %v5025_v58  ;;  %v3973_v51 = vld [vmem:[%s9982_s5 + $0x718] sm:$0xff]  ;;  %v4022_v58 = vld [vmem:[%s9982_s5 + $0x8a0] sm:$0xff] }
 0x2cb   :  { %5054 = vmatprep.subr.bf16.mxu1 %v10535_v47  ;;  %5028 = vmatprep.subr.bf16.mxu0 %v5027_v30  ;;  %v5067_v30 = vpack.c.bf16 %v3989_v10, %v3988_v48  ;;  %v5081_v10 = vpack.c.bf16 %v3979_v34, %v3978_v56  ;;  %v4052_v56 = vld [vmem:[%s9982_s5 + $0x990] sm:$0xff] }
 0x2ce   :  { %5056 = vmatpush3.bf16.msra.mxu1 %v5055_v22  ;;  %5030 = vmatpush3.bf16.msra.mxu0 %v5029_v39  ;;  %v5069_v22 = vpack.c.bf16 %v3973_v51, %v3972_v5  ;;  %v5103_v39 = vpack.c.bf16 %v4023_v3, %v4022_v58  ;;  %v4031_v51 = vld [vmem:[%s9982_s5 + $0x8e8] sm:$0xff]  ;;  %v3998_v58 = vld [vmem:[%s9982_s5 + $0x7e0] sm:$0xff] }
 0x2cf   :  { %5057 = vmatprep.subr.bf16.mxu1 %v10535_v47  ;;  %5032 = vmatprep.subr.bf16.mxu0 %v5031_v2  ;;  %v3974_v2 = vld [vmem:[%s9982_s5 + $0x720] sm:$0xff]  ;;  %v3999_v3 = vld [vmem:[%s9982_s5 + $0x7e8] sm:$0xff] }
 0x2d0   :  { %v5073_v54 = vpack.c.bf16 %v3975_v1, %v3974_v2  ;;  %v4000_v2 = vld [vmem:[%s9982_s5 + $0x7f0] sm:$0xff] }
 0x2d2   :  { %5059 = vmatpush3.bf16.msra.mxu1 %v5058_v14  ;;  %5034 = vmatpush3.bf16.msra.mxu0 %v5033_v24  ;;  %v3992_v14 = vld [vmem:[%s9982_s5 + $0x7b0] sm:$0xff]  ;;  %v3993_v24 = vld [vmem:[%s9982_s5 + $0x7b8] sm:$0xff] }
 0x2d3   :  { %5060 = vmatprep.subr.bf16.mxu1 %v10535_v47  ;;  %5036 = vmatprep.subr.bf16.mxu0 %v5035_v18  ;;  %v4008_v18 = vld [vmem:[%s9982_s5 + $0x830] sm:$0xff]  ;;  %v5075_v59 = vpack.c.bf16 %v3993_v24, %v3992_v14  ;;  %v4017_v24 = vld [vmem:[%s9982_s5 + $0x878] sm:$0xff] }
 0x2d4   :  { %v4016_v14 = vld [vmem:[%s9982_s5 + $0x870] sm:$0xff] }
 0x2d5   :  { %v5125_v37 = vpack.c.bf16 %v4017_v24, %v4016_v14  ;;  %v5169_v14 = vpack.c.bf16 %v4073_v52, %v4072_v53  ;;  %v4083_v52 = vld [vmem:[%s9982_s5 + $0xa88] sm:$0xff] }
 0x2d6   :  { %5062 = vmatpush3.bf16.msra.mxu1 %v5061_v61  ;;  %5038 = vmatpush3.bf16.msra.mxu0 %v5037_v17  ;;  %v4027_v61 = vld [vmem:[%s9982_s5 + $0x8c8] sm:$0xff]  ;;  %v3994_v17 = vld [vmem:[%s9982_s5 + $0x7c0] sm:$0xff] }
 0x2d7   :  { %5096 = vmatprep.subr.bf16.mxu1 %v5095_v57  ;;  %5064 = vmatprep.subr.bf16.mxu0 %v5063_v28  ;;  %v5109_v57 = vpack.c.bf16 %v4009_v45, %v4008_v18  ;;  %v5111_v15 = vpack.c.bf16 %v4027_v61, %v4026_v8  ;;  %v4011_v28 = vld [vmem:[%s9982_s5 + $0x848] sm:$0xff]  ;;  %v5079_v43 = vpack.c.bf16 %v3995_v23, %v3994_v17  ;;  %v4050_v18 = vld [vmem:[%s9982_s5 + $0x980] sm:$0xff] }
 0x2d8   :  { %v5113_v48 = vpack.c.bf16 %v4011_v28, %v4010_v7  ;;  %v4051_v45 = vld [vmem:[%s9982_s5 + $0x988] sm:$0xff]  ;;  %v2090_v8 = vadd.f32 %v9254_v49, %v10579_v31  ;;  %v4066_v61 = vld [vmem:[%s9982_s5 + $0xa00] sm:$0xff]  ;;  %v2093_v28 = vadd.f32 %v9254_v49, %v9077_v46  ;;  %v4069_v46 = vld [vmem:[%s9982_s5 + $0xa18] sm:$0xff] }
 0x2d9   :  { %4751 = vmatmul.mubr.f32.vlgmr.msra.gmra.mrb[6].mxu1 %v2069_v16  ;;  %2873 = vmatmul.mubr.f32.vlgmr.msra.gmra.mrb[6].mxu0 %v2067_v50  ;;  %v5115_v16 = vpack.c.bf16 %v4029_v41, %v4028_v13  ;;  %v3981_v50 = vld [vmem:[%s9982_s5 + $0x758] sm:$0xff]  ;;  %v4067_v17 = vld [vmem:[%s9982_s5 + $0xa08] sm:$0xff]  ;;  %v10580_v23 = vld [vmem:[#allocation26_spill] sm:$0xff] }
 0x2da   :  { %5098 = vmatpush3.bf16.msra.mxu1 %v5097_v32  ;;  %3202 = vmatprep.mubr.f32.mxu1 %v2098_v11  ;;  %v3996_v32 = vld [vmem:[%s9982_s5 + $0x7d0] sm:$0xff]  ;;  %v4035_v7 = vld [vmem:[%s9982_s5 + $0x908] sm:$0xff]  ;;  %v5160_v34 = vpack.c.bf16 %v4067_v17, %v4066_v61  ;;  %v2097_v13 = vmax.f32 %v2090_v8, 0.0  ;;  %v4077_v17 = vld [vmem:[%s9982_s5 + $0xa58] sm:$0xff] }
 0x2db   :  { %5066 = vmatpush3.bf16.msra.mxu0 %v5065_v60  ;;  %3132 = vmatprep.mubr.f32.mxu0 %v2096_v33  ;;  %v4012_v60 = vld [vmem:[%s9982_s5 + $0x850] sm:$0xff]  ;;  %v5083_v5 = vpack.c.bf16 %v3997_v26, %v3996_v32  ;;  %v4015_v33 = vld [vmem:[%s9982_s5 + $0x868] sm:$0xff] }
 0x2dc   :  { %5100 = vmatprep.subr.bf16.mxu1 %v5099_v29  ;;  %5068 = vmatprep.subr.bf16.mxu0 %v5067_v30  ;;  %v4030_v29 = vld [vmem:[%s9982_s5 + $0x8e0] sm:$0xff]  ;;  %v5117_v11 = vpack.c.bf16 %v4013_v35, %v4012_v60  ;;  %v5085_v30 = vpack.c.bf16 %v3981_v50, %v3980_v9  ;;  %v5121_v1 = vpack.c.bf16 %v4015_v33, %v4014_v42  ;;  %v4068_v32 = vld [vmem:[%s9982_s5 + $0xa10] sm:$0xff]  ;;  %v2100_v60 = vmax.f32 %v2093_v28, 0.0  ;;  %v4055_v9 = vld [vmem:[%s9982_s5 + $0x9a8] sm:$0xff] }
 0x2dd   :  { %v5119_v27 = vpack.c.bf16 %v4031_v51, %v4030_v29  ;;  %v4054_v35 = vld [vmem:[%s9982_s5 + $0x9a0] sm:$0xff]  ;;  %v4071_v51 = vld [vmem:[%s9982_s5 + $0xa28] sm:$0xff]  ;;  %v4057_v42 = vld [vmem:[%s9982_s5 + $0x9b8] sm:$0xff] }
 0x2de   :  { %5102 = vmatpush3.bf16.msra.mxu1 %v5101_v12  ;;  %v3982_v12 = vld [vmem:[%s9982_s5 + $0x760] sm:$0xff]  ;;  %v4076_v61 = vld [vmem:[%s9982_s5 + $0xa50] sm:$0xff] }
 0x2df   :  { %5070 = vmatpush3.bf16.msra.mxu0 %v5069_v22  ;;  %5104 = vmatprep.subr.bf16.mxu1 %v5103_v39  ;;  %v5087_v22 = vpack.c.bf16 %v3999_v3, %v3998_v58  ;;  %v3983_v39 = vld [vmem:[%s9982_s5 + $0x768] sm:$0xff]  ;;  %v4070_v29 = vld [vmem:[%s9982_s5 + $0xa20] sm:$0xff]  ;;  %v5135_v58 = vpack.c.bf16 %v4055_v9, %v4054_v35  ;;  %v5175_v28 = vpack.c.bf16 %v4077_v17, %v4076_v61  ;;  %v4048_v35 = vld [vmem:[%s9982_s5 + $0x970] sm:$0xff] }
 0x2e0   :  { %5072 = vmatprep.subr.bf16.mxu0 %v5071_v55  ;;  %v4001_v55 = vld [vmem:[%s9982_s5 + $0x7f8] sm:$0xff]  ;;  %v5089_v36 = vpack.c.bf16 %v3983_v39, %v3982_v12  ;;  %v4038_v3 = vld [vmem:[%s9982_s5 + $0x920] sm:$0xff]  ;;  %v5166_v12 = vpack.c.bf16 %v4071_v51, %v4070_v29  ;;  %v4131_v29 = vld [vmem:[%s9982_s5 + $0xc08] sm:$0xff] }
 0x2e1   :  { %v4098_v51 = vld [vmem:[%s9982_s5 + $0xb00] sm:$0xff]  ;;  %v4103_v61 = vld [vmem:[%s9982_s5 + $0xb28] sm:$0xff] }
 0x2e2   :  { %5106 = vmatpush3.bf16.msra.mxu1 %v5105_v44  ;;  %v5091_v44 = vpack.c.bf16 %v4001_v55, %v4000_v2  ;;  %v4040_v55 = vld [vmem:[%s9982_s5 + $0x930] sm:$0xff] }
 0x2e3   :  { %5074 = vmatpush3.bf16.msra.mxu0 %v5073_v54  ;;  %5108 = vmatprep.subr.bf16.mxu1 %v5107_v0  ;;  %v3984_v54 = vld [vmem:[%s9982_s5 + $0x770] sm:$0xff]  ;;  %v3985_v0 = vld [vmem:[%s9982_s5 + $0x778] sm:$0xff] }
 0x2e4   :  { %5076 = vmatprep.subr.bf16.mxu0 %v5075_v59  ;;  %v5093_v59 = vpack.c.bf16 %v3985_v0, %v3984_v54  ;;  %v4075_v54 = vld [vmem:[%s9982_s5 + $0xa48] sm:$0xff] }
 0x2e6   :  { %5110 = vmatpush3.bf16.msra.mxu1 %v5109_v57  ;;  %v2088_v57 = vadd.f32 %v9254_v49, %v10580_v23 }
 0x2e7   :  { %5078 = vmatpush3.bf16.msra.mxu0 %v5077_v40  ;;  %5112 = vmatprep.subr.bf16.mxu1 %v5111_v15  ;;  %v5127_v40 = vpack.c.bf16 %v4051_v45, %v4050_v18  ;;  %v4034_v15 = vld [vmem:[%s9982_s5 + $0x900] sm:$0xff]  ;;  %v4043_v45 = vld [vmem:[%s9982_s5 + $0x948] sm:$0xff] }
 0x2e8   :  { %5080 = vmatprep.subr.bf16.mxu0 %v5079_v43  ;;  %v4053_v43 = vld [vmem:[%s9982_s5 + $0x998] sm:$0xff]  ;;  %v5129_v41 = vpack.c.bf16 %v4035_v7, %v4034_v15  ;;  %v2095_v26 = vmax.f32 %v2088_v57, 0.0  ;;  %v4042_v18 = vld [vmem:[%s9982_s5 + $0x940] sm:$0xff]  ;;  %v4044_v57 = vld [vmem:[%s9982_s5 + $0x950] sm:$0xff] }
 0x2e9   :  { %v5145_v8 = vpack.c.bf16 %v4043_v45, %v4042_v18  ;;  %v4062_v15 = vld [vmem:[%s9982_s5 + $0x9e0] sm:$0xff]  ;;  %v4063_v7 = vld [vmem:[%s9982_s5 + $0x9e8] sm:$0xff]  ;;  %v4085_v18 = vld [vmem:[%s9982_s5 + $0xa98] sm:$0xff] }
 0x2ea   :  { %5114 = vmatpush3.bf16.msra.mxu1 %v5113_v48  ;;  %v5131_v48 = vpack.c.bf16 %v4053_v43, %v4052_v56  ;;  %v4078_v43 = vld [vmem:[%s9982_s5 + $0xa60] sm:$0xff] }
 0x2eb   :  { %5082 = vmatpush3.bf16.msra.mxu0 %v5081_v10  ;;  %5116 = vmatprep.subr.bf16.mxu1 %v5115_v16  ;;  %v4036_v10 = vld [vmem:[%s9982_s5 + $0x910] sm:$0xff]  ;;  %v4037_v16 = vld [vmem:[%s9982_s5 + $0x918] sm:$0xff]  ;;  %v4134_v45 = vld [vmem:[%s9982_s5 + $0xc20] sm:$0xff] }
 0x2ec   :  { %5084 = vmatprep.subr.bf16.mxu0 %v5083_v5  ;;  %v5163_v5 = vpack.c.bf16 %v4069_v46, %v4068_v32  ;;  %v5133_v50 = vpack.c.bf16 %v4037_v16, %v4036_v10  ;;  %v4047_v32 = vld [vmem:[%s9982_s5 + $0x968] sm:$0xff]  ;;  %v4064_v46 = vld [vmem:[%s9982_s5 + $0x9f0] sm:$0xff] }
 0x2ed   :  { %v4080_v16 = vld [vmem:[%s9982_s5 + $0xa70] sm:$0xff] }
 0x2ee   :  { %5118 = vmatpush3.bf16.msra.mxu1 %v5117_v11  ;;  %v4039_v11 = vld [vmem:[%s9982_s5 + $0x928] sm:$0xff] }
 0x2ef   :  { %5086 = vmatpush3.bf16.msra.mxu0 %v5085_v30  ;;  %5120 = vmatprep.subr.bf16.mxu1 %v5119_v27  ;;  %v4056_v27 = vld [vmem:[%s9982_s5 + $0x9b0] sm:$0xff]  ;;  %v5137_v39 = vpack.c.bf16 %v4039_v11, %v4038_v3 }
 0x2f0   :  { %5088 = vmatprep.subr.bf16.mxu0 %v5087_v22  ;;  %v5139_v2 = vpack.c.bf16 %v4057_v42, %v4056_v27  ;;  %v4114_v42 = vld [vmem:[%s9982_s5 + $0xb80] sm:$0xff] }
 0x2f2   :  { %5122 = vmatpush3.bf16.msra.mxu1 %v5121_v1  ;;  %v4041_v1 = vld [vmem:[%s9982_s5 + $0x938] sm:$0xff] }
 0x2f3   :  { %5090 = vmatpush3.bf16.msra.mxu0 %v5089_v36  ;;  %5124 = vmatprep.subr.bf16.mxu1 %v5123_v62  ;;  %v4058_v36 = vld [vmem:[%s9982_s5 + $0x9c0] sm:$0xff]  ;;  %v4059_v62 = vld [vmem:[%s9982_s5 + $0x9c8] sm:$0xff]  ;;  %v5141_v24 = vpack.c.bf16 %v4041_v1, %v4040_v55  ;;  %v4132_v55 = vld [vmem:[%s9982_s5 + $0xc10] sm:$0xff] }
 0x2f4   :  { %5092 = vmatprep.subr.bf16.mxu0 %v5091_v44  ;;  %v4074_v44 = vld [vmem:[%s9982_s5 + $0xa40] sm:$0xff]  ;;  %v5143_v0 = vpack.c.bf16 %v4059_v62, %v4058_v36  ;;  %v4100_v36 = vld [vmem:[%s9982_s5 + $0xb10] sm:$0xff] }
 0x2f5   :  { %v5172_v31 = vpack.c.bf16 %v4075_v54, %v4074_v44  ;;  %v4084_v44 = vld [vmem:[%s9982_s5 + $0xa90] sm:$0xff] }
 0x2f6   :  { %5126 = vmatpush3.bf16.msra.mxu1 %v5125_v37  ;;  %v4060_v37 = vld [vmem:[%s9982_s5 + $0x9d0] sm:$0xff] }
 0x2f7   :  { %5094 = vmatpush3.bf16.msra.mxu0 %v5093_v59  ;;  %5159 = vmatprep.subr.bf16.mxu1 %v10535_v47  ;;  %v4061_v59 = vld [vmem:[%s9982_s5 + $0x9d8] sm:$0xff] }
 0x2f8   :  { %5128 = vmatprep.subr.bf16.mxu0 %v5127_v40  ;;  %v5147_v23 = vpack.c.bf16 %v4061_v59, %v4060_v37  ;;  %v4045_v40 = vld [vmem:[%s9982_s5 + $0x958] sm:$0xff]  ;;  %v4135_v37 = vld [vmem:[%s9982_s5 + $0xc28] sm:$0xff] }
 0x2f9   :  { %3203 = vmatmul.mubr.f32.vlgmr.msra.gmra.mrb[8].mxu1 %v2097_v13  ;;  %v5149_v56 = vpack.c.bf16 %v4045_v40, %v4044_v57  ;;  %v5151_v13 = vpack.c.bf16 %v4063_v7, %v4062_v15  ;;  %v5189_v15 = vpack.c.bf16 %v4085_v18, %v4084_v44  ;;  %v5223_v7 = vpack.c.bf16 %v4135_v37, %v4134_v45  ;;  %v4093_v44 = vld [vmem:[%s9982_s5 + $0xad8] sm:$0xff]  ;;  %v4110_v18 = vld [vmem:[%s9982_s5 + $0xb60] sm:$0xff]  ;;  %v4111_v45 = vld [vmem:[%s9982_s5 + $0xb68] sm:$0xff] }
 0x2fa   :  { %3133 = vmatmul.mubr.f32.vlgmr.msra.gmra.mrb[8].mxu0 %v2095_v26  ;;  %5161 = vmatpush3.bf16.msra.mxu1 %v5160_v34  ;;  %v4079_v34 = vld [vmem:[%s9982_s5 + $0xa68] sm:$0xff]  ;;  %v4065_v26 = vld [vmem:[%s9982_s5 + $0x9f8] sm:$0xff] }
 0x2fb   :  { %5130 = vmatpush3.bf16.msra.mxu0 %v5129_v41  ;;  %3272 = vmatprep.mubr.f32.mxu0 %v2100_v60  ;;  %v4046_v41 = vld [vmem:[%s9982_s5 + $0x960] sm:$0xff]  ;;  %v4081_v60 = vld [vmem:[%s9982_s5 + $0xa78] sm:$0xff]  ;;  %v5155_v9 = vpack.c.bf16 %v4065_v26, %v4064_v46  ;;  %v4104_v26 = vld [vmem:[%s9982_s5 + $0xb30] sm:$0xff] }
 0x2fc   :  { %5162 = vmatprep.subr.bf16.mxu1 %v10535_v47  ;;  %5132 = vmatprep.subr.bf16.mxu0 %v5131_v48  ;;  %v4227_v30 = vpop.f32.mrb[0].mxu0  ;;  %v5178_v48 = vpack.c.bf16 %v4079_v34, %v4078_v43  ;;  %v5153_v10 = vpack.c.bf16 %v4047_v32, %v4046_v41  ;;  %v5181_v3 = vpack.c.bf16 %v4081_v60, %v4080_v16  ;;  %v4086_v43 = vld [vmem:[%s9982_s5 + $0xaa0] sm:$0xff]  ;;  %v4087_v41 = vld [vmem:[%s9982_s5 + $0xaa8] sm:$0xff]  ;;  %v4136_v32 = vld [vmem:[%s9982_s5 + $0xc30] sm:$0xff] }
 0x2fd   :  { %4785 = vmatprep.mubr.msk.f32.mxu1 %vm5385_vm8, %v10577_v21  ;;  %v4228_v33 = vpop.f32.mrb[1].mxu0  ;;  %v4137_v46 = vld [vmem:[%s9982_s5 + $0xc38] sm:$0xff]  ;;  %v5193_v60 = vpack.c.bf16 %v4087_v41, %v4086_v43 }
 0x2fe   :  { %5164 = vmatpush3.bf16.msra.mxu1 %v5163_v5  ;;  %v9506_v22 = vadd.f32 %v4228_v33, %v4227_v30  ;;  %v4049_v5 = vld [vmem:[%s9982_s5 + $0x978] sm:$0xff]  ;;  %v2094_v30 = vadd.f32 %v9254_v49, %v8782_v19  ;;  %v4115_v33 = vld [vmem:[%s9982_s5 + $0xb88] sm:$0xff]  ;;  %v4082_v19 = vld [vmem:[%s9982_s5 + $0xa80] sm:$0xff] }
 0x2ff   :  { %5134 = vmatpush3.bf16.msra.mxu0 %v5133_v50  ;;  %5165 = vmatprep.subr.bf16.mxu1 %v10535_v47  ;;  %v4130_v50 = vld [vmem:[%s9982_s5 + $0xc00] sm:$0xff]  ;;  %v5157_v11 = vpack.c.bf16 %v4049_v5, %v4048_v35  ;;  %v5227_v35 = vpack.c.bf16 %v4137_v46, %v4136_v32  ;;  %v4121_v5 = vld [vmem:[%s9982_s5 + $0xbb8] sm:$0xff]  ;;  %v4096_v46 = vld [vmem:[%s9982_s5 + $0xaf0] sm:$0xff] }
 0x300   :  { %5136 = vmatprep.subr.bf16.mxu0 %v5135_v58  ;;  %v4099_v58 = vld [vmem:[%s9982_s5 + $0xb08] sm:$0xff]  ;;  %v5215_v27 = vpack.c.bf16 %v4131_v29, %v4130_v50  ;;  %v2101_v62 = vmax.f32 %v2094_v30, 0.0  ;;  %v4088_v50 = vld [vmem:[%s9982_s5 + $0xab0] sm:$0xff]  ;;  %v4089_v29 = vld [vmem:[%s9982_s5 + $0xab8] sm:$0xff] }
 0x301   :  { %v5183_v53 = vpack.c.bf16 %v4099_v58, %v4098_v51  ;;  %v4138_v51 = vld [vmem:[%s9982_s5 + $0xc40] sm:$0xff]  ;;  %v4139_v58 = vld [vmem:[%s9982_s5 + $0xc48] sm:$0xff]  ;;  %v4129_v41 = vld [vmem:[%s9982_s5 + $0xbf8] sm:$0xff] }
 0x302   :  { %5167 = vmatpush3.bf16.msra.mxu1 %v5166_v12  ;;  %v9621_v12 = vstv %s9572_s26 }
 0x303   :  { %5138 = vmatpush3.bf16.msra.mxu0 %v5137_v39  ;;  %5168 = vmatprep.subr.bf16.mxu1 %v10535_v47  ;;  %v2092_v39 = vadd.f32 %v9254_v49, %v8816_v25  ;;  %v4133_v25 = vld [vmem:[%s9982_s5 + $0xc18] sm:$0xff]  ;;  %v5217_v49 = vpack.c.bf16 %v4115_v33, %v4114_v42  ;;  %v2105_v1 = vadd.f32 %v9621_v12, %v9134_v38  ;;  %v4122_v33 = vld [vmem:[%s9982_s5 + $0xbc0] sm:$0xff] }
 0x304   :  { %5140 = vmatprep.subr.bf16.mxu0 %v5139_v2  ;;  %v2107_v2 = vadd.f32 %v9621_v12, %v9123_v63  ;;  %v4101_v63 = vld [vmem:[%s9982_s5 + $0xb18] sm:$0xff]  ;;  %v5231_v42 = vpack.c.bf16 %v4139_v58, %v4138_v51 }
 0x305   :  { %v4117_v38 = vld [vmem:[%s9982_s5 + $0xb98] sm:$0xff]  ;;  %v2099_v54 = vmax.f32 %v2092_v39, 0.0  ;;  %v4123_v39 = vld [vmem:[%s9982_s5 + $0xbc8] sm:$0xff] }
 0x306   :  { %5170 = vmatpush3.bf16.msra.mxu1 %v5169_v14  ;;  %v5185_v14 = vpack.c.bf16 %v4083_v52, %v4082_v19  ;;  %v2114_v59 = vmax.f32 %v2107_v2, 0.0  ;;  %v4091_v52 = vld [vmem:[%s9982_s5 + $0xac8] sm:$0xff]  ;;  %v4140_v2 = vld [vmem:[%s9982_s5 + $0xc50] sm:$0xff] }
 0x307   :  { %5142 = vmatpush3.bf16.msra.mxu0 %v5141_v24  ;;  %5171 = vmatprep.subr.bf16.mxu1 %v10535_v47  ;;  %v4116_v24 = vld [vmem:[%s9982_s5 + $0xb90] sm:$0xff] }
 0x308   :  { %5144 = vmatprep.subr.bf16.mxu0 %v5143_v0  ;;  %v5219_v0 = vpack.c.bf16 %v4133_v25, %v4132_v55  ;;  %v5221_v57 = vpack.c.bf16 %v4117_v38, %v4116_v24  ;;  %v4141_v55 = vld [vmem:[%s9982_s5 + $0xc58] sm:$0xff]  ;;  %v4108_v25 = vld [vmem:[%s9982_s5 + $0xb50] sm:$0xff] }
 0x309   :  { %v4092_v24 = vld [vmem:[%s9982_s5 + $0xad0] sm:$0xff] }
 0x30a   :  { %5173 = vmatpush3.bf16.msra.mxu1 %v5172_v31  ;;  %v5187_v31 = vpack.c.bf16 %v4101_v63, %v4100_v36  ;;  %v5235_v63 = vpack.c.bf16 %v4141_v55, %v4140_v2  ;;  %v4148_v55 = vld [vmem:[%s9982_s5 + $0xc90] sm:$0xff] }
 0x30b   :  { %5146 = vmatpush3.bf16.msra.mxu0 %v5145_v8  ;;  %5174 = vmatprep.subr.bf16.mxu1 %v10535_v47  ;;  %v4102_v8 = vld [vmem:[%s9982_s5 + $0xb20] sm:$0xff] }
 0x30c   :  { %5148 = vmatprep.subr.bf16.mxu0 %v5147_v23  ;;  %v2112_v23 = vmax.f32 %v2105_v1, 0.0  ;;  %v5233_v1 = vpack.c.bf16 %v4123_v39, %v4122_v33 }
 0x30e   :  { %5176 = vmatpush3.bf16.msra.mxu1 %v5175_v28  ;;  %v4118_v28 = vld [vmem:[%s9982_s5 + $0xba0] sm:$0xff] }
 0x30f   :  { %5150 = vmatpush3.bf16.msra.mxu0 %v5149_v56  ;;  %5177 = vmatprep.subr.bf16.mxu1 %v10535_v47  ;;  %v4119_v56 = vld [vmem:[%s9982_s5 + $0xba8] sm:$0xff] }
 0x310   :  { %5152 = vmatprep.subr.bf16.mxu0 %v5151_v13  ;;  %v5191_v13 = vpack.c.bf16 %v4103_v61, %v4102_v8  ;;  %v5225_v16 = vpack.c.bf16 %v4119_v56, %v4118_v28  ;;  %v4126_v8 = vld [vmem:[%s9982_s5 + $0xbe0] sm:$0xff]  ;;  %v4127_v61 = vld [vmem:[%s9982_s5 + $0xbe8] sm:$0xff]  ;;  %v4113_v28 = vld [vmem:[%s9982_s5 + $0xb78] sm:$0xff] }
 0x311   :  { %v5241_v56 = vpack.c.bf16 %v4127_v61, %v4126_v8  ;;  %v4153_v61 = vld [vmem:[%s9982_s5 + $0xcb8] sm:$0xff] }
 0x312   :  { %5179 = vmatpush3.bf16.msra.mxu1 %v5178_v48  ;;  %v4105_v48 = vld [vmem:[%s9982_s5 + $0xb38] sm:$0xff] }
 0x313   :  { %5154 = vmatpush3.bf16.msra.mxu0 %v5153_v10  ;;  %5180 = vmatprep.subr.bf16.mxu1 %v10535_v47 }
 0x314   :  { %5156 = vmatprep.subr.bf16.mxu0 %v5155_v9  ;;  %v4120_v9 = vld [vmem:[%s9982_s5 + $0xbb0] sm:$0xff] }
 0x315   :  { %v5229_v30 = vpack.c.bf16 %v4121_v5, %v4120_v9  ;;  %v10581_v9 = vld [vmem:[#allocation66_spill] sm:$0xff] }
 0x316   :  { %5182 = vmatpush3.bf16.msra.mxu1 %v5181_v3  ;;  %v4106_v3 = vld [vmem:[%s9982_s5 + $0xb40] sm:$0xff]  ;;  %v2106_v5 = vadd.f32 %v9621_v12, %v10581_v9  ;;  %v4175_v9 = vld [vmem:[%s9982_s5 + $0xd68] sm:$0xff] }
 0x317   :  { %5158 = vmatpush3.bf16.msra.mxu0 %v5157_v11  ;;  %5216 = vmatprep.subr.bf16.mxu1 %v5215_v27  ;;  %v4107_v11 = vld [vmem:[%s9982_s5 + $0xb48] sm:$0xff]  ;;  %v5197_v27 = vpack.c.bf16 %v4089_v29, %v4088_v50  ;;  %v4178_v50 = vld [vmem:[%s9982_s5 + $0xd80] sm:$0xff] }
 0x318   :  { %5184 = vmatprep.subr.bf16.mxu0 %v5183_v53  ;;  %v4090_v53 = vld [vmem:[%s9982_s5 + $0xac0] sm:$0xff]  ;;  %v5199_v19 = vpack.c.bf16 %v4107_v11, %v4106_v3  ;;  %v10582_v29 = vld [vmem:[#allocation63_spill] sm:$0xff]  ;;  %v2113_v39 = vmax.f32 %v2106_v5, 0.0 }
 0x319   :  { %4786 = vmatmul.mubr.f32.vlgmr.msra.gmra.mrb[10].mxu1 %v2101_v62  ;;  %v4262_v17 = vpop.f32.mrb[0].mxu1  ;;  %v5201_v36 = vpack.c.bf16 %v4091_v52, %v4090_v53  ;;  %v4124_v62 = vld [vmem:[%s9982_s5 + $0xbd0] sm:$0xff]  ;;  %v2104_v51 = vadd.f32 %v9621_v12, %v10582_v29  ;;  %v4146_v3 = vld [vmem:[%s9982_s5 + $0xc80] sm:$0xff]  ;;  %v4147_v11 = vld [vmem:[%s9982_s5 + $0xc88] sm:$0xff] }
 0x31a   :  { %3273 = vmatmul.mubr.f32.vlgmr.msra.gmra.mrb[10].mxu0 %v2099_v54  ;;  %5218 = vmatpush3.bf16.msra.mxu1 %v5217_v49  ;;  %v4263_v40 = vpop.f32.mrb[1].mxu1  ;;  %v4109_v49 = vld [vmem:[%s9982_s5 + $0xb58] sm:$0xff]  ;;  %v4142_v54 = vld [vmem:[%s9982_s5 + $0xc60] sm:$0xff]  ;;  %v5249_v53 = vpack.c.bf16 %v4147_v11, %v4146_v3  ;;  %v4191_v29 = vld [vmem:[%s9982_s5 + $0xde8] sm:$0xff] }
 0x31b   :  { %3603 = vmatprep.mubr.f32.mxu1 %v2114_v59  ;;  %5186 = vmatpush3.bf16.msra.mxu0 %v5185_v14  ;;  %v4264_v34 = vadd.f32 %v4263_v40, %v4262_v17  ;;  %v4125_v14 = vld [vmem:[%s9982_s5 + $0xbd8] sm:$0xff]  ;;  %v5203_v38 = vpack.c.bf16 %v4109_v49, %v4108_v25  ;;  %v5205_v59 = vpack.c.bf16 %v4093_v44, %v4092_v24  ;;  %v4094_v17 = vld [vmem:[%s9982_s5 + $0xae0] sm:$0xff]  ;;  %v4144_v40 = vld [vmem:[%s9982_s5 + $0xc70] sm:$0xff]  ;;  %v2111_v52 = vmax.f32 %v2104_v51, 0.0 }
 0x31c   :  { %3533 = vmatprep.mubr.f32.mxu0 %v2112_v23  ;;  %5220 = vmatprep.subr.bf16.mxu1 %v5219_v0  ;;  %v4143_v0 = vld [vmem:[%s9982_s5 + $0xc68] sm:$0xff]  ;;  %v5237_v37 = vpack.c.bf16 %v4125_v14, %v4124_v62  ;;  %v5207_v23 = vpack.c.bf16 %v4111_v45, %v4110_v18  ;;  %v4149_v25 = vld [vmem:[%s9982_s5 + $0xc98] sm:$0xff]  ;;  %v4182_v14 = vld [vmem:[%s9982_s5 + $0xda0] sm:$0xff] }
 0x31d   :  { %5188 = vmatprep.subr.bf16.mxu0 %v5187_v31  ;;  %v9696_v10 = vadd.f32 %v4264_v34, %v9506_v22  ;;  %v5195_v22 = vpack.c.bf16 %v4105_v48, %v4104_v26  ;;  %v5239_v31 = vpack.c.bf16 %v4143_v0, %v4142_v54  ;;  %v4097_v26 = vld [vmem:[%s9982_s5 + $0xaf8] sm:$0xff]  ;;  %v4162_v48 = vld [vmem:[%s9982_s5 + $0xd00] sm:$0xff]  ;;  %v5253_v62 = vpack.c.bf16 %v4149_v25, %v4148_v55  ;;  %v4183_v24 = vld [vmem:[%s9982_s5 + $0xda8] sm:$0xff] }
 0x31e   :  { %5222 = vmatpush3.bf16.msra.mxu1 %v5221_v57  ;;  %v4095_v57 = vld [vmem:[%s9982_s5 + $0xae8] sm:$0xff]  ;;  %v4150_v44 = vld [vmem:[%s9982_s5 + $0xca0] sm:$0xff]  ;;  %v4168_v0 = vld [vmem:[%s9982_s5 + $0xd30] sm:$0xff]  ;;  %v5286_v45 = vpack.c.bf16 %v4183_v24, %v4182_v14  ;;  %v2110_v55 = vadd.f32 %v9621_v12, %v8784_v20  ;;  %v2108_v25 = vadd.f32 %v9621_v12, %v8824_v4 }
 0x31f   :  { %5190 = vmatpush3.bf16.msra.mxu0 %v5189_v15  ;;  %5224 = vmatprep.subr.bf16.mxu1 %v5223_v7  ;;  %v4145_v15 = vld [vmem:[%s9982_s5 + $0xc78] sm:$0xff]  ;;  %v4112_v7 = vld [vmem:[%s9982_s5 + $0xb70] sm:$0xff]  ;;  %v5209_v43 = vpack.c.bf16 %v4095_v57, %v4094_v17  ;;  %v4151_v54 = vld [vmem:[%s9982_s5 + $0xca8] sm:$0xff] }
 0x320   :  { %5192 = vmatprep.subr.bf16.mxu0 %v5191_v13  ;;  %v5243_v34 = vpack.c.bf16 %v4145_v15, %v4144_v40  ;;  %v4128_v13 = vld [vmem:[%s9982_s5 + $0xbf0] sm:$0xff]  ;;  %v5211_v32 = vpack.c.bf16 %v4113_v28, %v4112_v7  ;;  %v4169_v18 = vld [vmem:[%s9982_s5 + $0xd38] sm:$0xff]  ;;  %v4170_v17 = vld [vmem:[%s9982_s5 + $0xd40] sm:$0xff] }
 0x321   :  { %v5259_v8 = vpack.c.bf16 %v4169_v18, %v4168_v0  ;;  %v4186_v15 = vld [vmem:[%s9982_s5 + $0xdc0] sm:$0xff]  ;;  %v4187_v7 = vld [vmem:[%s9982_s5 + $0xdc8] sm:$0xff]  ;;  %v4176_v11 = vld [vmem:[%s9982_s5 + $0xd70] sm:$0xff] }
 0x322   :  { %5226 = vmatpush3.bf16.msra.mxu1 %v5225_v16  ;;  %v4163_v16 = vld [vmem:[%s9982_s5 + $0xd08] sm:$0xff] }
 0x323   :  { %5194 = vmatpush3.bf16.msra.mxu0 %v5193_v60  ;;  %5228 = vmatprep.subr.bf16.mxu1 %v5227_v35  ;;  %v5245_v60 = vpack.c.bf16 %v4129_v41, %v4128_v13  ;;  %v5213_v35 = vpack.c.bf16 %v4097_v26, %v4096_v46  ;;  %v5247_v58 = vpack.c.bf16 %v4163_v16, %v4162_v48  ;;  %v4173_v13 = vld [vmem:[%s9982_s5 + $0xd58] sm:$0xff]  ;;  %v4188_v46 = vld [vmem:[%s9982_s5 + $0xdd0] sm:$0xff]  ;;  %v4159_v3 = vld [vmem:[%s9982_s5 + $0xce8] sm:$0xff] }
 0x324   :  { %5196 = vmatprep.subr.bf16.mxu0 %v5195_v22  ;;  %v4179_v22 = vld [vmem:[%s9982_s5 + $0xd88] sm:$0xff]  ;;  %v5292_v41 = vpack.c.bf16 %v4187_v7, %v4186_v15  ;;  %v4189_v26 = vld [vmem:[%s9982_s5 + $0xdd8] sm:$0xff]  ;;  %v4156_v16 = vld [vmem:[%s9982_s5 + $0xcd0] sm:$0xff] }
 0x325   :  { %v5280_v33 = vpack.c.bf16 %v4179_v22, %v4178_v50  ;;  %v5295_v5 = vpack.c.bf16 %v4189_v26, %v4188_v46  ;;  %v4190_v22 = vld [vmem:[%s9982_s5 + $0xde0] sm:$0xff] }
 0x326   :  { %5230 = vmatpush3.bf16.msra.mxu1 %v5229_v30  ;;  %v2109_v30 = vadd.f32 %v9621_v12, %v9190_v6  ;;  %v4181_v6 = vld [vmem:[%s9982_s5 + $0xd98] sm:$0xff] }
 0x327   :  { %5198 = vmatpush3.bf16.msra.mxu0 %v5197_v27  ;;  %5232 = vmatprep.subr.bf16.mxu1 %v5231_v42  ;;  %v4164_v27 = vld [vmem:[%s9982_s5 + $0xd10] sm:$0xff]  ;;  %v4165_v42 = vld [vmem:[%s9982_s5 + $0xd18] sm:$0xff] }
 0x328   :  { %5200 = vmatprep.subr.bf16.mxu0 %v5199_v19  ;;  %v4180_v19 = vld [vmem:[%s9982_s5 + $0xd90] sm:$0xff]  ;;  %v5251_v2 = vpack.c.bf16 %v4165_v42, %v4164_v27  ;;  %v2116_v49 = vmax.f32 %v2109_v30, 0.0  ;;  %v4177_v30 = vld [vmem:[%s9982_s5 + $0xd78] sm:$0xff]  ;;  %v5298_v27 = vpack.c.bf16 %v4191_v29, %v4190_v22 }
 0x32a   :  { %5234 = vmatpush3.bf16.msra.mxu1 %v5233_v1  ;;  %v4166_v1 = vld [vmem:[%s9982_s5 + $0xd20] sm:$0xff] }
 0x32b   :  { %5202 = vmatpush3.bf16.msra.mxu0 %v5201_v36  ;;  %5236 = vmatprep.subr.bf16.mxu1 %v5235_v63  ;;  %v4167_v36 = vld [vmem:[%s9982_s5 + $0xd28] sm:$0xff]  ;;  %v5283_v63 = vpack.c.bf16 %v4181_v6, %v4180_v19  ;;  %v4160_v19 = vld [vmem:[%s9982_s5 + $0xcf0] sm:$0xff]  ;;  %v4161_v6 = vld [vmem:[%s9982_s5 + $0xcf8] sm:$0xff] }
 0x32c   :  { %5204 = vmatprep.subr.bf16.mxu0 %v5203_v38  ;;  %v5255_v38 = vpack.c.bf16 %v4167_v36, %v4166_v1  ;;  %v2115_v1 = vmax.f32 %v2108_v25, 0.0 }
 0x32e   :  { %5238 = vmatpush3.bf16.msra.mxu1 %v5237_v37  ;;  %v5257_v37 = vpack.c.bf16 %v4151_v54, %v4150_v44 }
 0x32f   :  { %5206 = vmatpush3.bf16.msra.mxu0 %v5205_v59  ;;  %5240 = vmatprep.subr.bf16.mxu1 %v5239_v31  ;;  %v4184_v59 = vld [vmem:[%s9982_s5 + $0xdb0] sm:$0xff]  ;;  %v4185_v31 = vld [vmem:[%s9982_s5 + $0xdb8] sm:$0xff] }
 0x330   :  { %5208 = vmatprep.subr.bf16.mxu0 %v5207_v23  ;;  %v4171_v23 = vld [vmem:[%s9982_s5 + $0xd48] sm:$0xff]  ;;  %v5289_v57 = vpack.c.bf16 %v4185_v31, %v4184_v59 }
 0x331   :  { %v5263_v28 = vpack.c.bf16 %v4171_v23, %v4170_v17 }
 0x332   :  { %5242 = vmatpush3.bf16.msra.mxu1 %v5241_v56  ;;  %v4154_v56 = vld [vmem:[%s9982_s5 + $0xcc0] sm:$0xff] }
 0x333   :  { %5210 = vmatpush3.bf16.msra.mxu0 %v5209_v43  ;;  %5244 = vmatprep.subr.bf16.mxu1 %v5243_v34  ;;  %v4155_v43 = vld [vmem:[%s9982_s5 + $0xcc8] sm:$0xff]  ;;  %v4172_v34 = vld [vmem:[%s9982_s5 + $0xd50] sm:$0xff] }
 0x334   :  { %5212 = vmatprep.subr.bf16.mxu0 %v5211_v32  ;;  %v5265_v32 = vpack.c.bf16 %v4155_v43, %v4154_v56  ;;  %v5267_v48 = vpack.c.bf16 %v4173_v13, %v4172_v34 }
 0x336   :  { %5246 = vmatpush3.bf16.msra.mxu1 %v5245_v60  ;;  %v4157_v60 = vld [vmem:[%s9982_s5 + $0xcd8] sm:$0xff] }
 0x337   :  { %5214 = vmatpush3.bf16.msra.mxu0 %v5213_v35  ;;  %5279 = vmatprep.subr.bf16.mxu1 %v10535_v47  ;;  %v4174_v35 = vld [vmem:[%s9982_s5 + $0xd60] sm:$0xff]  ;;  %v5269_v50 = vpack.c.bf16 %v4157_v60, %v4156_v16 }
 0x338   :  { %5248 = vmatprep.subr.bf16.mxu0 %v5247_v58  ;;  %v5271_v51 = vpack.c.bf16 %v4175_v9, %v4174_v35  ;;  %v4158_v58 = vld [vmem:[%s9982_s5 + $0xce0] sm:$0xff] }
 0x339   :  { %3604 = vmatmul.mubr.f32.vlgmr.msra.gmra.mrb[12].mxu1 %v2113_v39  ;;  %v5273_v42 = vpack.c.bf16 %v4159_v3, %v4158_v58  ;;  %v4193_v39 = vld [vmem:[%s9982_s5 + $0xdf8] sm:$0xff] }
 0x33a   :  { %3534 = vmatmul.mubr.f32.vlgmr.msra.gmra.mrb[12].mxu0 %v2111_v52  ;;  %5281 = vmatpush3.bf16.msra.mxu1 %v5280_v33  ;;  %v4192_v33 = vld [vmem:[%s9982_s5 + $0xdf0] sm:$0xff] }
 0x33b   :  { %5250 = vmatpush3.bf16.msra.mxu0 %v5249_v53  ;;  %3673 = vmatprep.mubr.f32.mxu0 %v2116_v49  ;;  %v5275_v53 = vpack.c.bf16 %v4177_v30, %v4176_v11  ;;  %v5301_v52 = vpack.c.bf16 %v4193_v39, %v4192_v33  ;;  %v2117_v49 = vmax.f32 %v2110_v55, 0.0 }
 0x33c   :  { %5282 = vmatprep.subr.bf16.mxu1 %v10535_v47  ;;  %5252 = vmatprep.subr.bf16.mxu0 %v5251_v2  ;;  %v5277_v2 = vpack.c.bf16 %v4161_v6, %v4160_v19 }
 0x33d   :  { %4820 = vmatprep.mubr.msk.f32.mxu1 %vm5385_vm8, %v10577_v21  ;;  %v4152_v21 = vld [vmem:[%s9982_s5 + $0xcb0] sm:$0xff] }
 0x33e   :  { %5284 = vmatpush3.bf16.msra.mxu1 %v5283_v63  ;;  %v5261_v40 = vpack.c.bf16 %v4153_v61, %v4152_v21 }
 0x33f   :  { %5254 = vmatpush3.bf16.msra.mxu0 %v5253_v62  ;;  %5285 = vmatprep.subr.bf16.mxu1 %v10535_v47 }
 0x340   :  { %5256 = vmatprep.subr.bf16.mxu0 %v5255_v38 }
 0x342   :  { %5287 = vmatpush3.bf16.msra.mxu1 %v5286_v45 }
 0x343   :  { %5258 = vmatpush3.bf16.msra.mxu0 %v5257_v37  ;;  %5288 = vmatprep.subr.bf16.mxu1 %v10535_v47 }
 0x344   :  { %5260 = vmatprep.subr.bf16.mxu0 %v5259_v8 }
 0x346   :  { %5290 = vmatpush3.bf16.msra.mxu1 %v5289_v57 }
 0x347   :  { %5262 = vmatpush3.bf16.msra.mxu0 %v5261_v40  ;;  %5291 = vmatprep.subr.bf16.mxu1 %v10535_v47 }
 0x348   :  { %5264 = vmatprep.subr.bf16.mxu0 %v5263_v28 }
 0x34a   :  { %5293 = vmatpush3.bf16.msra.mxu1 %v5292_v41 }
 0x34b   :  { %5266 = vmatpush3.bf16.msra.mxu0 %v5265_v32  ;;  %5294 = vmatprep.subr.bf16.mxu1 %v10535_v47 }
 0x34c   :  { %5268 = vmatprep.subr.bf16.mxu0 %v5267_v48 }
 0x34e   :  { %5296 = vmatpush3.bf16.msra.mxu1 %v5295_v5 }
 0x34f   :  { %5270 = vmatpush3.bf16.msra.mxu0 %v5269_v50  ;;  %5297 = vmatprep.subr.bf16.mxu1 %v10535_v47 }
 0x350   :  { %5272 = vmatprep.subr.bf16.mxu0 %v5271_v51 }
 0x352   :  { %5299 = vmatpush3.bf16.msra.mxu1 %v5298_v27  ;;  %v4194_v27 = vld [vmem:[%s9983_s6] ss:$0 sm:$0xff] }
 0x353   :  { %5274 = vmatpush3.bf16.msra.mxu0 %v5273_v42  ;;  %5300 = vmatprep.subr.bf16.mxu1 %v10535_v47 }
 0x354   :  { %5276 = vmatprep.subr.bf16.mxu0 %v5275_v53 }
 0x356   :  { %5302 = vmatpush3.bf16.msra.mxu1 %v5301_v52 }
 0x357   :  { %5278 = vmatpush3.bf16.msra.mxu0 %v5277_v2 }
 0x359   :  { %4821 = vmatmul.mubr.f32.vlgmr.msra.gmra.mrb[14].mxu1 %v2117_v49 }
 0x35a   :  { %3674 = vmatmul.mubr.f32.vlgmr.msra.gmra.mrb[14].mxu0 %v2115_v1 }
 0x36c   :  { %v2664_v36 = vpop.f32.mrb[2].mxu1  ;;  %v4297_v63 = vpop.f32.mrb[2].mxu0 }
 0x36d   :  { %v4717_v62 = vpop.f32.mrb[3].mxu1  ;;  %v4298_v14 = vpop.f32.mrb[3].mxu0 }
 0x36e   :  { %v4299_v24 = vadd.f32 %v4298_v14, %v4297_v63 }
 0x370   :  { %v2595_v47 = vadd.f32 %v4299_v24, %v9696_v10 }
 0x372   :  { %v2665_v38 = vadd.f32 %v2664_v36, %v2595_v47 }
 0x38c   :  { %v4384_v44 = vpop.f32.mrb[4].mxu1  ;;  %v4349_v20 = vpop.f32.mrb[4].mxu0 }
 0x38d   :  { %v4385_v54 = vpop.f32.mrb[5].mxu1  ;;  %v4350_v18 = vpop.f32.mrb[5].mxu0 }
 0x38e   :  { %v4386_v0 = vadd.f32 %v4385_v54, %v4384_v44  ;;  %v4351_v4 = vadd.f32 %v4350_v18, %v4349_v20 }
 0x390   :  { %v2735_v12 = vadd.f32 %v4351_v4, %v2665_v38 }
 0x392   :  { %v2805_v45 = vadd.f32 %v4386_v0, %v2735_v12 }
 0x3ac   :  { %v2944_v37 = vpop.f32.mrb[6].mxu1  ;;  %v4419_v59 = vpop.f32.mrb[6].mxu0 }
 0x3ad   :  { %v4752_v31 = vpop.f32.mrb[7].mxu1  ;;  %v4420_v8 = vpop.f32.mrb[7].mxu0 }
 0x3ae   :  { %v4421_v21 = vadd.f32 %v4420_v8, %v4419_v59 }
 0x3b0   :  { %v2875_v61 = vadd.f32 %v4421_v21, %v2805_v45 }
 0x3b2   :  { %v2945_v17 = vadd.f32 %v2944_v37, %v2875_v61 }
 0x3cc   :  { %v4506_v23 = vpop.f32.mrb[8].mxu1 }
 0x3cd   :  { %v4471_v57 = vpop.f32.mrb[8].mxu0  ;;  %v4507_v40 = vpop.f32.mrb[9].mxu1 }
 0x3ce   :  { %v4508_v10 = vadd.f32 %v4507_v40, %v4506_v23  ;;  %v4472_v15 = vpop.f32.mrb[9].mxu0 }
 0x3cf   :  { %v4473_v7 = vadd.f32 %v4472_v15, %v4471_v57 }
 0x3d1   :  { %v3205_v28 = vadd.f32 %v4508_v10, %v4473_v7 }
 0x3ec   :  { %v3344_v56 = vpop.f32.mrb[10].mxu1 }
 0x3ed   :  { %v4541_v43 = vpop.f32.mrb[10].mxu0  ;;  %v4787_v34 = vpop.f32.mrb[11].mxu1 }
 0x3ee   :  { %v4542_v13 = vpop.f32.mrb[11].mxu0 }
 0x3ef   :  { %v4543_v41 = vadd.f32 %v4542_v13, %v4541_v43 }
 0x3f1   :  { %v3275_v32 = vadd.f32 %v4543_v41, %v3205_v28 }
 0x3f3   :  { %v3345_v46 = vadd.f32 %v3344_v56, %v3275_v32 }
 0x3f5   :  { %v3348_v26 = vadd.f32 %v3345_v46, %v2945_v17 }
 0x40c   :  { %v4628_v48 = vpop.f32.mrb[12].mxu1 }
 0x40d   :  { %v4593_v16 = vpop.f32.mrb[12].mxu0  ;;  %v4629_v60 = vpop.f32.mrb[13].mxu1 }
 0x40e   :  { %v4630_v35 = vadd.f32 %v4629_v60, %v4628_v48  ;;  %v4594_v9 = vpop.f32.mrb[13].mxu0 }
 0x40f   :  { %v4595_v5 = vadd.f32 %v4594_v9, %v4593_v16 }
 0x411   :  { %v3606_v50 = vadd.f32 %v4630_v35, %v4595_v5 }
 0x42c   :  { %v3745_v22 = vpop.f32.mrb[14].mxu1 }
 0x42d   :  { %v4663_v29 = vpop.f32.mrb[14].mxu0  ;;  %v4822_v51 = vpop.f32.mrb[15].mxu1 }
 0x42e   :  { %v4664_v58 = vpop.f32.mrb[15].mxu0 }
 0x42f   :  { %v4665_v3 = vadd.f32 %v4664_v58, %v4663_v29 }
 0x431   :  { %v3676_v11 = vadd.f32 %v4665_v3, %v3606_v50 }
 0x433   :  { %v3746_v30 = vadd.f32 %v3745_v22, %v3676_v11 }
 0x435   :  { %v3749_v42 = vadd.f32 %v3746_v30, %v3348_v26 }
 0x437   :  { %v3757_v33 = vadd.f32 %v4194_v27, %v3749_v42 }
 0x439   :  { %3758 = vst [vmem:[%s9984_s7] sm:$0xff] %v3757_v33 }
 0x43a   :  { %3763 = vsyncpa [#allocation5], 1 }
 0x43b   :  { %3764 = vsyncpa [#allocation7], 1 }
 0x43c   :  { %3765 = vsyncpa [#allocation10], 1 }

</bundles_post_ra>
